<compile_context>
chip_gen: v7x
topology: tpu7x:2x2x1
jax: 0.10.0
libtpu: 0.0.40
codegen_flags: <defaults>
</compile_context>

<pallas_src>
import functools

import jax
import jax.numpy as jnp
import numpy as np
from jax.experimental import pallas as pl
from jax.experimental.pallas import tpu as pltpu

_LANE = 128   # lane width of the packed output slabs / fused head
_BB = 32      # batch rows per grid step (multiple of 16 for bf16 sublane packing)

_COMPILER_PARAMS = pltpu.CompilerParams(dimension_semantics=("parallel",))


# ----------------------------------------------------------------------------
# Fused kernel
# ----------------------------------------------------------------------------
def _fused_agent_kernel(
    x_ref, w1_ref, b1_ref, w2_ref, b2_ref, fc_ref, fcb_ref,
    wcat_ref, lb_ref, state_in_ref, headw_ref, headb_ref, tab_ref,
    logsm_ref, scalar_ref, state_ref,
    *, bb, n1, n2, c1, c2, hidden, num_layers, num_logits):
    f32 = jnp.float32
    bf16 = jnp.bfloat16
    k = w1_ref.shape[0]                       # conv kernel height (3)

    # ---- conv1 (3x3 valid) as banded matmuls; rows = out_row*bb + batch ----
    xs = x_ref[0]                             # (in_h*bb, in_w*cin_pad), bf16
    acc1 = jnp.zeros((n1 * bb, n1 * c1), f32)
    for ki in range(k):
        acc1 = acc1 + jnp.dot(xs[ki * bb:ki * bb + n1 * bb, :], w1_ref[ki],
                              preferred_element_type=f32)
    h1 = jnp.maximum(acc1 + b1_ref[...], 0.0).astype(bf16)   # cast ONCE

    # ---- conv2 ----
    acc2 = jnp.zeros((n2 * bb, n2 * c2), f32)
    for ki in range(k):
        acc2 = acc2 + jnp.dot(h1[ki * bb:ki * bb + n2 * bb, :], w2_ref[ki],
                              preferred_element_type=f32)
    h2 = jnp.maximum(acc2 + b2_ref[...], 0.0).astype(bf16)   # cast ONCE

    # ---- FC over the flattened (row, col, channel) features: ONE MXU pass ----
    # fc_ref is block-column packed: column block r holds the weights for
    # spatial row r, so enc = sum_r fc_res[r-th row block, r-th column block].
    fc_res = jnp.dot(h2, fc_ref[...], preferred_element_type=f32)  # (n2*bb, n2*H)
    enc = fc_res[0:bb, 0:hidden]
    for r in range(1, n2):
        enc = enc + fc_res[r * bb:(r + 1) * bb, r * hidden:(r + 1) * hidden]
    enc = jnp.maximum(enc + fcb_ref[...], 0.0)                # (bb, hidden) f32

    # ---- _core_ : stacked LSTM, single step, torch gate order (i, f, g, o) --
    # State arrives as the lane-dense slab [h0|h1|...|c0|c1|...] (bb, 128).
    st_in = state_in_ref[...]
    new_h, new_c = [], []
    layer_in = enc
    for layer in range(num_layers):
        h_prev = st_in[:, layer * hidden:(layer + 1) * hidden]
        c_prev = st_in[:, (num_layers + layer) * hidden:
                          (num_layers + layer + 1) * hidden]
        # fused w_ih|w_hh matmul: one MXU pass per layer (K = 2*hidden)
        xh = jnp.concatenate([layer_in, h_prev], axis=-1).astype(bf16)
        gates = (jnp.dot(xh, wcat_ref[layer], preferred_element_type=f32)
                 + lb_ref[layer])                              # (bb, 4*hidden)
        # full-vreg transcendentals, then cheap 32-lane slices
        sig = jax.nn.sigmoid(gates)
        tng = jnp.tanh(gates)
        i_g = sig[:, 0 * hidden:1 * hidden]
        f_g = sig[:, 1 * hidden:2 * hidden]
        g_g = tng[:, 2 * hidden:3 * hidden]
        o_g = sig[:, 3 * hidden:4 * hidden]
        c_n = f_g * c_prev + i_g * g_g
        h_n = o_g * jnp.tanh(c_n)
        new_h.append(h_n)
        new_c.append(c_n)
        layer_in = h_n
    core_out = layer_in

    # ---- fused value + action head (lane-dense, 128 wide) ----
    # cols [0:A) = action logits, col A = value, rest = padding
    head = (jnp.dot(core_out.astype(bf16), headw_ref[...],
                    preferred_element_type=f32) + headb_ref[...])   # (bb, 128)
    value = head[:, num_logits:num_logits + 1]                      # (bb, 1)

    lane = jax.lax.broadcasted_iota(jnp.int32, (bb, _LANE), 1)
    lane_f = lane.astype(f32)
    valid = lane < num_logits
    masked = jnp.where(valid, head, -1e30)
    m = jnp.max(masked, axis=-1, keepdims=True)
    z = masked - m
    ez = jnp.exp(z)
    s = jnp.sum(ez, axis=-1, keepdims=True)
    logsm = z - jnp.log(s)                                          # log_softmax
    probs = ez / s
    entropy = -jnp.sum(jnp.where(valid, probs * logsm, 0.0),
                       axis=-1, keepdims=True)                      # (bb, 1)

    # TODO(synk): torch.multinomial sampling replaced by deterministic argmax.
    is_max = masked == m
    idx_f = jnp.min(jnp.where(is_max, lane_f, float(_LANE)),
                    axis=-1, keepdims=True)                         # (bb, 1)
    sel = (lane_f == idx_f).astype(f32)                             # one-hot
    logprob = jnp.sum(sel * logsm, axis=-1, keepdims=True)

    # _convert_logit_index_to_action via the padded lookup table (2, 128)
    tab = tab_ref[...]
    a_type = jnp.sum(sel * tab[0:1, :], axis=-1, keepdims=True)
    a_param = jnp.sum(sel * tab[1:2, :], axis=-1, keepdims=True)

    logsm_ref[...] = logsm
    scalar_ref[...] = (jnp.where(lane == 0, value, 0.0)
                       + jnp.where(lane == 1, entropy, 0.0)
                       + jnp.where(lane == 2, logprob, 0.0)
                       + jnp.where(lane == 3, idx_f, 0.0)
                       + jnp.where(lane == 4, a_type, 0.0)
                       + jnp.where(lane == 5, a_param, 0.0))

    pieces = new_h + new_c
    width = 2 * num_layers * hidden
    if width < _LANE:
        pieces = pieces + [jnp.zeros((bb, _LANE - width), f32)]
    state_ref[...] = jnp.concatenate(pieces, axis=-1)


# ----------------------------------------------------------------------------
# Parameters (logical, torch-like) + offline packing into kernel layout
# ----------------------------------------------------------------------------
def init_params(key, c_in, hw, hidden, num_layers, num_logits):
    ks = list(jax.random.split(key, 16))

    def nrm(k_, shape, scale=0.1):
        return (scale * jax.random.normal(k_, shape)).astype(jnp.float32)

    n1 = hw - 2
    n2 = n1 - 2
    flat = 32 * n2 * n2          # flatten order in this implementation: (h, w, c)
    params = {
        "conv1_w": nrm(ks[0], (16, c_in, 3, 3)),
        "conv1_b": nrm(ks[1], (16,)),
        "conv2_w": nrm(ks[2], (32, 16, 3, 3)),
        "conv2_b": nrm(ks[3], (32,)),
        "fc_w": nrm(ks[4], (flat, hidden)),
        "fc_b": nrm(ks[5], (1, hidden)),
        "value_w": nrm(ks[10], (hidden, 1)),
        "value_b": nrm(ks[11], (1, 1)),
        "action_w": nrm(ks[12], (hidden, num_logits)),
        "action_b": nrm(ks[13], (1, num_logits)),
        "lstm": [],
    }
    kl = jax.random.split(ks[6], num_layers * 3)
    for layer in range(num_layers):
        params["lstm"].append({
            "w_ih": nrm(kl[3 * layer + 0], (hidden, 4 * hidden)),
            "w_hh": nrm(kl[3 * layer + 1], (hidden, 4 * hidden)),
            "b": nrm(kl[3 * layer + 2], (1, 4 * hidden)),   # b_ih + b_hh folded
        })
    return params


def build_action_index(action_max_params):
    # mirrors MettaAgent.activate_actions
    rows = []
    for a_type, max_p in enumerate(action_max_params):
        for j in range(max_p + 1):
            rows.append([a_type, j])
    return np.asarray(rows, dtype=np.int32)


def pack_params(params, action_index, *, c_in, hw):
    """Pack logical params into the fused-kernel layout (all offline, one time)."""
    k = 3
    c1, c2 = 16, 32
    n1, n2 = hw - 2, hw - 4
    cin_pad = max(8, ((c_in + 7) // 8) * 8)

    w1 = np.asarray(params["conv1_w"], np.float32)
    b1 = np.asarray(params["conv1_b"], np.float32)
    w2 = np.asarray(params["conv2_w"], np.float32)
    b2 = np.asarray(params["conv2_b"], np.float32)

    # Banded (Toeplitz) conv weights:
    #   conv1: (in_w*cin_pad) -> (out_w*c1), one band per kernel row ki
    w1_band = np.zeros((k, hw * cin_pad, n1 * c1), np.float32)
    for ki in range(k):
        for kj in range(k):
            for c in range(c_in):
                for j in range(n1):
                    w = j + kj
                    w1_band[ki, w * cin_pad + c, j * c1:(j + 1) * c1] = w1[:, c, ki, kj]
    b1_row = np.tile(b1, n1)[None, :]

    w2_band = np.zeros((k, n1 * c1, n2 * c2), np.float32)
    for ki in range(k):
        for kj in range(k):
            for c in range(c1):
                for s in range(n2):
                    j = s + kj
                    w2_band[ki, j * c1 + c, s * c2:(s + 1) * c2] = w2[:, c, ki, kj]
    b2_row = np.tile(b2, n2)[None, :]

    # FC: block-column packed so the kernel does a single MXU pass over all of h2.
    # (assumes (h, w, c) flatten order; permute here when importing torch weights)
    fc_w = np.asarray(params["fc_w"], np.float32)
    hidden = fc_w.shape[1]
    fc3 = fc_w.reshape(n2, n2 * c2, hidden)
    fc_wide = np.zeros((n2 * c2, n2 * hidden), np.float32)
    for r in range(n2):
        fc_wide[:, r * hidden:(r + 1) * hidden] = fc3[r]

    # LSTM: fuse w_ih / w_hh vertically so each layer is one matmul.
    num_layers = len(params["lstm"])
    wcat = np.stack([np.vstack([np.asarray(p["w_ih"], np.float32),
                                np.asarray(p["w_hh"], np.float32)])
                     for p in params["lstm"]])                 # (L, 2H, 4H)
    lb = np.stack([np.asarray(p["b"], np.float32) for p in params["lstm"]])

    A = int(params["action_w"].shape[1])
    assert A + 1 <= _LANE, "action logits + value must fit in one 128-lane slab"
    assert 2 * num_layers * hidden <= _LANE, "LSTM state must fit in one slab"
    assert 4 * hidden <= _LANE, "LSTM gates must fit in one 128-lane register"

    # fused value + action head, padded to 128 lanes
    head_w = np.zeros((hidden, _LANE), np.float32)
    head_b = np.zeros((1, _LANE), np.float32)
    head_w[:, :A] = np.asarray(params["action_w"], np.float32)
    head_b[0, :A] = np.asarray(params["action_b"], np.float32).reshape(-1)
    head_w[:, A] = np.asarray(params["value_w"], np.float32)[:, 0]
    head_b[0, A] = float(np.asarray(params["value_b"], np.float32).reshape(-1)[0])

    tab = np.zeros((2, _LANE), np.float32)
    tab[0, :A] = action_index[:, 0]
    tab[1, :A] = action_index[:, 1]

    bf = jnp.bfloat16
    arrays = {
        "w1": jnp.asarray(w1_band, bf), "b1": jnp.asarray(b1_row),
        "w2": jnp.asarray(w2_band, bf), "b2": jnp.asarray(b2_row),
        "fc": jnp.asarray(fc_wide, bf),
        "fcb": jnp.asarray(params["fc_b"], jnp.float32).reshape(1, hidden),
        "wcat": jnp.asarray(wcat, bf),
        "lb": jnp.asarray(lb, jnp.float32),
        "headw": jnp.asarray(head_w, bf), "headb": jnp.asarray(head_b),
        "tab": jnp.asarray(tab),
    }
    dims = dict(c_in=c_in, cin_pad=cin_pad, hw_in=hw, n1=n1, n2=n2, c1=c1, c2=c2,
                hidden=hidden, num_layers=num_layers, num_logits=A, bb=_BB)
    return {"arrays": arrays, "dims": dims}


# ----------------------------------------------------------------------------
# Producer-side obs relayout and lane-dense state packing (outside the hot kernel)
# ----------------------------------------------------------------------------
def prepare_obs(packed, x_nchw):
    """NCHW obs -> interleaved bf16 tiles (nb, hw*BB, hw*cin_pad).

    In a real pipeline this relayout is fused into the upstream obs producer;
    it is kept as a separate one-shot helper so the per-step forward is a
    single pallas_call."""
    d = packed["dims"]
    hw, cin, cin_pad, bb = d["hw_in"], d["c_in"], d["cin_pad"], d["bb"]
    B = x_nchw.shape[0]
    nb = -(-B // bb)
    B_pad = nb * bb
    xn = jnp.transpose(x_nchw, (0, 2, 3, 1)).astype(jnp.float32)
    xn = jnp.pad(xn, ((0, B_pad - B), (0, 0), (0, 0), (0, cin_pad - cin)))
    xs = xn.reshape(nb, bb, hw, hw, cin_pad)
    xs = xs.transpose(0, 2, 1, 3, 4).reshape(nb, hw * bb, hw * cin_pad)
    return xs.astype(jnp.bfloat16)


def pack_state(packed, lstm_h, lstm_c):
    """(L, B, H) h/c -> lane-dense (B_pad, 128) slab [h0|h1|...|c0|c1|...]."""
    d = packed["dims"]
    H, L, bb = d["hidden"], d["num_layers"], d["bb"]
    B = lstm_h.shape[1]
    nb = -(-B // bb)
    B_pad = nb * bb
    slab = jnp.zeros((B_pad, _LANE), jnp.float32)
    for l in range(L):
        slab = slab.at[:B, l * H:(l + 1) * H].set(lstm_h[l].astype(jnp.float32))
        slab = slab.at[:B, (L + l) * H:(L + l + 1) * H].set(
            lstm_c[l].astype(jnp.float32))
    return slab


def unpack_state(packed, slab, batch_size):
    d = packed["dims"]
    H, L = d["hidden"], d["num_layers"]
    new_h = jnp.stack([slab[:batch_size, l * H:(l + 1) * H] for l in range(L)], 0)
    new_c = jnp.stack([slab[:batch_size, (L + l) * H:(L + l + 1) * H]
                       for l in range(L)], 0)
    return new_h, new_c


# ----------------------------------------------------------------------------
# Forward wrapper (one fused pallas_call)
# ----------------------------------------------------------------------------
def metta_agent_forward(packed, obs_tiles, state_slab, batch_size):
    """Returns (action, logprob_act, entropy, value, log_sftmx_logits, new_state_slab).

    obs_tiles  : bf16 (nb, hw*BB, hw*cin_pad) from prepare_obs
    state_slab : f32  (nb*BB, 128) lane-dense [h|c] slab (round-trips unchanged)
    """
    a = packed["arrays"]
    d = packed["dims"]
    hw_in, cin_pad = d["hw_in"], d["cin_pad"]
    bb, H, L, A = d["bb"], d["hidden"], d["num_layers"], d["num_logits"]
    nb = obs_tiles.shape[0]
    B_pad = nb * bb

    kernel = functools.partial(
        _fused_agent_kernel, bb=bb, n1=d["n1"], n2=d["n2"], c1=d["c1"],
        c2=d["c2"], hidden=H, num_layers=L, num_logits=A)

    in_specs = [
        pl.BlockSpec((1, hw_in * bb, hw_in * cin_pad), lambda i: (i, 0, 0)),
        pl.BlockSpec(a["w1"].shape, lambda i: (0, 0, 0)),
        pl.BlockSpec(a["b1"].shape, lambda i: (0, 0)),
        pl.BlockSpec(a["w2"].shape, lambda i: (0, 0, 0)),
        pl.BlockSpec(a["b2"].shape, lambda i: (0, 0)),
        pl.BlockSpec(a["fc"].shape, lambda i: (0, 0)),
        pl.BlockSpec(a["fcb"].shape, lambda i: (0, 0)),
        pl.BlockSpec(a["wcat"].shape, lambda i: (0, 0, 0)),
        pl.BlockSpec(a["lb"].shape, lambda i: (0, 0, 0)),
        pl.BlockSpec((bb, _LANE), lambda i: (i, 0)),          # lane-dense state in
        pl.BlockSpec(a["headw"].shape, lambda i: (0, 0)),
        pl.BlockSpec(a["headb"].shape, lambda i: (0, 0)),
        pl.BlockSpec(a["tab"].shape, lambda i: (0, 0)),
    ]
    out_specs = (
        pl.BlockSpec((bb, _LANE), lambda i: (i, 0)),
        pl.BlockSpec((bb, _LANE), lambda i: (i, 0)),
        pl.BlockSpec((bb, _LANE), lambda i: (i, 0)),
    )
    out_shape = (
        jax.ShapeDtypeStruct((B_pad, _LANE), jnp.float32),
        jax.ShapeDtypeStruct((B_pad, _LANE), jnp.float32),
        jax.ShapeDtypeStruct((B_pad, _LANE), jnp.float32),
    )

    logsm_p, scal_p, state_p = pl.pallas_call(
        kernel,
        grid=(nb,),
        in_specs=in_specs,
        out_specs=out_specs,
        out_shape=out_shape,
        compiler_params=_COMPILER_PARAMS,
    )(obs_tiles, a["w1"], a["b1"], a["w2"], a["b2"], a["fc"], a["fcb"],
      a["wcat"], a["lb"], state_slab, a["headw"], a["headb"], a["tab"])

    # Unpack the lane-dense slabs (tiny XLA slices).
    B = batch_size
    log_sftmx_logits = logsm_p[:B, :A]
    value = scal_p[:B, 0:1]
    entropy = scal_p[:B, 1]
    logprob_act = scal_p[:B, 2]
    action = scal_p[:B, 4:6].astype(jnp.int32)            # (B, 2)
    return action, logprob_act, entropy, value, log_sftmx_logits, state_p


if __name__ == "__main__":
    B, C_IN, HW = 2, 4, 11          # small grid observation (B, C, 11, 11)
    HIDDEN = 32
    CORE_NUM_LAYERS = 2
    ACTION_MAX_PARAMS = [0, 3, 9]   # -> 1 + 4 + 10 = 15 logits
    NUM_LOGITS = sum(p + 1 for p in ACTION_MAX_PARAMS)

    key = jax.random.PRNGKey(0)
    k_x, k_h, k_c, k_p = jax.random.split(key, 4)

    x = jax.random.normal(k_x, (B, C_IN, HW, HW), dtype=jnp.float32)
    lstm_h = jax.random.normal(k_h, (CORE_NUM_LAYERS, B, HIDDEN), dtype=jnp.float32)
    lstm_c = jax.random.normal(k_c, (CORE_NUM_LAYERS, B, HIDDEN), dtype=jnp.float32)

    params = init_params(k_p, C_IN, HW, HIDDEN, CORE_NUM_LAYERS, NUM_LOGITS)
    action_index = build_action_index(ACTION_MAX_PARAMS)
    packed = pack_params(params, action_index, c_in=C_IN, hw=HW)

    # Producer-side relayout (done once per step, outside the fused kernel path).
    obs_tiles = prepare_obs(packed, x)
    state_slab = pack_state(packed, lstm_h, lstm_c)

    fwd = jax.jit(lambda ot, ss: metta_agent_forward(packed, ot, ss, B))
    outs = fwd(obs_tiles, state_slab)
    (action, logprob, entropy, value, log_sftmx, new_state_slab) = outs
    jax.block_until_ready((action, logprob, entropy, value, log_sftmx,
                           new_state_slab))
    new_h, new_c = unpack_state(packed, new_state_slab, B)
    jax.block_until_ready((new_h, new_c))

    assert action.shape == (B, 2)
    assert logprob.shape == (B,)
    assert entropy.shape == (B,)
    assert value.shape == (B, 1)
    assert log_sftmx.shape == (B, NUM_LOGITS)
    assert new_h.shape == (CORE_NUM_LAYERS, B, HIDDEN)
    assert new_c.shape == (CORE_NUM_LAYERS, B, HIDDEN)
    assert bool(jnp.all(jnp.isfinite(log_sftmx)))
    assert bool(jnp.all(jnp.isfinite(new_h))) and bool(jnp.all(jnp.isfinite(new_c)))
    print("KERNEL_OK")
</pallas_src>

<mosaic_0001>
module attributes {stable_mosaic.version = 11 : i64} {
  func.func @_fused_agent_kernel(%arg0: i32, %arg1: memref<1x352x88xbf16, #tpu.memory_space<vmem>>, %arg2: memref<3x88x144xbf16, #tpu.memory_space<vmem>>, %arg3: memref<1x144xf32, #tpu.memory_space<vmem>>, %arg4: memref<3x144x224xbf16, #tpu.memory_space<vmem>>, %arg5: memref<1x224xf32, #tpu.memory_space<vmem>>, %arg6: memref<224x224xbf16, #tpu.memory_space<vmem>>, %arg7: memref<1x32xf32, #tpu.memory_space<vmem>>, %arg8: memref<2x64x128xbf16, #tpu.memory_space<vmem>>, %arg9: memref<2x1x128xf32, #tpu.memory_space<vmem>>, %arg10: memref<32x128xf32, #tpu.memory_space<vmem>>, %arg11: memref<32x128xbf16, #tpu.memory_space<vmem>>, %arg12: memref<1x128xf32, #tpu.memory_space<vmem>>, %arg13: memref<2x128xf32, #tpu.memory_space<vmem>>, %arg14: memref<32x128xf32, #tpu.memory_space<vmem>>, %arg15: memref<32x128xf32, #tpu.memory_space<vmem>>, %arg16: memref<32x128xf32, #tpu.memory_space<vmem>>) attributes {dimension_semantics = [#tpu.dimension_semantics<parallel>], iteration_bounds = array<i64: 1>, scalar_prefetch = 0 : i64, scratch_operands = 0 : i64, tpu.core_type = #tpu.core_type<tc>, window_params = [{transform_indices = @transform_0, window_bounds = array<i64: 1, 352, 88>}, {pipeline_mode = #tpu.pipeline_mode<synchronous>, transform_indices = @transform_1, window_bounds = array<i64: 3, 88, 144>}, {pipeline_mode = #tpu.pipeline_mode<synchronous>, transform_indices = @transform_2, window_bounds = array<i64: 1, 144>}, {pipeline_mode = #tpu.pipeline_mode<synchronous>, transform_indices = @transform_3, window_bounds = array<i64: 3, 144, 224>}, {pipeline_mode = #tpu.pipeline_mode<synchronous>, transform_indices = @transform_4, window_bounds = array<i64: 1, 224>}, {pipeline_mode = #tpu.pipeline_mode<synchronous>, transform_indices = @transform_5, window_bounds = array<i64: 224, 224>}, {pipeline_mode = #tpu.pipeline_mode<synchronous>, transform_indices = @transform_6, window_bounds = array<i64: 1, 32>}, {pipeline_mode = #tpu.pipeline_mode<synchronous>, transform_indices = @transform_7, window_bounds = array<i64: 2, 64, 128>}, {pipeline_mode = #tpu.pipeline_mode<synchronous>, transform_indices = @transform_8, window_bounds = array<i64: 2, 1, 128>}, {transform_indices = @transform_9, window_bounds = array<i64: 32, 128>}, {pipeline_mode = #tpu.pipeline_mode<synchronous>, transform_indices = @transform_10, window_bounds = array<i64: 32, 128>}, {pipeline_mode = #tpu.pipeline_mode<synchronous>, transform_indices = @transform_11, window_bounds = array<i64: 1, 128>}, {pipeline_mode = #tpu.pipeline_mode<synchronous>, transform_indices = @transform_12, window_bounds = array<i64: 2, 128>}, {transform_indices = @transform_13, window_bounds = array<i64: 32, 128>}, {transform_indices = @transform_14, window_bounds = array<i64: 32, 128>}, {transform_indices = @transform_15, window_bounds = array<i64: 32, 128>}]} {
    %c0 = arith.constant 0 : index
    %c0_0 = arith.constant 0 : index
    %c0_1 = arith.constant 0 : index
    %0 = vector.load %arg1[%c0, %c0_0, %c0_1] : memref<1x352x88xbf16, #tpu.memory_space<vmem>>, vector<1x352x88xbf16>
    %1 = vector.shape_cast %0 : vector<1x352x88xbf16> to vector<352x88xbf16>
    %cst = arith.constant 0.000000e+00 : f32
    %2 = vector.broadcast %cst : f32 to vector<288x144xf32>
    %3 = vector.extract_strided_slice %1 {offsets = [0, 0], sizes = [288, 88], strides = [1, 1]} : vector<352x88xbf16> to vector<288x88xbf16>
    %c0_2 = arith.constant 0 : index
    %c0_3 = arith.constant 0 : index
    %c0_4 = arith.constant 0 : index
    %4 = vector.load %arg2[%c0_2, %c0_3, %c0_4] : memref<3x88x144xbf16, #tpu.memory_space<vmem>>, vector<1x88x144xbf16>
    %5 = vector.shape_cast %4 : vector<1x88x144xbf16> to vector<88x144xbf16>
    %cst_5 = arith.constant dense<0.000000e+00> : vector<288x144xf32>
    %6 = tpu.matmul %3, %5, %cst_5 {dimension_numbers = #tpu.dot_dimension_numbers<[1], [0], [0], [1], [0, 0, 1, 1], [], []>} : vector<288x88xbf16>, vector<88x144xbf16>, vector<288x144xf32> -> vector<288x144xf32>
    %7 = arith.addf %2, %6 : vector<288x144xf32>
    %8 = vector.extract_strided_slice %1 {offsets = [32, 0], sizes = [288, 88], strides = [1, 1]} : vector<352x88xbf16> to vector<288x88xbf16>
    %c1 = arith.constant 1 : index
    %c0_6 = arith.constant 0 : index
    %c0_7 = arith.constant 0 : index
    %9 = vector.load %arg2[%c1, %c0_6, %c0_7] : memref<3x88x144xbf16, #tpu.memory_space<vmem>>, vector<1x88x144xbf16>
    %10 = vector.shape_cast %9 : vector<1x88x144xbf16> to vector<88x144xbf16>
    %cst_8 = arith.constant dense<0.000000e+00> : vector<288x144xf32>
    %11 = tpu.matmul %8, %10, %cst_8 {dimension_numbers = #tpu.dot_dimension_numbers<[1], [0], [0], [1], [0, 0, 1, 1], [], []>} : vector<288x88xbf16>, vector<88x144xbf16>, vector<288x144xf32> -> vector<288x144xf32>
    %12 = arith.addf %7, %11 : vector<288x144xf32>
    %13 = vector.extract_strided_slice %1 {offsets = [64, 0], sizes = [288, 88], strides = [1, 1]} : vector<352x88xbf16> to vector<288x88xbf16>
    %c2 = arith.constant 2 : index
    %c0_9 = arith.constant 0 : index
    %c0_10 = arith.constant 0 : index
    %14 = vector.load %arg2[%c2, %c0_9, %c0_10] : memref<3x88x144xbf16, #tpu.memory_space<vmem>>, vector<1x88x144xbf16>
    %15 = vector.shape_cast %14 : vector<1x88x144xbf16> to vector<88x144xbf16>
    %cst_11 = arith.constant dense<0.000000e+00> : vector<288x144xf32>
    %16 = tpu.matmul %13, %15, %cst_11 {dimension_numbers = #tpu.dot_dimension_numbers<[1], [0], [0], [1], [0, 0, 1, 1], [], []>} : vector<288x88xbf16>, vector<88x144xbf16>, vector<288x144xf32> -> vector<288x144xf32>
    %17 = arith.addf %12, %16 : vector<288x144xf32>
    %c0_12 = arith.constant 0 : index
    %c0_13 = arith.constant 0 : index
    %18 = vector.load %arg3[%c0_12, %c0_13] : memref<1x144xf32, #tpu.memory_space<vmem>>, vector<1x144xf32>
    %19 = vector.broadcast %18 : vector<1x144xf32> to vector<288x144xf32>
    %20 = arith.addf %17, %19 : vector<288x144xf32>
    %cst_14 = arith.constant 0.000000e+00 : f32
    %21 = vector.broadcast %cst_14 : f32 to vector<288x144xf32>
    %22 = arith.maximumf %20, %21 : vector<288x144xf32>
    %23 = arith.truncf %22 : vector<288x144xf32> to vector<288x144xbf16>
    %cst_15 = arith.constant 0.000000e+00 : f32
    %24 = vector.broadcast %cst_15 : f32 to vector<224x224xf32>
    %25 = vector.extract_strided_slice %23 {offsets = [0, 0], sizes = [224, 144], strides = [1, 1]} : vector<288x144xbf16> to vector<224x144xbf16>
    %c0_16 = arith.constant 0 : index
    %c0_17 = arith.constant 0 : index
    %c0_18 = arith.constant 0 : index
    %26 = vector.load %arg4[%c0_16, %c0_17, %c0_18] : memref<3x144x224xbf16, #tpu.memory_space<vmem>>, vector<1x144x224xbf16>
    %27 = vector.shape_cast %26 : vector<1x144x224xbf16> to vector<144x224xbf16>
    %cst_19 = arith.constant dense<0.000000e+00> : vector<224x224xf32>
    %28 = tpu.matmul %25, %27, %cst_19 {dimension_numbers = #tpu.dot_dimension_numbers<[1], [0], [0], [1], [0, 0, 1, 1], [], []>} : vector<224x144xbf16>, vector<144x224xbf16>, vector<224x224xf32> -> vector<224x224xf32>
    %29 = arith.addf %24, %28 : vector<224x224xf32>
    %30 = vector.extract_strided_slice %23 {offsets = [32, 0], sizes = [224, 144], strides = [1, 1]} : vector<288x144xbf16> to vector<224x144xbf16>
    %c1_20 = arith.constant 1 : index
    %c0_21 = arith.constant 0 : index
    %c0_22 = arith.constant 0 : index
    %31 = vector.load %arg4[%c1_20, %c0_21, %c0_22] : memref<3x144x224xbf16, #tpu.memory_space<vmem>>, vector<1x144x224xbf16>
    %32 = vector.shape_cast %31 : vector<1x144x224xbf16> to vector<144x224xbf16>
    %cst_23 = arith.constant dense<0.000000e+00> : vector<224x224xf32>
    %33 = tpu.matmul %30, %32, %cst_23 {dimension_numbers = #tpu.dot_dimension_numbers<[1], [0], [0], [1], [0, 0, 1, 1], [], []>} : vector<224x144xbf16>, vector<144x224xbf16>, vector<224x224xf32> -> vector<224x224xf32>
    %34 = arith.addf %29, %33 : vector<224x224xf32>
    %35 = vector.extract_strided_slice %23 {offsets = [64, 0], sizes = [224, 144], strides = [1, 1]} : vector<288x144xbf16> to vector<224x144xbf16>
    %c2_24 = arith.constant 2 : index
    %c0_25 = arith.constant 0 : index
    %c0_26 = arith.constant 0 : index
    %36 = vector.load %arg4[%c2_24, %c0_25, %c0_26] : memref<3x144x224xbf16, #tpu.memory_space<vmem>>, vector<1x144x224xbf16>
    %37 = vector.shape_cast %36 : vector<1x144x224xbf16> to vector<144x224xbf16>
    %cst_27 = arith.constant dense<0.000000e+00> : vector<224x224xf32>
    %38 = tpu.matmul %35, %37, %cst_27 {dimension_numbers = #tpu.dot_dimension_numbers<[1], [0], [0], [1], [0, 0, 1, 1], [], []>} : vector<224x144xbf16>, vector<144x224xbf16>, vector<224x224xf32> -> vector<224x224xf32>
    %39 = arith.addf %34, %38 : vector<224x224xf32>
    %c0_28 = arith.constant 0 : index
    %c0_29 = arith.constant 0 : index
    %40 = vector.load %arg5[%c0_28, %c0_29] : memref<1x224xf32, #tpu.memory_space<vmem>>, vector<1x224xf32>
    %41 = vector.broadcast %40 : vector<1x224xf32> to vector<224x224xf32>
    %42 = arith.addf %39, %41 : vector<224x224xf32>
    %cst_30 = arith.constant 0.000000e+00 : f32
    %43 = vector.broadcast %cst_30 : f32 to vector<224x224xf32>
    %44 = arith.maximumf %42, %43 : vector<224x224xf32>
    %45 = arith.truncf %44 : vector<224x224xf32> to vector<224x224xbf16>
    %c0_31 = arith.constant 0 : index
    %c0_32 = arith.constant 0 : index
    %46 = vector.load %arg6[%c0_31, %c0_32] : memref<224x224xbf16, #tpu.memory_space<vmem>>, vector<224x224xbf16>
    %cst_33 = arith.constant dense<0.000000e+00> : vector<224x224xf32>
    %47 = tpu.matmul %45, %46, %cst_33 {dimension_numbers = #tpu.dot_dimension_numbers<[1], [0], [0], [1], [0, 0, 1, 1], [], []>} : vector<224x224xbf16>, vector<224x224xbf16>, vector<224x224xf32> -> vector<224x224xf32>
    %48 = vector.extract_strided_slice %47 {offsets = [0, 0], sizes = [32, 32], strides = [1, 1]} : vector<224x224xf32> to vector<32x32xf32>
    %49 = vector.extract_strided_slice %47 {offsets = [32, 32], sizes = [32, 32], strides = [1, 1]} : vector<224x224xf32> to vector<32x32xf32>
    %50 = arith.addf %48, %49 : vector<32x32xf32>
    %51 = vector.extract_strided_slice %47 {offsets = [64, 64], sizes = [32, 32], strides = [1, 1]} : vector<224x224xf32> to vector<32x32xf32>
    %52 = arith.addf %50, %51 : vector<32x32xf32>
    %53 = vector.extract_strided_slice %47 {offsets = [96, 96], sizes = [32, 32], strides = [1, 1]} : vector<224x224xf32> to vector<32x32xf32>
    %54 = arith.addf %52, %53 : vector<32x32xf32>
    %55 = vector.extract_strided_slice %47 {offsets = [128, 128], sizes = [32, 32], strides = [1, 1]} : vector<224x224xf32> to vector<32x32xf32>
    %56 = arith.addf %54, %55 : vector<32x32xf32>
    %57 = vector.extract_strided_slice %47 {offsets = [160, 160], sizes = [32, 32], strides = [1, 1]} : vector<224x224xf32> to vector<32x32xf32>
    %58 = arith.addf %56, %57 : vector<32x32xf32>
    %59 = vector.extract_strided_slice %47 {offsets = [192, 192], sizes = [32, 32], strides = [1, 1]} : vector<224x224xf32> to vector<32x32xf32>
    %60 = arith.addf %58, %59 : vector<32x32xf32>
    %c0_34 = arith.constant 0 : index
    %c0_35 = arith.constant 0 : index
    %61 = vector.load %arg7[%c0_34, %c0_35] : memref<1x32xf32, #tpu.memory_space<vmem>>, vector<1x32xf32>
    %62 = vector.broadcast %61 : vector<1x32xf32> to vector<32x32xf32>
    %63 = arith.addf %60, %62 : vector<32x32xf32>
    %cst_36 = arith.constant 0.000000e+00 : f32
    %64 = vector.broadcast %cst_36 : f32 to vector<32x32xf32>
    %65 = arith.maximumf %63, %64 : vector<32x32xf32>
    %c0_37 = arith.constant 0 : index
    %c0_38 = arith.constant 0 : index
    %66 = vector.load %arg10[%c0_37, %c0_38] : memref<32x128xf32, #tpu.memory_space<vmem>>, vector<32x128xf32>
    %67 = vector.extract_strided_slice %66 {offsets = [0, 0], sizes = [32, 32], strides = [1, 1]} : vector<32x128xf32> to vector<32x32xf32>
    %68 = vector.extract_strided_slice %66 {offsets = [0, 64], sizes = [32, 32], strides = [1, 1]} : vector<32x128xf32> to vector<32x32xf32>
    %69 = tpu.concatenate %65, %67 in 1 : vector<32x32xf32>, vector<32x32xf32> -> vector<32x64xf32>
    %70 = arith.truncf %69 : vector<32x64xf32> to vector<32x64xbf16>
    %c0_39 = arith.constant 0 : index
    %c0_40 = arith.constant 0 : index
    %c0_41 = arith.constant 0 : index
    %71 = vector.load %arg8[%c0_39, %c0_40, %c0_41] : memref<2x64x128xbf16, #tpu.memory_space<vmem>>, vector<1x64x128xbf16>
    %72 = vector.shape_cast %71 : vector<1x64x128xbf16> to vector<64x128xbf16>
    %cst_42 = arith.constant dense<0.000000e+00> : vector<32x128xf32>
    %73 = tpu.matmul %70, %72, %cst_42 {dimension_numbers = #tpu.dot_dimension_numbers<[1], [0], [0], [1], [0, 0, 1, 1], [], []>} : vector<32x64xbf16>, vector<64x128xbf16>, vector<32x128xf32> -> vector<32x128xf32>
    %c0_43 = arith.constant 0 : index
    %c0_44 = arith.constant 0 : index
    %c0_45 = arith.constant 0 : index
    %74 = vector.load %arg9[%c0_43, %c0_44, %c0_45] : memref<2x1x128xf32, #tpu.memory_space<vmem>>, vector<1x1x128xf32>
    %75 = vector.shape_cast %74 : vector<1x1x128xf32> to vector<1x128xf32>
    %76 = vector.broadcast %75 : vector<1x128xf32> to vector<32x128xf32>
    %77 = arith.addf %73, %76 : vector<32x128xf32>
    %78 = arith.negf %77 : vector<32x128xf32>
    %79 = math.exp %78 : vector<32x128xf32>
    %cst_46 = arith.constant 1.000000e+00 : f32
    %80 = vector.broadcast %cst_46 : f32 to vector<32x128xf32>
    %81 = arith.addf %80, %79 : vector<32x128xf32>
    %82 = arith.divf %80, %81 : vector<32x128xf32>
    %83 = math.tanh %77 : vector<32x128xf32>
    %84 = vector.extract_strided_slice %82 {offsets = [0, 0], sizes = [32, 32], strides = [1, 1]} : vector<32x128xf32> to vector<32x32xf32>
    %85 = vector.extract_strided_slice %82 {offsets = [0, 32], sizes = [32, 32], strides = [1, 1]} : vector<32x128xf32> to vector<32x32xf32>
    %86 = vector.extract_strided_slice %83 {offsets = [0, 64], sizes = [32, 32], strides = [1, 1]} : vector<32x128xf32> to vector<32x32xf32>
    %87 = vector.extract_strided_slice %82 {offsets = [0, 96], sizes = [32, 32], strides = [1, 1]} : vector<32x128xf32> to vector<32x32xf32>
    %88 = arith.mulf %85, %68 : vector<32x32xf32>
    %89 = arith.mulf %84, %86 : vector<32x32xf32>
    %90 = arith.addf %88, %89 : vector<32x32xf32>
    %91 = math.tanh %90 : vector<32x32xf32>
    %92 = arith.mulf %87, %91 : vector<32x32xf32>
    %93 = vector.extract_strided_slice %66 {offsets = [0, 32], sizes = [32, 32], strides = [1, 1]} : vector<32x128xf32> to vector<32x32xf32>
    %94 = vector.extract_strided_slice %66 {offsets = [0, 96], sizes = [32, 32], strides = [1, 1]} : vector<32x128xf32> to vector<32x32xf32>
    %95 = tpu.concatenate %92, %93 in 1 : vector<32x32xf32>, vector<32x32xf32> -> vector<32x64xf32>
    %96 = arith.truncf %95 : vector<32x64xf32> to vector<32x64xbf16>
    %c1_47 = arith.constant 1 : index
    %c0_48 = arith.constant 0 : index
    %c0_49 = arith.constant 0 : index
    %97 = vector.load %arg8[%c1_47, %c0_48, %c0_49] : memref<2x64x128xbf16, #tpu.memory_space<vmem>>, vector<1x64x128xbf16>
    %98 = vector.shape_cast %97 : vector<1x64x128xbf16> to vector<64x128xbf16>
    %cst_50 = arith.constant dense<0.000000e+00> : vector<32x128xf32>
    %99 = tpu.matmul %96, %98, %cst_50 {dimension_numbers = #tpu.dot_dimension_numbers<[1], [0], [0], [1], [0, 0, 1, 1], [], []>} : vector<32x64xbf16>, vector<64x128xbf16>, vector<32x128xf32> -> vector<32x128xf32>
    %c1_51 = arith.constant 1 : index
    %c0_52 = arith.constant 0 : index
    %c0_53 = arith.constant 0 : index
    %100 = vector.load %arg9[%c1_51, %c0_52, %c0_53] : memref<2x1x128xf32, #tpu.memory_space<vmem>>, vector<1x1x128xf32>
    %101 = vector.shape_cast %100 : vector<1x1x128xf32> to vector<1x128xf32>
    %102 = vector.broadcast %101 : vector<1x128xf32> to vector<32x128xf32>
    %103 = arith.addf %99, %102 : vector<32x128xf32>
    %104 = arith.negf %103 : vector<32x128xf32>
    %105 = math.exp %104 : vector<32x128xf32>
    %cst_54 = arith.constant 1.000000e+00 : f32
    %106 = vector.broadcast %cst_54 : f32 to vector<32x128xf32>
    %107 = arith.addf %106, %105 : vector<32x128xf32>
    %108 = arith.divf %106, %107 : vector<32x128xf32>
    %109 = math.tanh %103 : vector<32x128xf32>
    %110 = vector.extract_strided_slice %108 {offsets = [0, 0], sizes = [32, 32], strides = [1, 1]} : vector<32x128xf32> to vector<32x32xf32>
    %111 = vector.extract_strided_slice %108 {offsets = [0, 32], sizes = [32, 32], strides = [1, 1]} : vector<32x128xf32> to vector<32x32xf32>
    %112 = vector.extract_strided_slice %109 {offsets = [0, 64], sizes = [32, 32], strides = [1, 1]} : vector<32x128xf32> to vector<32x32xf32>
    %113 = vector.extract_strided_slice %108 {offsets = [0, 96], sizes = [32, 32], strides = [1, 1]} : vector<32x128xf32> to vector<32x32xf32>
    %114 = arith.mulf %111, %94 : vector<32x32xf32>
    %115 = arith.mulf %110, %112 : vector<32x32xf32>
    %116 = arith.addf %114, %115 : vector<32x32xf32>
    %117 = math.tanh %116 : vector<32x32xf32>
    %118 = arith.mulf %113, %117 : vector<32x32xf32>
    %119 = arith.truncf %118 : vector<32x32xf32> to vector<32x32xbf16>
    %c0_55 = arith.constant 0 : index
    %c0_56 = arith.constant 0 : index
    %120 = vector.load %arg11[%c0_55, %c0_56] : memref<32x128xbf16, #tpu.memory_space<vmem>>, vector<32x128xbf16>
    %cst_57 = arith.constant dense<0.000000e+00> : vector<32x128xf32>
    %121 = tpu.matmul %119, %120, %cst_57 {dimension_numbers = #tpu.dot_dimension_numbers<[1], [0], [0], [1], [0, 0, 1, 1], [], []>} : vector<32x32xbf16>, vector<32x128xbf16>, vector<32x128xf32> -> vector<32x128xf32>
    %c0_58 = arith.constant 0 : index
    %c0_59 = arith.constant 0 : index
    %122 = vector.load %arg12[%c0_58, %c0_59] : memref<1x128xf32, #tpu.memory_space<vmem>>, vector<1x128xf32>
    %123 = vector.broadcast %122 : vector<1x128xf32> to vector<32x128xf32>
    %124 = arith.addf %121, %123 : vector<32x128xf32>
    %125 = vector.extract_strided_slice %124 {offsets = [0, 15], sizes = [32, 1], strides = [1, 1]} : vector<32x128xf32> to vector<32x1xf32>
    %126 = tpu.iota {dimensions = array<i32: 1>} : vector<32x128xi32>
    %127 = arith.sitofp %126 : vector<32x128xi32> to vector<32x128xf32>
    %c15_i32 = arith.constant 15 : i32
    %128 = vector.broadcast %c15_i32 : i32 to vector<32x128xi32>
    %129 = arith.cmpi slt, %126, %128 : vector<32x128xi32>
    %cst_60 = arith.constant -1.000000e+30 : f32
    %130 = vector.broadcast %cst_60 : f32 to vector<32x128xf32>
    %131 = arith.select %129, %124, %130 : vector<32x128xi1>, vector<32x128xf32>
    %cst_61 = arith.constant dense<0xFF800000> : vector<32xf32>
    %132 = vector.multi_reduction <maximumf>, %131, %cst_61 [1] : vector<32x128xf32> to vector<32xf32>
    %133 = vector.shape_cast %132 : vector<32xf32> to vector<32x1xf32>
    %134 = vector.broadcast %133 : vector<32x1xf32> to vector<32x128xf32>
    %135 = arith.subf %131, %134 : vector<32x128xf32>
    %136 = math.exp %135 : vector<32x128xf32>
    %cst_62 = arith.constant dense<0.000000e+00> : vector<32xf32>
    %137 = vector.multi_reduction <add>, %136, %cst_62 [1] : vector<32x128xf32> to vector<32xf32>
    %138 = vector.shape_cast %137 : vector<32xf32> to vector<32x1xf32>
    %139 = math.log %138 : vector<32x1xf32>
    %140 = vector.broadcast %139 : vector<32x1xf32> to vector<32x128xf32>
    %141 = arith.subf %135, %140 : vector<32x128xf32>
    %142 = vector.broadcast %138 : vector<32x1xf32> to vector<32x128xf32>
    %143 = arith.divf %136, %142 : vector<32x128xf32>
    %144 = arith.mulf %143, %141 : vector<32x128xf32>
    %cst_63 = arith.constant 0.000000e+00 : f32
    %145 = vector.broadcast %cst_63 : f32 to vector<32x128xf32>
    %146 = arith.select %129, %144, %145 : vector<32x128xi1>, vector<32x128xf32>
    %cst_64 = arith.constant dense<0.000000e+00> : vector<32xf32>
    %147 = vector.multi_reduction <add>, %146, %cst_64 [1] : vector<32x128xf32> to vector<32xf32>
    %148 = vector.shape_cast %147 : vector<32xf32> to vector<32x1xf32>
    %cst_65 = arith.constant 0.000000e+00 : f32
    %149 = vector.broadcast %cst_65 : f32 to vector<32x1xf32>
    %150 = arith.subf %149, %148 : vector<32x1xf32>
    %151 = vector.broadcast %133 : vector<32x1xf32> to vector<32x128xf32>
    %152 = arith.cmpf oeq, %131, %151 : vector<32x128xf32>
    %cst_66 = arith.constant 1.280000e+02 : f32
    %153 = vector.broadcast %cst_66 : f32 to vector<32x128xf32>
    %154 = arith.select %152, %127, %153 : vector<32x128xi1>, vector<32x128xf32>
    %cst_67 = arith.constant dense<0x7F800000> : vector<32xf32>
    %155 = vector.multi_reduction <minimumf>, %154, %cst_67 [1] : vector<32x128xf32> to vector<32xf32>
    %156 = vector.shape_cast %155 : vector<32xf32> to vector<32x1xf32>
    %157 = vector.broadcast %156 : vector<32x1xf32> to vector<32x128xf32>
    %158 = arith.cmpf oeq, %127, %157 : vector<32x128xf32>
    %159 = arith.extui %158 : vector<32x128xi1> to vector<32x128xi32>
    %160 = arith.sitofp %159 : vector<32x128xi32> to vector<32x128xf32>
    %161 = arith.mulf %160, %141 : vector<32x128xf32>
    %cst_68 = arith.constant dense<0.000000e+00> : vector<32xf32>
    %162 = vector.multi_reduction <add>, %161, %cst_68 [1] : vector<32x128xf32> to vector<32xf32>
    %163 = vector.shape_cast %162 : vector<32xf32> to vector<32x1xf32>
    %c0_69 = arith.constant 0 : index
    %c0_70 = arith.constant 0 : index
    %164 = vector.load %arg13[%c0_69, %c0_70] : memref<2x128xf32, #tpu.memory_space<vmem>>, vector<2x128xf32>
    %165 = vector.extract_strided_slice %164 {offsets = [0, 0], sizes = [1, 128], strides = [1, 1]} : vector<2x128xf32> to vector<1x128xf32>
    %166 = vector.broadcast %165 : vector<1x128xf32> to vector<32x128xf32>
    %167 = arith.mulf %160, %166 : vector<32x128xf32>
    %cst_71 = arith.constant dense<0.000000e+00> : vector<32xf32>
    %168 = vector.multi_reduction <add>, %167, %cst_71 [1] : vector<32x128xf32> to vector<32xf32>
    %169 = vector.shape_cast %168 : vector<32xf32> to vector<32x1xf32>
    %170 = vector.extract_strided_slice %164 {offsets = [1, 0], sizes = [1, 128], strides = [1, 1]} : vector<2x128xf32> to vector<1x128xf32>
    %171 = vector.broadcast %170 : vector<1x128xf32> to vector<32x128xf32>
    %172 = arith.mulf %160, %171 : vector<32x128xf32>
    %cst_72 = arith.constant dense<0.000000e+00> : vector<32xf32>
    %173 = vector.multi_reduction <add>, %172, %cst_72 [1] : vector<32x128xf32> to vector<32xf32>
    %174 = vector.shape_cast %173 : vector<32xf32> to vector<32x1xf32>
    %c0_73 = arith.constant 0 : index
    %c0_74 = arith.constant 0 : index
    %175 = vector.load %arg14[%c0_73, %c0_74] : memref<32x128xf32, #tpu.memory_space<vmem>>, vector<32x128xf32>
    tpu.vector_store %arg14[%c0_73, %c0_74], %141 {strides = array<i32>} : memref<32x128xf32, #tpu.memory_space<vmem>>, vector<32x128xf32>,
    %c0_i32 = arith.constant 0 : i32
    %176 = vector.broadcast %c0_i32 : i32 to vector<32x128xi32>
    %177 = arith.cmpi eq, %126, %176 : vector<32x128xi32>
    %cst_75 = arith.constant 0.000000e+00 : f32
    %178 = vector.shape_cast %125 : vector<32x1xf32> to vector<32x1xf32>
    %179 = vector.broadcast %178 : vector<32x1xf32> to vector<32x128xf32>
    %180 = vector.broadcast %cst_75 : f32 to vector<32x128xf32>
    %181 = arith.select %177, %179, %180 : vector<32x128xi1>, vector<32x128xf32>
    %c1_i32 = arith.constant 1 : i32
    %182 = vector.broadcast %c1_i32 : i32 to vector<32x128xi32>
    %183 = arith.cmpi eq, %126, %182 : vector<32x128xi32>
    %cst_76 = arith.constant 0.000000e+00 : f32
    %184 = vector.shape_cast %150 : vector<32x1xf32> to vector<32x1xf32>
    %185 = vector.broadcast %184 : vector<32x1xf32> to vector<32x128xf32>
    %186 = vector.broadcast %cst_76 : f32 to vector<32x128xf32>
    %187 = arith.select %183, %185, %186 : vector<32x128xi1>, vector<32x128xf32>
    %188 = arith.addf %181, %187 : vector<32x128xf32>
    %c2_i32 = arith.constant 2 : i32
    %189 = vector.broadcast %c2_i32 : i32 to vector<32x128xi32>
    %190 = arith.cmpi eq, %126, %189 : vector<32x128xi32>
    %cst_77 = arith.constant 0.000000e+00 : f32
    %191 = vector.shape_cast %163 : vector<32x1xf32> to vector<32x1xf32>
    %192 = vector.broadcast %191 : vector<32x1xf32> to vector<32x128xf32>
    %193 = vector.broadcast %cst_77 : f32 to vector<32x128xf32>
    %194 = arith.select %190, %192, %193 : vector<32x128xi1>, vector<32x128xf32>
    %195 = arith.addf %188, %194 : vector<32x128xf32>
    %c3_i32 = arith.constant 3 : i32
    %196 = vector.broadcast %c3_i32 : i32 to vector<32x128xi32>
    %197 = arith.cmpi eq, %126, %196 : vector<32x128xi32>
    %cst_78 = arith.constant 0.000000e+00 : f32
    %198 = vector.shape_cast %156 : vector<32x1xf32> to vector<32x1xf32>
    %199 = vector.broadcast %198 : vector<32x1xf32> to vector<32x128xf32>
    %200 = vector.broadcast %cst_78 : f32 to vector<32x128xf32>
    %201 = arith.select %197, %199, %200 : vector<32x128xi1>, vector<32x128xf32>
    %202 = arith.addf %195, %201 : vector<32x128xf32>
    %c4_i32 = arith.constant 4 : i32
    %203 = vector.broadcast %c4_i32 : i32 to vector<32x128xi32>
    %204 = arith.cmpi eq, %126, %203 : vector<32x128xi32>
    %cst_79 = arith.constant 0.000000e+00 : f32
    %205 = vector.shape_cast %169 : vector<32x1xf32> to vector<32x1xf32>
    %206 = vector.broadcast %205 : vector<32x1xf32> to vector<32x128xf32>
    %207 = vector.broadcast %cst_79 : f32 to vector<32x128xf32>
    %208 = arith.select %204, %206, %207 : vector<32x128xi1>, vector<32x128xf32>
    %209 = arith.addf %202, %208 : vector<32x128xf32>
    %c5_i32 = arith.constant 5 : i32
    %210 = vector.broadcast %c5_i32 : i32 to vector<32x128xi32>
    %211 = arith.cmpi eq, %126, %210 : vector<32x128xi32>
    %cst_80 = arith.constant 0.000000e+00 : f32
    %212 = vector.shape_cast %174 : vector<32x1xf32> to vector<32x1xf32>
    %213 = vector.broadcast %212 : vector<32x1xf32> to vector<32x128xf32>
    %214 = vector.broadcast %cst_80 : f32 to vector<32x128xf32>
    %215 = arith.select %211, %213, %214 : vector<32x128xi1>, vector<32x128xf32>
    %216 = arith.addf %209, %215 : vector<32x128xf32>
    %c0_81 = arith.constant 0 : index
    %c0_82 = arith.constant 0 : index
    %217 = vector.load %arg15[%c0_81, %c0_82] : memref<32x128xf32, #tpu.memory_space<vmem>>, vector<32x128xf32>
    tpu.vector_store %arg15[%c0_81, %c0_82], %216 {strides = array<i32>} : memref<32x128xf32, #tpu.memory_space<vmem>>, vector<32x128xf32>,
    %218 = tpu.concatenate %92, %118, %90, %116 in 1 : vector<32x32xf32>, vector<32x32xf32>, vector<32x32xf32>, vector<32x32xf32> -> vector<32x128xf32>
    %c0_83 = arith.constant 0 : index
    %c0_84 = arith.constant 0 : index
    %219 = vector.load %arg16[%c0_83, %c0_84] : memref<32x128xf32, #tpu.memory_space<vmem>>, vector<32x128xf32>
    tpu.vector_store %arg16[%c0_83, %c0_84], %218 {strides = array<i32>} : memref<32x128xf32, #tpu.memory_space<vmem>>, vector<32x128xf32>,
    return
  }
  func.func @transform_0(%arg0: i32) -> (i32, i32, i32) {
    %c0_i32 = arith.constant 0 : i32
    %c0_i32_0 = arith.constant 0 : i32
    %c0_i32_1 = arith.constant 0 : i32
    return %arg0, %c0_i32, %c0_i32_0 : i32, i32, i32
  }
  func.func @transform_1(%arg0: i32) -> (i32, i32, i32) {
    %c0_i32 = arith.constant 0 : i32
    %c0_i32_0 = arith.constant 0 : i32
    %c0_i32_1 = arith.constant 0 : i32
    %c0_i32_2 = arith.constant 0 : i32
    return %c0_i32, %c0_i32_0, %c0_i32_1 : i32, i32, i32
  }
  func.func @transform_2(%arg0: i32) -> (i32, i32) {
    %c0_i32 = arith.constant 0 : i32
    %c0_i32_0 = arith.constant 0 : i32
    %c0_i32_1 = arith.constant 0 : i32
    return %c0_i32, %c0_i32_0 : i32, i32
  }
  func.func @transform_3(%arg0: i32) -> (i32, i32, i32) {
    %c0_i32 = arith.constant 0 : i32
    %c0_i32_0 = arith.constant 0 : i32
    %c0_i32_1 = arith.constant 0 : i32
    %c0_i32_2 = arith.constant 0 : i32
    return %c0_i32, %c0_i32_0, %c0_i32_1 : i32, i32, i32
  }
  func.func @transform_4(%arg0: i32) -> (i32, i32) {
    %c0_i32 = arith.constant 0 : i32
    %c0_i32_0 = arith.constant 0 : i32
    %c0_i32_1 = arith.constant 0 : i32
    return %c0_i32, %c0_i32_0 : i32, i32
  }
  func.func @transform_5(%arg0: i32) -> (i32, i32) {
    %c0_i32 = arith.constant 0 : i32
    %c0_i32_0 = arith.constant 0 : i32
    %c0_i32_1 = arith.constant 0 : i32
    return %c0_i32, %c0_i32_0 : i32, i32
  }
  func.func @transform_6(%arg0: i32) -> (i32, i32) {
    %c0_i32 = arith.constant 0 : i32
    %c0_i32_0 = arith.constant 0 : i32
    %c0_i32_1 = arith.constant 0 : i32
    return %c0_i32, %c0_i32_0 : i32, i32
  }
  func.func @transform_7(%arg0: i32) -> (i32, i32, i32) {
    %c0_i32 = arith.constant 0 : i32
    %c0_i32_0 = arith.constant 0 : i32
    %c0_i32_1 = arith.constant 0 : i32
    %c0_i32_2 = arith.constant 0 : i32
    return %c0_i32, %c0_i32_0, %c0_i32_1 : i32, i32, i32
  }
  func.func @transform_8(%arg0: i32) -> (i32, i32, i32) {
    %c0_i32 = arith.constant 0 : i32
    %c0_i32_0 = arith.constant 0 : i32
    %c0_i32_1 = arith.constant 0 : i32
    %c0_i32_2 = arith.constant 0 : i32
    return %c0_i32, %c0_i32_0, %c0_i32_1 : i32, i32, i32
  }
  func.func @transform_9(%arg0: i32) -> (i32, i32) {
    %c0_i32 = arith.constant 0 : i32
    %c0_i32_0 = arith.constant 0 : i32
    return %arg0, %c0_i32 : i32, i32
  }
  func.func @transform_10(%arg0: i32) -> (i32, i32) {
    %c0_i32 = arith.constant 0 : i32
    %c0_i32_0 = arith.constant 0 : i32
    %c0_i32_1 = arith.constant 0 : i32
    return %c0_i32, %c0_i32_0 : i32, i32
  }
  func.func @transform_11(%arg0: i32) -> (i32, i32) {
    %c0_i32 = arith.constant 0 : i32
    %c0_i32_0 = arith.constant 0 : i32
    %c0_i32_1 = arith.constant 0 : i32
    return %c0_i32, %c0_i32_0 : i32, i32
  }
  func.func @transform_12(%arg0: i32) -> (i32, i32) {
    %c0_i32 = arith.constant 0 : i32
    %c0_i32_0 = arith.constant 0 : i32
    %c0_i32_1 = arith.constant 0 : i32
    return %c0_i32, %c0_i32_0 : i32, i32
  }
  func.func @transform_13(%arg0: i32) -> (i32, i32) {
    %c0_i32 = arith.constant 0 : i32
    %c0_i32_0 = arith.constant 0 : i32
    return %arg0, %c0_i32 : i32, i32
  }
  func.func @transform_14(%arg0: i32) -> (i32, i32) {
    %c0_i32 = arith.constant 0 : i32
    %c0_i32_0 = arith.constant 0 : i32
    return %arg0, %c0_i32 : i32, i32
  }
  func.func @transform_15(%arg0: i32) -> (i32, i32) {
    %c0_i32 = arith.constant 0 : i32
    %c0_i32_0 = arith.constant 0 : i32
    return %arg0, %c0_i32 : i32, i32
  }
}

</mosaic_0001>

<bundles_post_ra>
// kernel: _lambda_.1
= control target key start
LH: loop header
LB: loop body
LE: loop exit
PB: predicated region body
PF: predicated region fallthrough
CT: control target
= control target key end

     0   :  { %v4827_v2 = vmov 0   ;;  %vm316_vm0 = vcmask 1043456   ;;  %vm261_vm1 = vcmask 719872   ;;  %s6340_s0 = inlined_call_operand.vmem [shape: bf16[1,352,88], index: 0, kind: input, shape index: {}]   ;;  %s6341_s1 = inlined_call_operand.vmem [shape: bf16[3,88,144], index: 1, kind: input, shape index: {}]   ;;  %s6342_s2 = inlined_call_operand.vmem [shape: f32[1,144], index: 2, kind: input, shape index: {}]   ;;  %s6343_s3 = inlined_call_operand.vmem [shape: bf16[3,144,224], index: 3, kind: input, shape index: {}]   ;;  %s6344_s4 = inlined_call_operand.vmem [shape: f32[1,224], index: 4, kind: input, shape index: {}]   ;;  %s6345_s5 = inlined_call_operand.vmem [shape: bf16[224,224], index: 5, kind: input, shape index: {}]   ;;  %s6346_s6 = inlined_call_operand.vmem [shape: f32[1,32], index: 6, kind: input, shape index: {}]   ;;  %s6347_s7 = inlined_call_operand.vmem [shape: bf16[2,64,128], index: 7, kind: input, shape index: {}]   ;;  %s6348_s8 = inlined_call_operand.vmem [shape: f32[2,1,128], index: 8, kind: input, shape index: {}]   ;;  %s6349_s9 = inlined_call_operand.vmem [shape: f32[32,128], index: 9, kind: input, shape index: {}]   ;;  %s6350_s10 = inlined_call_operand.vmem [shape: bf16[32,128], index: 10, kind: input, shape index: {}]   ;;  %s6351_s11 = inlined_call_operand.vmem [shape: f32[1,128], index: 11, kind: input, shape index: {}]   ;;  %s6352_s12 = inlined_call_operand.vmem [shape: f32[2,128], index: 12, kind: input, shape index: {}]   ;;  %s6353_s13 = inlined_call_operand.vmem [shape: f32[32,128], index: 13, kind: output, shape index: {0}]   ;;  %s6354_s14 = inlined_call_operand.vmem [shape: f32[32,128], index: 14, kind: output, shape index: {1}]   ;;  %s6355_s15 = inlined_call_operand.hbm [shape: f32[32,128], index: 15, kind: output, shape index: {2}]  }
   0x1   :  { %v4509_v0 = vld [vmem:[%s6341_s1 + $0x5c] ss:$8 sps:$4 sm:$0xff]   ;;  %v4511_v1 = vld [vmem:[%s6341_s1 + $0x58] ss:$8 sps:$4 sm:$0xff]   ;;  %355 = vmatprep.mubr.bf16.mxu0 %v4827_v2  ;;  %v4512_v3 = vld [vmem:[%s6341_s1 + $0x6c] ss:$8 sps:$4 sm:$0xff]  }
   0x2   :  { %323 = vmatprep.subr.bf16.mxu0 %v4509_v0  ;;  %v4514_v4 = vld [vmem:[%s6341_s1 + $0x68] ss:$8 sps:$4 sm:$0xff]   ;;  %v4515_v5 = vld [vmem:[%s6341_s1 + $0x7c] ss:$8 sps:$4 sm:$0xff]   ;;  %v4517_v6 = vld [vmem:[%s6341_s1 + $0x78] ss:$8 sps:$4 sm:$0xff]  }
   0x3   :  { %324 = vmatpush1.bf16.msra.mxu0 %v4511_v1  ;;  %v4518_v7 = vld [vmem:[%s6341_s1 + $0x8c] ss:$8 sps:$4 sm:$0xff]   ;;  %v4520_v8 = vld [vmem:[%s6341_s1 + $0x88] ss:$8 sps:$4 sm:$0xff]   ;;  %v4521_v9 = vld [vmem:[%s6341_s1 + $0x9c] ss:$8 sps:$4 sm:$0xff]  }
   0x4   :  { %325 = vmatprep.subr.bf16.mxu0 %v4512_v3  ;;  %v3842_v10 = vld [vmem:[%s6341_s1 + $0xa8] sm:$0xff]  ;;  %v4523_v11 = vld [vmem:[%s6341_s1 + $0x98] ss:$8 sps:$4 sm:$0xff]   ;;  %v4958_v16 = vld [vmem:[%s6340_s0 + $0x10] sm:$0xff]  }
   0x5   :  { %v3871_v12 = vcombine.low %v3842_v10, %v3842_v10  ;;  %v3872_v13 = vcombine.high %v3842_v10, %v3842_v10  ;;  %v4529_v15 = vld [vmem:[%s6341_s1 + $0x4] ss:$8 sps:$4 sm:$0xff]   ;;  %v4527_v17 = vld [vmem:[%s6341_s1] ss:$8 sps:$4 sm:$0xff]   ;;  %v4535_v18 = vld [vmem:[%s6341_s1 + $0x14] ss:$8 sps:$4 sm:$0xff]  }
   0x6   :  { %v4533_v19 = vld [vmem:[%s6341_s1 + $0x10] ss:$8 sps:$4 sm:$0xff]   ;;  %v4541_v20 = vld [vmem:[%s6341_s1 + $0x24] ss:$8 sps:$4 sm:$0xff]   ;;  %v4539_v22 = vld [vmem:[%s6341_s1 + $0x20] ss:$8 sps:$4 sm:$0xff]  }
   0x7   :  { %326 = vmatpush1.bf16.msra.mxu0 %v4514_v4  ;;  %v318_v14 = vsel %vm316_vm0, %v3871_v12, 0  ;;  %v4978_v21 = vld [vmem:[%s6340_s0 + $0x18] sm:$0xff]   ;;  %v4553_v25 = vld [vmem:[%s6341_s1 + $0x44] ss:$8 sps:$4 sm:$0xff]   ;;  %v103_v26 = vld [vmem:[%s6341_s1 + $0x50] sm:$0xff] }
   0x8   :  { %327 = vmatprep.subr.bf16.mxu0 %v4515_v5  ;;  %v4547_v23 = vld [vmem:[%s6341_s1 + $0x34] ss:$8 sps:$4 sm:$0xff]   ;;  %v4545_v24 = vld [vmem:[%s6341_s1 + $0x30] ss:$8 sps:$4 sm:$0xff]   ;;  %v5001_v27 = vld [vmem:[%s6340_s0 + $0x20] sm:$0xff]   ;;  %v3905_v29 = vcombine.high %v103_v26, %v103_v26  ;;  %v3904_v30 = vcombine.low %v103_v26, %v103_v26 }
   0x9   :  { %v4551_v28 = vld [vmem:[%s6341_s1 + $0x40] ss:$8 sps:$4 sm:$0xff]   ;;  %v4564_v31 = vld [vmem:[%s6341_s1 + $0xb4] ss:$8 sps:$4 sm:$0xff]  }
   0xa   :  { %v5015_v32 = vld [vmem:[%s6340_s0 + $0x28] sm:$0xff]   ;;  %v608_v33 = vsel %vm316_vm0, %v3904_v30, 0  ;;  %v5025_v34 = vld [vmem:[%s6340_s0 + $0x30] sm:$0xff]   ;;  %v5033_v35 = vld [vmem:[%s6340_s0 + $0x38] sm:$0xff]  }
   0xb   :  { %328 = vmatpush1.bf16.msra.mxu0 %v4517_v6  ;;  %v5041_v36 = vld [vmem:[%s6340_s0 + $0x40] sm:$0xff]  }
   0xc   :  { %329 = vmatprep.subr.bf16.mxu0 %v4518_v7 }
   0xf   :  { %330 = vmatpush1.bf16.msra.mxu0 %v4520_v8 }
  0x10   :  { %331 = vmatprep.subr.bf16.mxu0 %v4521_v9 }
  0x13   :  { %332 = vmatpush1.bf16.msra.mxu0 %v4523_v11 }
  0x14   :  { %3873 = vmatprep.subr.msk.bf16.mxu0 %vm316_vm0, %v3872_v13 }
  0x17   :  { %334 = vmatpush1.bf16.msra.mxu0 %v318_v14 }
  0x18   :  { %613 = vmatprep.subr.bf16.mxu0 %v4529_v15 }
  0x1a   :  { %3874 = vmatmul.mubr.msk.bf16.vlgmr.msra.gmra.mrb[0].mxu0 %vm261_vm1, %v4958_v16 }
  0x1b   :  { %614 = vmatpush1.bf16.msra.mxu0 %v4527_v17  ;;  %365 = vmatprep.mubr.bf16.mxu0 %v4827_v2 }
  0x1c   :  { %615 = vmatprep.subr.bf16.mxu0 %v4535_v18 }
  0x1f   :  { %616 = vmatpush1.bf16.msra.mxu0 %v4533_v19 }
  0x20   :  { %617 = vmatprep.subr.bf16.mxu0 %v4541_v20 }
  0x22   :  { %3875 = vmatmul.mubr.msk.bf16.gmra.mrb[4].mxu0 %vm261_vm1, %v4978_v21 }
  0x23   :  { %375 = vmatprep.mubr.bf16.mxu0 %v4827_v2  ;;  %618 = vmatpush1.bf16.msra.mxu0 %v4539_v22 }
  0x24   :  { %619 = vmatprep.subr.bf16.mxu0 %v4547_v23 }
  0x27   :  { %620 = vmatpush1.bf16.msra.mxu0 %v4545_v24 }
  0x28   :  { %621 = vmatprep.subr.bf16.mxu0 %v4553_v25 }
  0x2a   :  { %3876 = vmatmul.mubr.msk.bf16.gmra.mrb[8].mxu0 %vm261_vm1, %v5001_v27 }
  0x2b   :  { %385 = vmatprep.mubr.bf16.mxu0 %v4827_v2  ;;  %622 = vmatpush1.bf16.msra.mxu0 %v4551_v28 }
  0x2c   :  { %3906 = vmatprep.subr.msk.bf16.mxu0 %vm316_vm0, %v3905_v29 }
  0x2f   :  { %624 = vmatpush1.bf16.msra.mxu0 %v608_v33 }
  0x30   :  { %915 = vmatprep.subr.bf16.mxu0 %v4564_v31 }
  0x32   :  { %3877 = vmatmul.mubr.msk.bf16.gmra.mrb[12].mxu0 %vm261_vm1, %v5015_v32 }
  0x33   :  { %395 = vmatprep.mubr.bf16.mxu0 %v4827_v2 }
  0x3a   :  { %3878 = vmatmul.mubr.msk.bf16.gmra.mrb[16].mxu0 %vm261_vm1, %v5025_v34 }
  0x3b   :  { %405 = vmatprep.mubr.bf16.mxu0 %v4827_v2 }
  0x42   :  { %3879 = vmatmul.mubr.msk.bf16.gmra.mrb[20].mxu0 %vm261_vm1, %v5033_v35 }
  0x43   :  { %415 = vmatprep.mubr.bf16.mxu0 %v4827_v2 }
  0x4a   :  { %3880 = vmatmul.mubr.msk.bf16.gmra.mrb[24].mxu0 %vm261_vm1, %v5041_v36 }
  0x4b   :  { %21 = vsyncpa [#allocation3], 0  ;;  %425 = vmatprep.mubr.bf16.mxu0 %v4827_v2  ;;  %v5049_v37 = vld [vmem:[%s6340_s0 + $0x48] sm:$0xff]   ;;  %v5057_v38 = vld [vmem:[%s6340_s0 + $0x50] sm:$0xff]   ;;  %vm1519_vm2 = vcmask 130048   ;;  %vm2668_vm3 = vcmask 785408  }
  0x4c   :  { %v5065_v39 = vld [vmem:[%s6340_s0 + $0x58] sm:$0xff]   ;;  %v5073_v40 = vld [vmem:[%s6340_s0 + $0x60] sm:$0xff]   ;;  %v5081_v41 = vld [vmem:[%s6340_s0 + $0x68] sm:$0xff]   ;;  %s4829_s16 = smov 64   ;;  %vm2995_vm4 = vcmask 261120   ;;  %vm3041_vm5 = vcmask 523264  }
  0x4d   :  { %v5089_v42 = vld [vmem:[%s6340_s0 + $0x70] sm:$0xff]   ;;  %v5097_v43 = vld [vmem:[%s6340_s0 + $0x78] sm:$0xff]   ;;  %v5105_v44 = vld [vmem:[%s6340_s0 + $0x80] sm:$0xff]  }
  0x4e   :  { %v5113_v45 = vld [vmem:[%s6340_s0 + $0x88] sm:$0xff]   ;;  %v5121_v46 = vld [vmem:[%s6340_s0 + $0x90] sm:$0xff]   ;;  %v5129_v47 = vld [vmem:[%s6340_s0 + $0x98] sm:$0xff]  }
  0x4f   :  { %v4561_v48 = vld [vmem:[%s6340_s0] sm:$0xff]   ;;  %v4562_v49 = vld [vmem:[%s6341_s1 + $0xb0] ss:$8 sps:$4 sm:$0xff]   ;;  %v4571_v52 = vld [vmem:[%s6341_s1 + $0xd4] ss:$8 sps:$4 sm:$0xff]  }
  0x50   :  { %v4568_v50 = vld [vmem:[%s6341_s1 + $0xc4] ss:$8 sps:$4 sm:$0xff]   ;;  %v4566_v51 = vld [vmem:[%s6341_s1 + $0xc0] ss:$8 sps:$4 sm:$0xff]   ;;  %v4569_v54 = vld [vmem:[%s6341_s1 + $0xd0] ss:$8 sps:$4 sm:$0xff]  }
  0x51   :  { %v4565_v53 = vld [vmem:[%s6340_s0 + $0x8] sm:$0xff]   ;;  %v4577_v57 = vld [vmem:[%s6341_s1 + $0xf4] ss:$8 sps:$4 sm:$0xff]   ;;  %v3935_v58 = vld [vmem:[%s6341_s1 + $0x100] sm:$0xff] }
  0x52   :  { %3881 = vmatmul.mubr.msk.bf16.gmra.mrb[28].mxu0 %vm261_vm1, %v5049_v37  ;;  %v4574_v55 = vld [vmem:[%s6341_s1 + $0xe4] ss:$8 sps:$4 sm:$0xff]   ;;  %v4572_v56 = vld [vmem:[%s6341_s1 + $0xe0] ss:$8 sps:$4 sm:$0xff]   ;;  %v4575_v59 = vld [vmem:[%s6341_s1 + $0xf0] ss:$8 sps:$4 sm:$0xff]   ;;  %v3949_v60 = vcombine.high %v3935_v58, %v3935_v58  ;;  %v3948_v61 = vcombine.low %v3935_v58, %v3935_v58 }
  0x53   :  { %435 = vmatprep.mubr.bf16.mxu0 %v4827_v2  ;;  %v4582_v63 = vld [vmem:[%s6343_s3 + $0x94] ss:$8 sps:$4 sm:$0xff]   ;;  %v4584_v0 = vld [vmem:[%s6343_s3 + $0x90] ss:$8 sps:$4 sm:$0xff]   ;;  %v4585_v1 = vld [vmem:[%s6343_s3 + $0xa4] ss:$8 sps:$4 sm:$0xff]  }
  0x54   :  { %v910_v62 = vsel %vm316_vm0, %v3948_v61, 0  ;;  %1562 = vmatprep.subr.bf16.mxu1 %v4582_v63  ;;  %v4587_v3 = vld [vmem:[%s6343_s3 + $0xa0] ss:$8 sps:$4 sm:$0xff]   ;;  %v4588_v4 = vld [vmem:[%s6343_s3 + $0xb4] ss:$8 sps:$4 sm:$0xff]   ;;  %s4830_s1 = smov 32  }
  0x55   :  { %1563 = vmatpush1.bf16.msra.mxu1 %v4584_v0  ;;  %v4590_v5 = vld [vmem:[%s6343_s3 + $0xb0] ss:$8 sps:$4 sm:$0xff]   ;;  %v4591_v6 = vld [vmem:[%s6343_s3 + $0xc4] ss:$8 sps:$4 sm:$0xff]   ;;  %v4593_v7 = vld [vmem:[%s6343_s3 + $0xc0] ss:$8 sps:$4 sm:$0xff]  }
  0x56   :  { %1564 = vmatprep.subr.bf16.mxu1 %v4585_v1  ;;  %v4594_v8 = vld [vmem:[%s6343_s3 + $0xd4] ss:$8 sps:$4 sm:$0xff]   ;;  %v4596_v9 = vld [vmem:[%s6343_s3 + $0xd0] ss:$8 sps:$4 sm:$0xff]   ;;  %v4597_v10 = vld [vmem:[%s6343_s3 + $0xe4] ss:$8 sps:$4 sm:$0xff]  }
  0x57   :  { %v4599_v11 = vld [vmem:[%s6343_s3 + $0xe0] ss:$8 sps:$4 sm:$0xff]   ;;  %v4600_v12 = vld [vmem:[%s6343_s3 + $0xf4] ss:$8 sps:$4 sm:$0xff]   ;;  %v4602_v13 = vld [vmem:[%s6343_s3 + $0xf0] ss:$8 sps:$4 sm:$0xff]  }
  0x58   :  { %v4603_v14 = vld [vmem:[%s6343_s3 + $0x104] ss:$8 sps:$4 sm:$0xff]   ;;  %v4605_v15 = vld [vmem:[%s6343_s3 + $0x100] ss:$8 sps:$4 sm:$0xff]   ;;  %v4608_v17 = vld [vmem:[%s6343_s3 + $0x110] ss:$8 sps:$4 sm:$0xff]  }
  0x59   :  { %1565 = vmatpush1.bf16.msra.mxu1 %v4587_v3  ;;  %v4611_v18 = vld [vmem:[%s6343_s3 + $0x4] ss:$8 sps:$4 sm:$0xff]   ;;  %v1200_v24 = vld [vmem:[%s6342_s2] sm:$0x3] }
  0x5a   :  { %3882 = vmatmul.mubr.msk.bf16.gmra.mrb[32].mxu0 %vm261_vm1, %v5057_v38  ;;  %1566 = vmatprep.subr.bf16.mxu1 %v4588_v4  ;;  %v4580_v19 = vld [vmem:[%s6340_s0 + $0xa0] sm:$0xff]   ;;  %v4581_v20 = vld [vmem:[%s6340_s0 + $0xa8] sm:$0xff]   ;;  %s4828_s0 = smov 96  }
  0x5b   :  { %445 = vmatprep.mubr.bf16.mxu0 %v4827_v2 }
  0x5d   :  { %1567 = vmatpush1.bf16.msra.mxu1 %v4590_v5 }
  0x5e   :  { %1568 = vmatprep.subr.bf16.mxu1 %v4591_v6 }
  0x61   :  { %1569 = vmatpush1.bf16.msra.mxu1 %v4593_v7  ;;  %v4609_v7 = vld [vmem:[%s6343_s3] ss:$8 sps:$4 sm:$0xff]  }
  0x62   :  { %3883 = vmatmul.mubr.msk.bf16.gmra.mrb[36].mxu0 %vm261_vm1, %v5065_v39  ;;  %1570 = vmatprep.subr.bf16.mxu1 %v4594_v8 }
  0x63   :  { %455 = vmatprep.mubr.bf16.mxu0 %v4827_v2 }
  0x65   :  { %1571 = vmatpush1.bf16.msra.mxu1 %v4596_v9 }
  0x66   :  { %1572 = vmatprep.subr.bf16.mxu1 %v4597_v10  ;;  %v4614_v10 = vld [vmem:[%s6343_s3 + $0x14] ss:$8 sps:$4 sm:$0xff]  }
  0x69   :  { %1573 = vmatpush1.bf16.msra.mxu1 %v4599_v11 }
  0x6a   :  { %3884 = vmatmul.mubr.msk.bf16.gmra.mrb[40].mxu0 %vm261_vm1, %v5073_v40  ;;  %1574 = vmatprep.subr.bf16.mxu1 %v4600_v12 }
  0x6b   :  { %465 = vmatprep.mubr.bf16.mxu0 %v4827_v2 }
  0x6d   :  { %1575 = vmatpush1.bf16.msra.mxu1 %v4602_v13 }
  0x6e   :  { %1576 = vmatprep.subr.bf16.mxu1 %v4603_v14 }
  0x71   :  { %1577 = vmatpush1.bf16.msra.mxu1 %v4605_v15 }
  0x72   :  { %3885 = vmatmul.mubr.msk.bf16.gmra.mrb[44].mxu0 %vm261_vm1, %v5081_v41 }
  0x73   :  { %475 = vmatprep.mubr.bf16.mxu0 %v4827_v2 }
  0x7a   :  { %3886 = vmatmul.mubr.msk.bf16.gmra.mrb[48].mxu0 %vm261_vm1, %v5089_v42 }
  0x7b   :  { %485 = vmatprep.mubr.bf16.mxu0 %v4827_v2 }
  0x82   :  { %3887 = vmatmul.mubr.msk.bf16.gmra.mrb[52].mxu0 %vm261_vm1, %v5097_v43 }
  0x83   :  { %495 = vmatprep.mubr.bf16.mxu0 %v4827_v2 }
  0x8a   :  { %3888 = vmatmul.mubr.msk.bf16.gmra.mrb[56].mxu0 %vm261_vm1, %v5105_v44 }
  0x8b   :  { %505 = vmatprep.mubr.bf16.mxu0 %v4827_v2 }
  0x92   :  { %3889 = vmatmul.mubr.msk.bf16.gmra.mrb[60].mxu0 %vm261_vm1, %v5113_v45 }
  0x93   :  { %515 = vmatprep.mubr.bf16.mxu0 %v4827_v2 }
  0x9a   :  { %3890 = vmatmul.mubr.msk.bf16.gmra.mrb[64].mxu0 %vm261_vm1, %v5121_v46 }
  0x9b   :  { %525 = vmatprep.mubr.bf16.mxu0 %v4827_v2 }
  0xa2   :  { %3891 = vmatmul.mubr.msk.bf16.gmra.mrb[68].mxu0 %vm261_vm1, %v5129_v47 }
  0xa3   :  { %645 = vmatprep.mubr.bf16.mxu0 %v4827_v2 }
  0xaa   :  { %3907 = vmatmul.mubr.msk.bf16.vlgmr.msra.gmra.mrb[0].mxu0 %vm261_vm1, %v4561_v48 }
  0xab   :  { %916 = vmatpush1.bf16.msra.mxu0 %v4562_v49  ;;  %655 = vmatprep.mubr.bf16.mxu0 %v4827_v2 }
  0xac   :  { %917 = vmatprep.subr.bf16.mxu0 %v4568_v50 }
  0xaf   :  { %918 = vmatpush1.bf16.msra.mxu0 %v4566_v51 }
  0xb0   :  { %919 = vmatprep.subr.bf16.mxu0 %v4571_v52 }
  0xb2   :  { %3908 = vmatmul.mubr.msk.bf16.gmra.mrb[4].mxu0 %vm261_vm1, %v4565_v53 }
  0xb3   :  { %665 = vmatprep.mubr.bf16.mxu0 %v4827_v2  ;;  %920 = vmatpush1.bf16.msra.mxu0 %v4569_v54 }
  0xb4   :  { %921 = vmatprep.subr.bf16.mxu0 %v4574_v55 }
  0xb7   :  { %922 = vmatpush1.bf16.msra.mxu0 %v4572_v56 }
  0xb8   :  { %923 = vmatprep.subr.bf16.mxu0 %v4577_v57 }
  0xba   :  { %3909 = vmatmul.mubr.msk.bf16.gmra.mrb[8].mxu0 %vm261_vm1, %v4958_v16  ;;  %v4606_v16 = vld [vmem:[%s6343_s3 + $0x114] ss:$8 sps:$4 sm:$0xff]  }
  0xbb   :  { %675 = vmatprep.mubr.bf16.mxu0 %v4827_v2  ;;  %924 = vmatpush1.bf16.msra.mxu0 %v4575_v59 }
  0xbc   :  { %3950 = vmatprep.subr.msk.bf16.mxu0 %vm316_vm0, %v3949_v60  ;;  %1578 = vmatprep.subr.bf16.mxu1 %v4606_v16  ;;  %v4612_v16 = vld [vmem:[%s6343_s3 + $0x10] ss:$8 sps:$4 sm:$0xff]  }
  0xbd   :  { %1579 = vmatpush1.bf16.msra.mxu1 %v4608_v17 }
  0xbe   :  { %1831 = vmatprep.subr.bf16.mxu1 %v4611_v18 }
  0xbf   :  { %926 = vmatpush1.bf16.msra.mxu0 %v910_v62 }
  0xc2   :  { %3910 = vmatmul.mubr.msk.bf16.gmra.mrb[12].mxu0 %vm261_vm1, %v4978_v21  ;;  %v1202_v21 = vlaneseq }
  0xc3   :  { %685 = vmatprep.mubr.bf16.mxu0 %v4827_v2 }
  0xc4   :  { %v1203_v22 = vshrl.u32 %v1202_v21, 7 }
  0xc6   :  { %v5339_v23 = vsub.s32 0, %v1203_v22  ;;  %v5344_v25 = vsub.s32 1, %v1203_v22 }
  0xc8   :  { %v5347_v26 = vrot.slane %v1200_v24, %v5339_v23 }
  0xca   :  { %3911 = vmatmul.mubr.msk.bf16.gmra.mrb[16].mxu0 %vm261_vm1, %v5001_v27 }
  0xcb   :  { %695 = vmatprep.mubr.bf16.mxu0 %v4827_v2 }
  0xd2   :  { %3912 = vmatmul.mubr.msk.bf16.gmra.mrb[20].mxu0 %vm261_vm1, %v5015_v32 }
  0xd3   :  { %705 = vmatprep.mubr.bf16.mxu0 %v4827_v2 }
  0xda   :  { %3913 = vmatmul.mubr.msk.bf16.gmra.mrb[24].mxu0 %vm261_vm1, %v5025_v34 }
  0xdb   :  { %715 = vmatprep.mubr.bf16.mxu0 %v4827_v2 }
  0xe2   :  { %3914 = vmatmul.mubr.msk.bf16.gmra.mrb[28].mxu0 %vm261_vm1, %v5033_v35 }
  0xe3   :  { %725 = vmatprep.mubr.bf16.mxu0 %v4827_v2 }
  0xea   :  { %3915 = vmatmul.mubr.msk.bf16.gmra.mrb[32].mxu0 %vm261_vm1, %v5041_v36 }
  0xeb   :  { %735 = vmatprep.mubr.bf16.mxu0 %v4827_v2 }
  0xf2   :  { %3916 = vmatmul.mubr.msk.bf16.gmra.mrb[36].mxu0 %vm261_vm1, %v5049_v37 }
  0xf3   :  { %745 = vmatprep.mubr.bf16.mxu0 %v4827_v2 }
  0xfa   :  { %3917 = vmatmul.mubr.msk.bf16.gmra.mrb[40].mxu0 %vm261_vm1, %v5057_v38 }
  0xfb   :  { %755 = vmatprep.mubr.bf16.mxu0 %v4827_v2 }
 0x102   :  { %3918 = vmatmul.mubr.msk.bf16.gmra.mrb[44].mxu0 %vm261_vm1, %v5065_v39 }
 0x103   :  { %765 = vmatprep.mubr.bf16.mxu0 %v4827_v2 }
 0x10a   :  { %3919 = vmatmul.mubr.msk.bf16.gmra.mrb[48].mxu0 %vm261_vm1, %v5073_v40 }
 0x10b   :  { %775 = vmatprep.mubr.bf16.mxu0 %v4827_v2 }
 0x112   :  { %3920 = vmatmul.mubr.msk.bf16.gmra.mrb[52].mxu0 %vm261_vm1, %v5081_v41 }
 0x113   :  { %785 = vmatprep.mubr.bf16.mxu0 %v4827_v2 }
 0x11a   :  { %3921 = vmatmul.mubr.msk.bf16.gmra.mrb[56].mxu0 %vm261_vm1, %v5089_v42 }
 0x11b   :  { %795 = vmatprep.mubr.bf16.mxu0 %v4827_v2 }
 0x122   :  { %3922 = vmatmul.mubr.msk.bf16.gmra.mrb[60].mxu0 %vm261_vm1, %v5097_v43 }
 0x123   :  { %805 = vmatprep.mubr.bf16.mxu0 %v4827_v2 }
 0x12a   :  { %3923 = vmatmul.mubr.msk.bf16.gmra.mrb[64].mxu0 %vm261_vm1, %v5105_v44 }
 0x12b   :  { %815 = vmatprep.mubr.bf16.mxu0 %v4827_v2 }
 0x132   :  { %3924 = vmatmul.mubr.msk.bf16.gmra.mrb[68].mxu0 %vm261_vm1, %v5113_v45 }
 0x133   :  { %947 = vmatprep.mubr.bf16.mxu0 %v4827_v2 }
 0x13a   :  { %3951 = vmatmul.mubr.msk.bf16.vlgmr.msra.gmra.mrb[0].mxu0 %vm261_vm1, %v5001_v27 }
 0x13b   :  { %957 = vmatprep.mubr.bf16.mxu0 %v4827_v2 }
 0x142   :  { %3952 = vmatmul.mubr.msk.bf16.gmra.mrb[4].mxu0 %vm261_vm1, %v5015_v32 }
 0x143   :  { %967 = vmatprep.mubr.bf16.mxu0 %v4827_v2 }
 0x14a   :  { %3953 = vmatmul.mubr.msk.bf16.gmra.mrb[8].mxu0 %vm261_vm1, %v5025_v34 }
 0x14b   :  { %977 = vmatprep.mubr.bf16.mxu0 %v4827_v2 }
 0x152   :  { %3954 = vmatmul.mubr.msk.bf16.gmra.mrb[12].mxu0 %vm261_vm1, %v5033_v35 }
 0x153   :  { %987 = vmatprep.mubr.bf16.mxu0 %v4827_v2 }
 0x15a   :  { %3955 = vmatmul.mubr.msk.bf16.gmra.mrb[16].mxu0 %vm261_vm1, %v5041_v36 }
 0x15b   :  { %997 = vmatprep.mubr.bf16.mxu0 %v4827_v2 }
 0x162   :  { %3956 = vmatmul.mubr.msk.bf16.gmra.mrb[20].mxu0 %vm261_vm1, %v5049_v37 }
 0x163   :  { %1007 = vmatprep.mubr.bf16.mxu0 %v4827_v2 }
 0x16a   :  { %3957 = vmatmul.mubr.msk.bf16.gmra.mrb[24].mxu0 %vm261_vm1, %v5057_v38 }
 0x16b   :  { %1017 = vmatprep.mubr.bf16.mxu0 %v4827_v2 }
 0x172   :  { %3958 = vmatmul.mubr.msk.bf16.gmra.mrb[28].mxu0 %vm261_vm1, %v5065_v39 }
 0x173   :  { %1027 = vmatprep.mubr.bf16.mxu0 %v4827_v2 }
 0x17a   :  { %3959 = vmatmul.mubr.msk.bf16.gmra.mrb[32].mxu0 %vm261_vm1, %v5073_v40 }
 0x17b   :  { %1037 = vmatprep.mubr.bf16.mxu0 %v4827_v2 }
 0x182   :  { %3960 = vmatmul.mubr.msk.bf16.gmra.mrb[36].mxu0 %vm261_vm1, %v5081_v41 }
 0x183   :  { %1047 = vmatprep.mubr.bf16.mxu0 %v4827_v2 }
 0x18a   :  { %3961 = vmatmul.mubr.msk.bf16.gmra.mrb[40].mxu0 %vm261_vm1, %v5089_v42 }
 0x18b   :  { %1057 = vmatprep.mubr.bf16.mxu0 %v4827_v2 }
 0x192   :  { %3962 = vmatmul.mubr.msk.bf16.gmra.mrb[44].mxu0 %vm261_vm1, %v5097_v43 }
 0x193   :  { %1067 = vmatprep.mubr.bf16.mxu0 %v4827_v2 }
 0x19a   :  { %3963 = vmatmul.mubr.msk.bf16.gmra.mrb[48].mxu0 %vm261_vm1, %v5105_v44 }
 0x19b   :  { %1077 = vmatprep.mubr.bf16.mxu0 %v4827_v2 }
 0x1a2   :  { %3964 = vmatmul.mubr.msk.bf16.gmra.mrb[52].mxu0 %vm261_vm1, %v5113_v45 }
 0x1a3   :  { %1087 = vmatprep.mubr.bf16.mxu0 %v4827_v2 }
 0x1aa   :  { %3965 = vmatmul.mubr.msk.bf16.gmra.mrb[56].mxu0 %vm261_vm1, %v5121_v46 }
 0x1ab   :  { %1097 = vmatprep.mubr.bf16.mxu0 %v4827_v2 }
 0x1b2   :  { %3966 = vmatmul.mubr.msk.bf16.gmra.mrb[60].mxu0 %vm261_vm1, %v5129_v47 }
 0x1b3   :  { %1107 = vmatprep.mubr.bf16.mxu0 %v4827_v2 }
 0x1ba   :  { %3967 = vmatmul.mubr.msk.bf16.gmra.mrb[64].mxu0 %vm261_vm1, %v4580_v19  ;;  %v4617_v19 = vld [vmem:[%s6343_s3 + $0x24] ss:$8 sps:$4 sm:$0xff]  }
 0x1bb   :  { %1117 = vmatprep.mubr.bf16.mxu0 %v4827_v2  ;;  %v5350_v2 = vrot.slane %v1200_v24, %v5344_v25 }
 0x1c2   :  { %3968 = vmatmul.mubr.msk.bf16.gmra.mrb[68].mxu0 %vm261_vm1, %v4581_v20 }
 0x20d   :  { %v949_v27 = vpop.f32.mrb[0].mxu0 }
 0x20e   :  { %v1212_v28 = vadd.f32 %v5347_v26, %v949_v27  ;;  %v951_v29 = vpop.f32.mrb[1].mxu0 }
 0x20f   :  { %v1213_v30 = vadd.f32 %v5350_v2, %v951_v29  ;;  %v953_v31 = vpop.f32.mrb[2].mxu0  ;;  %v4615_v29 = vld [vmem:[%s6343_s3 + $0x20] ss:$8 sps:$4 sm:$0xff]  }
 0x210   :  { %v1214_v32 = vadd.f32 %v5347_v26, %v953_v31  ;;  %v955_v33 = vpop.f32.mrb[3].mxu0  ;;  %v1284_v35 = vmax.f32 %v1212_v28, 0.0 }
 0x211   :  { %v1215_v34 = vadd.f32 %v5350_v2, %v955_v33  ;;  %v1285_v37 = vmax.f32 %v1213_v30, 0.0 }
 0x212   :  { %v1286_v36 = vmax.f32 %v1214_v32, 0.0  ;;  %v4620_v32 = vld [vmem:[%s6343_s3 + $0x34] ss:$8 sps:$4 sm:$0xff]  }
 0x213   :  { %v1287_v38 = vmax.f32 %v1215_v34, 0.0 }
 0x214   :  { %v5356_v39 = vpack.c.bf16 %v1286_v36, %v1284_v35 }
 0x215   :  { %v5358_v40 = vpack.c.bf16 %v1287_v38, %v1285_v37  ;;  %v959_v41 = vpop.f32.mrb[4].mxu0  ;;  %v4618_v38 = vld [vmem:[%s6343_s3 + $0x30] ss:$8 sps:$4 sm:$0xff]  }
 0x216   :  { %v1216_v42 = vadd.f32 %v5347_v26, %v959_v41  ;;  %v961_v43 = vpop.f32.mrb[5].mxu0 }
 0x217   :  { %v1217_v44 = vadd.f32 %v5350_v2, %v961_v43  ;;  %v963_v45 = vpop.f32.mrb[6].mxu0  ;;  %v4623_v43 = vld [vmem:[%s6343_s3 + $0x44] ss:$8 sps:$4 sm:$0xff]  }
 0x218   :  { %v1218_v46 = vadd.f32 %v5347_v26, %v963_v45  ;;  %v965_v47 = vpop.f32.mrb[7].mxu0  ;;  %v1288_v49 = vmax.f32 %v1216_v42, 0.0 }
 0x219   :  { %v1219_v48 = vadd.f32 %v5350_v2, %v965_v47  ;;  %v1289_v51 = vmax.f32 %v1217_v44, 0.0 }
 0x21a   :  { %v1290_v50 = vmax.f32 %v1218_v46, 0.0 }
 0x21b   :  { %v1291_v52 = vmax.f32 %v1219_v48, 0.0 }
 0x21c   :  { %v5364_v53 = vpack.c.bf16 %v1290_v50, %v1288_v49  ;;  %v4621_v49 = vld [vmem:[%s6343_s3 + $0x40] ss:$8 sps:$4 sm:$0xff]  }
 0x21d   :  { %v5366_v54 = vpack.c.bf16 %v1291_v52, %v1289_v51  ;;  %v969_v55 = vpop.f32.mrb[8].mxu0  ;;  %v4626_v52 = vld [vmem:[%s6343_s3 + $0x54] ss:$8 sps:$4 sm:$0xff]  }
 0x21e   :  { %v1220_v56 = vadd.f32 %v5347_v26, %v969_v55  ;;  %v971_v57 = vpop.f32.mrb[9].mxu0 }
 0x21f   :  { %v1221_v58 = vadd.f32 %v5350_v2, %v971_v57  ;;  %v973_v59 = vpop.f32.mrb[10].mxu0 }
 0x220   :  { %v1222_v60 = vadd.f32 %v5347_v26, %v973_v59  ;;  %v975_v61 = vpop.f32.mrb[11].mxu0  ;;  %v1292_v63 = vmax.f32 %v1220_v56, 0.0 }
 0x221   :  { %v1223_v62 = vadd.f32 %v5350_v2, %v975_v61  ;;  %v1293_v1 = vmax.f32 %v1221_v58, 0.0 }
 0x222   :  { %v1294_v0 = vmax.f32 %v1222_v60, 0.0  ;;  %v4624_v60 = vld [vmem:[%s6343_s3 + $0x50] ss:$8 sps:$4 sm:$0xff]  }
 0x223   :  { %v1295_v3 = vmax.f32 %v1223_v62, 0.0 }
 0x224   :  { %v5372_v4 = vpack.c.bf16 %v1294_v0, %v1292_v63  ;;  %v4629_v63 = vld [vmem:[%s6343_s3 + $0x64] ss:$8 sps:$4 sm:$0xff]  }
 0x225   :  { %v979_v5 = vpop.f32.mrb[12].mxu0  ;;  %v5374_v6 = vpack.c.bf16 %v1295_v3, %v1293_v1 }
 0x226   :  { %v1224_v8 = vadd.f32 %v5347_v26, %v979_v5  ;;  %v981_v9 = vpop.f32.mrb[13].mxu0 }
 0x227   :  { %v1225_v11 = vadd.f32 %v5350_v2, %v981_v9  ;;  %v983_v12 = vpop.f32.mrb[14].mxu0  ;;  %4005 = vmatprep.mubr.msk.bf16.mxu1 %vm1519_vm2, %v5374_v6 }
 0x228   :  { %v1226_v13 = vadd.f32 %v5347_v26, %v983_v12  ;;  %v985_v14 = vpop.f32.mrb[15].mxu0  ;;  %1595 = vmatmul.mubr.bf16.vlgmr.msra.gmra.mrb[0].mxu1 %v5372_v4  ;;  %v1296_v17 = vmax.f32 %v1224_v8, 0.0  ;;  %v4627_v8 = vld [vmem:[%s6343_s3 + $0x60] ss:$8 sps:$4 sm:$0xff]  }
 0x229   :  { %v1227_v15 = vadd.f32 %v5350_v2, %v985_v14  ;;  %1832 = vmatpush1.bf16.msra.mxu1 %v4609_v7  ;;  %v1297_v20 = vmax.f32 %v1225_v11, 0.0  ;;  %v4632_v11 = vld [vmem:[%s6343_s3 + $0x74] ss:$8 sps:$4 sm:$0xff]  }
 0x22a   :  { %v1298_v18 = vmax.f32 %v1226_v13, 0.0  ;;  %1833 = vmatprep.subr.bf16.mxu1 %v4614_v10 }
 0x22b   :  { %v1299_v22 = vmax.f32 %v1227_v15, 0.0 }
 0x22c   :  { %v5395_v24 = vpack.c.bf16 %v1298_v18, %v1296_v17  ;;  %v4630_v17 = vld [vmem:[%s6343_s3 + $0x70] ss:$8 sps:$4 sm:$0xff]  }
 0x22d   :  { %v5397_v27 = vpack.c.bf16 %v1299_v22, %v1297_v20  ;;  %v989_v28 = vpop.f32.mrb[16].mxu0  ;;  %1834 = vmatpush1.bf16.msra.mxu1 %v4612_v16  ;;  %v4635_v20 = vld [vmem:[%s6343_s3 + $0x84] ss:$8 sps:$4 sm:$0xff]  }
 0x22e   :  { %v1228_v30 = vadd.f32 %v5347_v26, %v989_v28  ;;  %v991_v31 = vpop.f32.mrb[17].mxu0  ;;  %1835 = vmatprep.subr.bf16.mxu1 %v4617_v19 }
 0x22f   :  { %v1229_v33 = vadd.f32 %v5350_v2, %v991_v31  ;;  %v993_v34 = vpop.f32.mrb[18].mxu0  ;;  %4006 = vmatprep.mubr.msk.bf16.mxu1 %vm1519_vm2, %v5397_v27 }
 0x230   :  { %v1230_v35 = vadd.f32 %v5347_v26, %v993_v34  ;;  %v995_v36 = vpop.f32.mrb[19].mxu0  ;;  %1605 = vmatmul.mubr.bf16.gmra.mrb[4].mxu1 %v5395_v24  ;;  %v1300_v41 = vmax.f32 %v1228_v30, 0.0 }
 0x231   :  { %v1231_v37 = vadd.f32 %v5350_v2, %v995_v36  ;;  %1836 = vmatpush1.bf16.msra.mxu1 %v4615_v29  ;;  %v1301_v44 = vmax.f32 %v1229_v33, 0.0 }
 0x232   :  { %v1302_v42 = vmax.f32 %v1230_v35, 0.0  ;;  %1837 = vmatprep.subr.bf16.mxu1 %v4620_v32  ;;  %v4633_v32 = vld [vmem:[%s6343_s3 + $0x80] ss:$8 sps:$4 sm:$0xff]   ;;  %v4638_v35 = vld [vmem:[%s6343_s3 + $0x124] ss:$8 sps:$4 sm:$0xff]  }
 0x233   :  { %v1303_v45 = vmax.f32 %v1231_v37, 0.0 }
 0x234   :  { %v5418_v46 = vpack.c.bf16 %v1302_v42, %v1300_v41 }
 0x235   :  { %v5420_v47 = vpack.c.bf16 %v1303_v45, %v1301_v44  ;;  %v999_v48 = vpop.f32.mrb[20].mxu0  ;;  %1838 = vmatpush1.bf16.msra.mxu1 %v4618_v38 }
 0x236   :  { %v1232_v50 = vadd.f32 %v5347_v26, %v999_v48  ;;  %v1001_v51 = vpop.f32.mrb[21].mxu0  ;;  %1839 = vmatprep.subr.bf16.mxu1 %v4623_v43 }
 0x237   :  { %v1233_v55 = vadd.f32 %v5350_v2, %v1001_v51  ;;  %v1003_v56 = vpop.f32.mrb[22].mxu0  ;;  %4007 = vmatprep.mubr.msk.bf16.mxu1 %vm1519_vm2, %v5420_v47 }
 0x238   :  { %v1234_v57 = vadd.f32 %v5347_v26, %v1003_v56  ;;  %v1005_v58 = vpop.f32.mrb[23].mxu0  ;;  %1615 = vmatmul.mubr.bf16.gmra.mrb[8].mxu1 %v5418_v46  ;;  %v1304_v61 = vmax.f32 %v1232_v50, 0.0 }
 0x239   :  { %v1235_v59 = vadd.f32 %v5350_v2, %v1005_v58  ;;  %1840 = vmatpush1.bf16.msra.mxu1 %v4621_v49  ;;  %v1305_v0 = vmax.f32 %v1233_v55, 0.0 }
 0x23a   :  { %v1306_v62 = vmax.f32 %v1234_v57, 0.0  ;;  %1841 = vmatprep.subr.bf16.mxu1 %v4626_v52 }
 0x23b   :  { %v1307_v1 = vmax.f32 %v1235_v59, 0.0 }
 0x23c   :  { %v5441_v3 = vpack.c.bf16 %v1306_v62, %v1304_v61 }
 0x23d   :  { %v5443_v5 = vpack.c.bf16 %v1307_v1, %v1305_v0  ;;  %v1009_v7 = vpop.f32.mrb[24].mxu0  ;;  %1842 = vmatpush1.bf16.msra.mxu1 %v4624_v60 }
 0x23e   :  { %v1236_v9 = vadd.f32 %v5347_v26, %v1009_v7  ;;  %v1011_v10 = vpop.f32.mrb[25].mxu0  ;;  %1843 = vmatprep.subr.bf16.mxu1 %v4629_v63 }
 0x23f   :  { %v1237_v12 = vadd.f32 %v5350_v2, %v1011_v10  ;;  %v1013_v13 = vpop.f32.mrb[26].mxu0  ;;  %4008 = vmatprep.mubr.msk.bf16.mxu1 %vm1519_vm2, %v5443_v5 }
 0x240   :  { %v1238_v14 = vadd.f32 %v5347_v26, %v1013_v13  ;;  %v1015_v15 = vpop.f32.mrb[27].mxu0  ;;  %1625 = vmatmul.mubr.bf16.gmra.mrb[12].mxu1 %v5441_v3  ;;  %v1308_v18 = vmax.f32 %v1236_v9, 0.0 }
 0x241   :  { %v1239_v16 = vadd.f32 %v5350_v2, %v1015_v15  ;;  %1844 = vmatpush1.bf16.msra.mxu1 %v4627_v8  ;;  %v1309_v22 = vmax.f32 %v1237_v12, 0.0 }
 0x242   :  { %v1310_v19 = vmax.f32 %v1238_v14, 0.0  ;;  %1845 = vmatprep.subr.bf16.mxu1 %v4632_v11 }
 0x243   :  { %v1311_v28 = vmax.f32 %v1239_v16, 0.0 }
 0x244   :  { %v5464_v29 = vpack.c.bf16 %v1310_v19, %v1308_v18 }
 0x245   :  { %v5466_v30 = vpack.c.bf16 %v1311_v28, %v1309_v22  ;;  %v1019_v31 = vpop.f32.mrb[28].mxu0  ;;  %1846 = vmatpush1.bf16.msra.mxu1 %v4630_v17 }
 0x246   :  { %v1240_v33 = vadd.f32 %v5347_v26, %v1019_v31  ;;  %v1021_v34 = vpop.f32.mrb[29].mxu0  ;;  %1847 = vmatprep.subr.bf16.mxu1 %v4635_v20 }
 0x247   :  { %v1241_v36 = vadd.f32 %v5350_v2, %v1021_v34  ;;  %v1023_v37 = vpop.f32.mrb[30].mxu0  ;;  %4009 = vmatprep.mubr.msk.bf16.mxu1 %vm1519_vm2, %v5466_v30 }
 0x248   :  { %v1242_v38 = vadd.f32 %v5347_v26, %v1023_v37  ;;  %v1025_v41 = vpop.f32.mrb[31].mxu0  ;;  %1635 = vmatmul.mubr.bf16.gmra.mrb[16].mxu1 %v5464_v29  ;;  %v1312_v43 = vmax.f32 %v1240_v33, 0.0 }
 0x249   :  { %v1243_v42 = vadd.f32 %v5350_v2, %v1025_v41  ;;  %1848 = vmatpush1.bf16.msra.mxu1 %v4633_v32  ;;  %v1313_v45 = vmax.f32 %v1241_v36, 0.0 }
 0x24a   :  { %v1314_v44 = vmax.f32 %v1242_v38, 0.0  ;;  %2119 = vmatprep.subr.bf16.mxu1 %v4638_v35 }
 0x24b   :  { %v1315_v48 = vmax.f32 %v1243_v42, 0.0 }
 0x24c   :  { %v5481_v49 = vpack.c.bf16 %v1314_v44, %v1312_v43 }
 0x24d   :  { %v5483_v50 = vpack.c.bf16 %v1315_v48, %v1313_v45  ;;  %v1029_v51 = vpop.f32.mrb[32].mxu0 }
 0x24e   :  { %v1244_v52 = vadd.f32 %v5347_v26, %v1029_v51  ;;  %v1031_v55 = vpop.f32.mrb[33].mxu0 }
 0x24f   :  { %v1245_v56 = vadd.f32 %v5350_v2, %v1031_v55  ;;  %v1033_v57 = vpop.f32.mrb[34].mxu0  ;;  %4010 = vmatprep.mubr.msk.bf16.mxu1 %vm1519_vm2, %v5483_v50 }
 0x250   :  { %v1246_v58 = vadd.f32 %v5347_v26, %v1033_v57  ;;  %v1035_v59 = vpop.f32.mrb[35].mxu0  ;;  %1645 = vmatmul.mubr.bf16.gmra.mrb[20].mxu1 %v5481_v49  ;;  %v1316_v61 = vmax.f32 %v1244_v52, 0.0 }
 0x251   :  { %v1247_v60 = vadd.f32 %v5350_v2, %v1035_v59  ;;  %v1317_v63 = vmax.f32 %v1245_v56, 0.0 }
 0x252   :  { %v1318_v62 = vmax.f32 %v1246_v58, 0.0 }
 0x253   :  { %v1319_v0 = vmax.f32 %v1247_v60, 0.0 }
 0x254   :  { %v5492_v1 = vpack.c.bf16 %v1318_v62, %v1316_v61 }
 0x255   :  { %v5494_v7 = vpack.c.bf16 %v1319_v0, %v1317_v63  ;;  %v1039_v8 = vpop.f32.mrb[36].mxu0 }
 0x256   :  { %v1248_v9 = vadd.f32 %v5347_v26, %v1039_v8  ;;  %v1041_v10 = vpop.f32.mrb[37].mxu0 }
 0x257   :  { %v1249_v11 = vadd.f32 %v5350_v2, %v1041_v10  ;;  %v1043_v12 = vpop.f32.mrb[38].mxu0  ;;  %4011 = vmatprep.mubr.msk.bf16.mxu1 %vm1519_vm2, %v5494_v7 }
 0x258   :  { %v1250_v13 = vadd.f32 %v5347_v26, %v1043_v12  ;;  %v1045_v14 = vpop.f32.mrb[39].mxu0  ;;  %1655 = vmatmul.mubr.bf16.gmra.mrb[24].mxu1 %v5492_v1  ;;  %v1320_v16 = vmax.f32 %v1248_v9, 0.0 }
 0x259   :  { %v1251_v15 = vadd.f32 %v5350_v2, %v1045_v14  ;;  %v1321_v18 = vmax.f32 %v1249_v11, 0.0 }
 0x25a   :  { %v1322_v17 = vmax.f32 %v1250_v13, 0.0 }
 0x25b   :  { %v1323_v19 = vmax.f32 %v1251_v15, 0.0 }
 0x25c   :  { %v5503_v20 = vpack.c.bf16 %v1322_v17, %v1320_v16 }
 0x25d   :  { %v5505_v22 = vpack.c.bf16 %v1323_v19, %v1321_v18  ;;  %v1049_v28 = vpop.f32.mrb[40].mxu0 }
 0x25e   :  { %v1252_v31 = vadd.f32 %v5347_v26, %v1049_v28  ;;  %v1051_v32 = vpop.f32.mrb[41].mxu0 }
 0x25f   :  { %v1253_v33 = vadd.f32 %v5350_v2, %v1051_v32  ;;  %v1053_v34 = vpop.f32.mrb[42].mxu0  ;;  %4012 = vmatprep.mubr.msk.bf16.mxu1 %vm1519_vm2, %v5505_v22 }
 0x260   :  { %v1254_v35 = vadd.f32 %v5347_v26, %v1053_v34  ;;  %v1055_v36 = vpop.f32.mrb[43].mxu0  ;;  %1665 = vmatmul.mubr.bf16.gmra.mrb[28].mxu1 %v5503_v20  ;;  %v1324_v38 = vmax.f32 %v1252_v31, 0.0 }
 0x261   :  { %v1255_v37 = vadd.f32 %v5350_v2, %v1055_v36  ;;  %v1325_v42 = vmax.f32 %v1253_v33, 0.0 }
 0x262   :  { %v1326_v41 = vmax.f32 %v1254_v35, 0.0 }
 0x263   :  { %v1327_v43 = vmax.f32 %v1255_v37, 0.0 }
 0x264   :  { %v5514_v44 = vpack.c.bf16 %v1326_v41, %v1324_v38 }
 0x265   :  { %v5516_v45 = vpack.c.bf16 %v1327_v43, %v1325_v42  ;;  %v1059_v48 = vpop.f32.mrb[44].mxu0 }
 0x266   :  { %v1256_v51 = vadd.f32 %v5347_v26, %v1059_v48  ;;  %v1061_v52 = vpop.f32.mrb[45].mxu0 }
 0x267   :  { %v1257_v55 = vadd.f32 %v5350_v2, %v1061_v52  ;;  %v1063_v56 = vpop.f32.mrb[46].mxu0  ;;  %4013 = vmatprep.mubr.msk.bf16.mxu1 %vm1519_vm2, %v5516_v45 }
 0x268   :  { %v1258_v57 = vadd.f32 %v5347_v26, %v1063_v56  ;;  %v1065_v58 = vpop.f32.mrb[47].mxu0  ;;  %1675 = vmatmul.mubr.bf16.gmra.mrb[32].mxu1 %v5514_v44  ;;  %v1328_v60 = vmax.f32 %v1256_v51, 0.0 }
 0x269   :  { %v1259_v59 = vadd.f32 %v5350_v2, %v1065_v58  ;;  %v1329_v62 = vmax.f32 %v1257_v55, 0.0 }
 0x26a   :  { %v1330_v61 = vmax.f32 %v1258_v57, 0.0 }
 0x26b   :  { %v1331_v63 = vmax.f32 %v1259_v59, 0.0 }
 0x26c   :  { %v5525_v0 = vpack.c.bf16 %v1330_v61, %v1328_v60 }
 0x26d   :  { %v5527_v8 = vpack.c.bf16 %v1331_v63, %v1329_v62  ;;  %v1069_v9 = vpop.f32.mrb[48].mxu0 }
 0x26e   :  { %v1260_v10 = vadd.f32 %v5347_v26, %v1069_v9  ;;  %v1071_v11 = vpop.f32.mrb[49].mxu0 }
 0x26f   :  { %v1261_v12 = vadd.f32 %v5350_v2, %v1071_v11  ;;  %v1073_v13 = vpop.f32.mrb[50].mxu0  ;;  %4014 = vmatprep.mubr.msk.bf16.mxu1 %vm1519_vm2, %v5527_v8 }
 0x270   :  { %v1262_v14 = vadd.f32 %v5347_v26, %v1073_v13  ;;  %v1075_v15 = vpop.f32.mrb[51].mxu0  ;;  %1685 = vmatmul.mubr.bf16.gmra.mrb[36].mxu1 %v5525_v0  ;;  %v1332_v17 = vmax.f32 %v1260_v10, 0.0 }
 0x271   :  { %v1263_v16 = vadd.f32 %v5350_v2, %v1075_v15  ;;  %v1333_v19 = vmax.f32 %v1261_v12, 0.0 }
 0x272   :  { %v1334_v18 = vmax.f32 %v1262_v14, 0.0 }
 0x273   :  { %v1335_v28 = vmax.f32 %v1263_v16, 0.0 }
 0x274   :  { %v5536_v31 = vpack.c.bf16 %v1334_v18, %v1332_v17 }
 0x275   :  { %v5538_v32 = vpack.c.bf16 %v1335_v28, %v1333_v19  ;;  %v1079_v33 = vpop.f32.mrb[52].mxu0 }
 0x276   :  { %v1264_v34 = vadd.f32 %v5347_v26, %v1079_v33  ;;  %v1081_v35 = vpop.f32.mrb[53].mxu0 }
 0x277   :  { %v1265_v36 = vadd.f32 %v5350_v2, %v1081_v35  ;;  %v1083_v37 = vpop.f32.mrb[54].mxu0  ;;  %4015 = vmatprep.mubr.msk.bf16.mxu1 %vm1519_vm2, %v5538_v32 }
 0x278   :  { %v1266_v38 = vadd.f32 %v5347_v26, %v1083_v37  ;;  %v1085_v41 = vpop.f32.mrb[55].mxu0  ;;  %1695 = vmatmul.mubr.bf16.gmra.mrb[40].mxu1 %v5536_v31  ;;  %v1336_v43 = vmax.f32 %v1264_v34, 0.0 }
 0x279   :  { %v1267_v42 = vadd.f32 %v5350_v2, %v1085_v41  ;;  %v1337_v51 = vmax.f32 %v1265_v36, 0.0 }
 0x27a   :  { %v1338_v48 = vmax.f32 %v1266_v38, 0.0 }
 0x27b   :  { %v1339_v52 = vmax.f32 %v1267_v42, 0.0 }
 0x27c   :  { %v5547_v55 = vpack.c.bf16 %v1338_v48, %v1336_v43 }
 0x27d   :  { %v5549_v56 = vpack.c.bf16 %v1339_v52, %v1337_v51  ;;  %v1089_v57 = vpop.f32.mrb[56].mxu0 }
 0x27e   :  { %v1268_v58 = vadd.f32 %v5347_v26, %v1089_v57  ;;  %v1091_v59 = vpop.f32.mrb[57].mxu0 }
 0x27f   :  { %v1269_v60 = vadd.f32 %v5350_v2, %v1091_v59  ;;  %v1093_v61 = vpop.f32.mrb[58].mxu0  ;;  %4016 = vmatprep.mubr.msk.bf16.mxu1 %vm1519_vm2, %v5549_v56 }
 0x280   :  { %v1270_v62 = vadd.f32 %v5347_v26, %v1093_v61  ;;  %v1095_v63 = vpop.f32.mrb[59].mxu0  ;;  %1705 = vmatmul.mubr.bf16.gmra.mrb[44].mxu1 %v5547_v55  ;;  %v1340_v10 = vmax.f32 %v1268_v58, 0.0 }
 0x281   :  { %v1271_v9 = vadd.f32 %v5350_v2, %v1095_v63  ;;  %v1341_v12 = vmax.f32 %v1269_v60, 0.0 }
 0x282   :  { %v1342_v11 = vmax.f32 %v1270_v62, 0.0 }
 0x283   :  { %v1343_v13 = vmax.f32 %v1271_v9, 0.0 }
 0x284   :  { %v5558_v14 = vpack.c.bf16 %v1342_v11, %v1340_v10 }
 0x285   :  { %v5560_v15 = vpack.c.bf16 %v1343_v13, %v1341_v12  ;;  %v1099_v16 = vpop.f32.mrb[60].mxu0 }
 0x286   :  { %v1272_v17 = vadd.f32 %v5347_v26, %v1099_v16  ;;  %v1101_v18 = vpop.f32.mrb[61].mxu0  ;;  %v4636_v16 = vld [vmem:[%s6343_s3 + $0x120] ss:$8 sps:$4 sm:$0xff]  }
 0x287   :  { %v1273_v19 = vadd.f32 %v5350_v2, %v1101_v18  ;;  %v1103_v28 = vpop.f32.mrb[62].mxu0  ;;  %4017 = vmatprep.mubr.msk.bf16.mxu1 %vm1519_vm2, %v5560_v15 }
 0x288   :  { %v1274_v33 = vadd.f32 %v5347_v26, %v1103_v28  ;;  %v1105_v34 = vpop.f32.mrb[63].mxu0  ;;  %1715 = vmatmul.mubr.bf16.gmra.mrb[48].mxu1 %v5558_v14  ;;  %v1344_v36 = vmax.f32 %v1272_v17, 0.0 }
 0x289   :  { %v1275_v35 = vadd.f32 %v5350_v2, %v1105_v34  ;;  %v1345_v38 = vmax.f32 %v1273_v19, 0.0 }
 0x28a   :  { %v1346_v37 = vmax.f32 %v1274_v33, 0.0 }
 0x28b   :  { %v1347_v41 = vmax.f32 %v1275_v35, 0.0 }
 0x28c   :  { %v5569_v42 = vpack.c.bf16 %v1346_v37, %v1344_v36  ;;  %v4639_v36 = vld [vmem:[%s6343_s3 + $0x130] ss:$8 sps:$4 sm:$0xff]  }
 0x28d   :  { %v5571_v43 = vpack.c.bf16 %v1347_v41, %v1345_v38  ;;  %v1109_v48 = vpop.f32.mrb[64].mxu0 }
 0x28e   :  { %v1276_v51 = vadd.f32 %v5347_v26, %v1109_v48  ;;  %v1111_v52 = vpop.f32.mrb[65].mxu0 }
 0x28f   :  { %v1277_v57 = vadd.f32 %v5350_v2, %v1111_v52  ;;  %v1113_v58 = vpop.f32.mrb[66].mxu0  ;;  %4018 = vmatprep.mubr.msk.bf16.mxu1 %vm1519_vm2, %v5571_v43  ;;  %v4645_v52 = vld [vmem:[%s6343_s3 + $0x150] ss:$8 sps:$4 sm:$0xff]  }
 0x290   :  { %v1278_v59 = vadd.f32 %v5347_v26, %v1113_v58  ;;  %v1115_v60 = vpop.f32.mrb[67].mxu0  ;;  %1725 = vmatmul.mubr.bf16.gmra.mrb[52].mxu1 %v5569_v42  ;;  %v1348_v62 = vmax.f32 %v1276_v51, 0.0  ;;  %v4647_v51 = vld [vmem:[%s6343_s3 + $0x154] ss:$8 sps:$4 sm:$0xff]   ;;  %v4648_v58 = vld [vmem:[%s6343_s3 + $0x160] ss:$8 sps:$4 sm:$0xff]  }
 0x291   :  { %v1279_v61 = vadd.f32 %v5350_v2, %v1115_v60  ;;  %4037 = vmatprep.mubr.msk.bf16.mxu1 %vm1519_vm2, %v5358_v40  ;;  %v1349_v9 = vmax.f32 %v1277_v57, 0.0  ;;  %v4641_v40 = vld [vmem:[%s6343_s3 + $0x134] ss:$8 sps:$4 sm:$0xff]   ;;  %v4650_v57 = vld [vmem:[%s6343_s3 + $0x164] ss:$8 sps:$4 sm:$0xff]  }
 0x292   :  { %v1350_v63 = vmax.f32 %v1278_v59, 0.0  ;;  %v4656_v59 = vld [vmem:[%s6343_s3 + $0x184] ss:$8 sps:$4 sm:$0xff]   ;;  %v4654_v60 = vld [vmem:[%s6343_s3 + $0x180] ss:$8 sps:$4 sm:$0xff]  }
 0x293   :  { %v1351_v10 = vmax.f32 %v1279_v61, 0.0  ;;  %v4662_v61 = vld [vmem:[%s6343_s3 + $0x1a4] ss:$8 sps:$4 sm:$0xff]  }
 0x294   :  { %v5582_v11 = vpack.c.bf16 %v1350_v63, %v1348_v62  ;;  %v4660_v62 = vld [vmem:[%s6343_s3 + $0x1a0] ss:$8 sps:$4 sm:$0xff]  }
 0x295   :  { %v5584_v12 = vpack.c.bf16 %v1351_v10, %v1349_v9  ;;  %v1119_v13 = vpop.f32.mrb[68].mxu0  ;;  %v4663_v63 = vld [vmem:[%s6345_s5] ss:$8 sps:$4 sm:$0xff]   ;;  %v4668_v9 = vld [vmem:[%s6345_s5 + $0x14] ss:$8 sps:$4 sm:$0xff]  }
 0x296   :  { %v1280_v17 = vadd.f32 %v5347_v26, %v1119_v13  ;;  %v1121_v18 = vpop.f32.mrb[69].mxu0  ;;  %v4666_v10 = vld [vmem:[%s6345_s5 + $0x10] ss:$8 sps:$4 sm:$0xff]   ;;  %v4669_v13 = vld [vmem:[%s6345_s5 + $0x20] ss:$8 sps:$4 sm:$0xff]  }
 0x297   :  { %v1281_v19 = vadd.f32 %v5350_v2, %v1121_v18  ;;  %v1123_v28 = vpop.f32.mrb[70].mxu0  ;;  %v4683_v18 = vld [vmem:[%s6345_s5 + $0x64] ss:$8 sps:$4 sm:$0xff]  }
 0x298   :  { %v1282_v33 = vadd.f32 %v5347_v26, %v1123_v28  ;;  %v1125_v34 = vpop.f32.mrb[71].mxu0  ;;  %1864 = vmatmul.mubr.bf16.vlgmr.msra.gmra.mrb[0].mxu1 %v5356_v39  ;;  %v1352_v37 = vmax.f32 %v1280_v17, 0.0  ;;  %v4644_v26 = vld [vmem:[%s6343_s3 + $0x144] ss:$8 sps:$4 sm:$0xff]   ;;  %v4675_v17 = vld [vmem:[%s6345_s5 + $0x40] ss:$8 sps:$4 sm:$0xff]  }
 0x299   :  { %v1283_v35 = vadd.f32 %v5350_v2, %v1125_v34  ;;  %4038 = vmatprep.mubr.msk.bf16.mxu1 %vm1519_vm2, %v5366_v54  ;;  %2120 = vmatpush1.bf16.msra.mxu1 %v4636_v16  ;;  %v1353_v41 = vmax.f32 %v1281_v19, 0.0  ;;  %v4642_v54 = vld [vmem:[%s6343_s3 + $0x140] ss:$8 sps:$4 sm:$0xff]   ;;  %v4677_v16 = vld [vmem:[%s6345_s5 + $0x44] ss:$8 sps:$4 sm:$0xff]  }
 0x29a   :  { %v1354_v38 = vmax.f32 %v1282_v33, 0.0  ;;  %2121 = vmatprep.subr.bf16.mxu1 %v4641_v40  ;;  %v4681_v40 = vld [vmem:[%s6345_s5 + $0x60] ss:$8 sps:$4 sm:$0xff]   ;;  %v4689_v19 = vld [vmem:[%s6345_s5 + $0x84] ss:$8 sps:$4 sm:$0xff]  }
 0x29b   :  { %v1355_v48 = vmax.f32 %v1283_v35, 0.0  ;;  %v4687_v28 = vld [vmem:[%s6345_s5 + $0x80] ss:$8 sps:$4 sm:$0xff]   ;;  %v4695_v33 = vld [vmem:[%s6345_s5 + $0xa4] ss:$8 sps:$4 sm:$0xff]  }
 0x29c   :  { %v5605_v39 = vpack.c.bf16 %v1354_v38, %v1352_v37  ;;  %v4693_v34 = vld [vmem:[%s6345_s5 + $0xa0] ss:$8 sps:$4 sm:$0xff]   ;;  %v4701_v35 = vld [vmem:[%s6345_s5 + $0xc4] ss:$8 sps:$4 sm:$0xff]  }
 0x29d   :  { %v5607_v2 = vpack.c.bf16 %v1355_v48, %v1353_v41  ;;  %2122 = vmatpush1.bf16.msra.mxu1 %v4639_v36  ;;  %v4699_v36 = vld [vmem:[%s6345_s5 + $0xc0] ss:$8 sps:$4 sm:$0xff]  }
 0x29e   :  { %2123 = vmatprep.subr.bf16.mxu1 %v4644_v26 }
 0x2a0   :  { %1874 = vmatmul.mubr.bf16.gmra.mrb[4].mxu1 %v5364_v53  ;;  %v4653_v53 = vld [vmem:[%s6343_s3 + $0x174] ss:$8 sps:$4 sm:$0xff]  }
 0x2a1   :  { %4039 = vmatprep.mubr.msk.bf16.mxu1 %vm1519_vm2, %v5374_v6  ;;  %2124 = vmatpush1.bf16.msra.mxu1 %v4642_v54  ;;  %v4651_v6 = vld [vmem:[%s6343_s3 + $0x170] ss:$8 sps:$4 sm:$0xff]  }
 0x2a2   :  { %2125 = vmatprep.subr.bf16.mxu1 %v4647_v51 }
 0x2a5   :  { %2126 = vmatpush1.bf16.msra.mxu1 %v4645_v52 }
 0x2a6   :  { %2127 = vmatprep.subr.bf16.mxu1 %v4650_v57 }
 0x2a8   :  { %1884 = vmatmul.mubr.bf16.gmra.mrb[8].mxu1 %v5372_v4  ;;  %v4659_v4 = vld [vmem:[%s6343_s3 + $0x194] ss:$8 sps:$4 sm:$0xff]  }
 0x2a9   :  { %4040 = vmatprep.mubr.msk.bf16.mxu1 %vm1519_vm2, %v5397_v27  ;;  %2128 = vmatpush1.bf16.msra.mxu1 %v4648_v58  ;;  %v4657_v27 = vld [vmem:[%s6343_s3 + $0x190] ss:$8 sps:$4 sm:$0xff]  }
 0x2aa   :  { %2129 = vmatprep.subr.bf16.mxu1 %v4653_v53 }
 0x2ad   :  { %2130 = vmatpush1.bf16.msra.mxu1 %v4651_v6 }
 0x2ae   :  { %2131 = vmatprep.subr.bf16.mxu1 %v4656_v59 }
 0x2b0   :  { %1894 = vmatmul.mubr.bf16.gmra.mrb[12].mxu1 %v5395_v24  ;;  %v4665_v24 = vld [vmem:[%s6345_s5 + $0x4] ss:$8 sps:$4 sm:$0xff]  }
 0x2b1   :  { %4041 = vmatprep.mubr.msk.bf16.mxu1 %vm1519_vm2, %v5420_v47  ;;  %2132 = vmatpush1.bf16.msra.mxu1 %v4654_v60 }
 0x2b2   :  { %2133 = vmatprep.subr.bf16.mxu1 %v4659_v4 }
 0x2b5   :  { %2134 = vmatpush1.bf16.msra.mxu1 %v4657_v27 }
 0x2b6   :  { %2135 = vmatprep.subr.bf16.mxu1 %v4662_v61 }
 0x2b8   :  { %1904 = vmatmul.mubr.bf16.gmra.mrb[16].mxu1 %v5418_v46 }
 0x2b9   :  { %4042 = vmatprep.mubr.msk.bf16.mxu1 %vm1519_vm2, %v5443_v5  ;;  %2136 = vmatpush1.bf16.msra.mxu1 %v4660_v62 }
 0x2ba   :  { %2711 = vmatprep.subr.bf16.mxu1 %v4665_v24 }
 0x2c0   :  { %1914 = vmatmul.mubr.bf16.gmra.mrb[20].mxu1 %v5441_v3 }
 0x2c1   :  { %4043 = vmatprep.mubr.msk.bf16.mxu1 %vm1519_vm2, %v5466_v30 }
 0x2c8   :  { %1924 = vmatmul.mubr.bf16.gmra.mrb[24].mxu1 %v5464_v29 }
 0x2c9   :  { %4044 = vmatprep.mubr.msk.bf16.mxu1 %vm1519_vm2, %v5483_v50 }
 0x2d0   :  { %1934 = vmatmul.mubr.bf16.gmra.mrb[28].mxu1 %v5481_v49 }
 0x2d1   :  { %4045 = vmatprep.mubr.msk.bf16.mxu1 %vm1519_vm2, %v5494_v7 }
 0x2d8   :  { %1944 = vmatmul.mubr.bf16.gmra.mrb[32].mxu1 %v5492_v1 }
 0x2d9   :  { %4046 = vmatprep.mubr.msk.bf16.mxu1 %vm1519_vm2, %v5505_v22 }
 0x2e0   :  { %1954 = vmatmul.mubr.bf16.gmra.mrb[36].mxu1 %v5503_v20 }
 0x2e1   :  { %4047 = vmatprep.mubr.msk.bf16.mxu1 %vm1519_vm2, %v5516_v45 }
 0x2e8   :  { %1964 = vmatmul.mubr.bf16.gmra.mrb[40].mxu1 %v5514_v44 }
 0x2e9   :  { %4048 = vmatprep.mubr.msk.bf16.mxu1 %vm1519_vm2, %v5527_v8 }
 0x2f0   :  { %1974 = vmatmul.mubr.bf16.gmra.mrb[44].mxu1 %v5525_v0 }
 0x2f1   :  { %4049 = vmatprep.mubr.msk.bf16.mxu1 %vm1519_vm2, %v5538_v32 }
 0x2f8   :  { %1984 = vmatmul.mubr.bf16.gmra.mrb[48].mxu1 %v5536_v31 }
 0x2f9   :  { %4050 = vmatprep.mubr.msk.bf16.mxu1 %vm1519_vm2, %v5549_v56 }
 0x300   :  { %1994 = vmatmul.mubr.bf16.gmra.mrb[52].mxu1 %v5547_v55 }
 0x301   :  { %4087 = vmatprep.mubr.msk.bf16.mxu1 %vm1519_vm2, %v5420_v47  ;;  %v4671_v47 = vld [vmem:[%s6345_s5 + $0x24] ss:$8 sps:$4 sm:$0xff]  }
 0x308   :  { %2152 = vmatmul.mubr.bf16.vlgmr.msra.gmra.mrb[0].mxu1 %v5418_v46  ;;  %v4674_v46 = vld [vmem:[%s6345_s5 + $0x34] ss:$8 sps:$4 sm:$0xff]  }
 0x309   :  { %4088 = vmatprep.mubr.msk.bf16.mxu1 %vm1519_vm2, %v5443_v5  ;;  %2712 = vmatpush1.bf16.msra.mxu1 %v4663_v63  ;;  %v4672_v5 = vld [vmem:[%s6345_s5 + $0x30] ss:$8 sps:$4 sm:$0xff]  }
 0x30a   :  { %2713 = vmatprep.subr.bf16.mxu1 %v4668_v9 }
 0x30d   :  { %2714 = vmatpush1.bf16.msra.mxu1 %v4666_v10 }
 0x30e   :  { %2715 = vmatprep.subr.bf16.mxu1 %v4671_v47 }
 0x310   :  { %2162 = vmatmul.mubr.bf16.gmra.mrb[4].mxu1 %v5441_v3  ;;  %v4680_v3 = vld [vmem:[%s6345_s5 + $0x54] ss:$8 sps:$4 sm:$0xff]  }
 0x311   :  { %4089 = vmatprep.mubr.msk.bf16.mxu1 %vm1519_vm2, %v5466_v30  ;;  %2716 = vmatpush1.bf16.msra.mxu1 %v4669_v13  ;;  %v4678_v30 = vld [vmem:[%s6345_s5 + $0x50] ss:$8 sps:$4 sm:$0xff]  }
 0x312   :  { %2717 = vmatprep.subr.bf16.mxu1 %v4674_v46 }
 0x315   :  { %2718 = vmatpush1.bf16.msra.mxu1 %v4672_v5 }
 0x316   :  { %2719 = vmatprep.subr.bf16.mxu1 %v4677_v16 }
 0x318   :  { %2172 = vmatmul.mubr.bf16.gmra.mrb[8].mxu1 %v5464_v29  ;;  %v4686_v29 = vld [vmem:[%s6345_s5 + $0x74] ss:$8 sps:$4 sm:$0xff]  }
 0x319   :  { %4090 = vmatprep.mubr.msk.bf16.mxu1 %vm1519_vm2, %v5483_v50  ;;  %2720 = vmatpush1.bf16.msra.mxu1 %v4675_v17  ;;  %v4684_v50 = vld [vmem:[%s6345_s5 + $0x70] ss:$8 sps:$4 sm:$0xff]  }
 0x31a   :  { %2721 = vmatprep.subr.bf16.mxu1 %v4680_v3 }
 0x31d   :  { %2722 = vmatpush1.bf16.msra.mxu1 %v4678_v30 }
 0x31e   :  { %2723 = vmatprep.subr.bf16.mxu1 %v4683_v18 }
 0x320   :  { %2182 = vmatmul.mubr.bf16.gmra.mrb[12].mxu1 %v5481_v49  ;;  %v4692_v49 = vld [vmem:[%s6345_s5 + $0x94] ss:$8 sps:$4 sm:$0xff]  }
 0x321   :  { %4091 = vmatprep.mubr.msk.bf16.mxu1 %vm1519_vm2, %v5494_v7  ;;  %2724 = vmatpush1.bf16.msra.mxu1 %v4681_v40  ;;  %v4690_v7 = vld [vmem:[%s6345_s5 + $0x90] ss:$8 sps:$4 sm:$0xff]  }
 0x322   :  { %2725 = vmatprep.subr.bf16.mxu1 %v4686_v29 }
 0x325   :  { %2726 = vmatpush1.bf16.msra.mxu1 %v4684_v50 }
 0x326   :  { %2727 = vmatprep.subr.bf16.mxu1 %v4689_v19 }
 0x328   :  { %2192 = vmatmul.mubr.bf16.gmra.mrb[16].mxu1 %v5492_v1  ;;  %v4698_v1 = vld [vmem:[%s6345_s5 + $0xb4] ss:$8 sps:$4 sm:$0xff]  }
 0x329   :  { %4092 = vmatprep.mubr.msk.bf16.mxu1 %vm1519_vm2, %v5505_v22  ;;  %2728 = vmatpush1.bf16.msra.mxu1 %v4687_v28  ;;  %v4696_v22 = vld [vmem:[%s6345_s5 + $0xb0] ss:$8 sps:$4 sm:$0xff]  }
 0x32a   :  { %2729 = vmatprep.subr.bf16.mxu1 %v4692_v49 }
 0x32d   :  { %2730 = vmatpush1.bf16.msra.mxu1 %v4690_v7 }
 0x32e   :  { %2731 = vmatprep.subr.bf16.mxu1 %v4695_v33 }
 0x330   :  { %2202 = vmatmul.mubr.bf16.gmra.mrb[20].mxu1 %v5503_v20  ;;  %v4704_v20 = vld [vmem:[%s6345_s5 + $0xd4] ss:$8 sps:$4 sm:$0xff]  }
 0x331   :  { %4093 = vmatprep.mubr.msk.bf16.mxu1 %vm1519_vm2, %v5516_v45  ;;  %2732 = vmatpush1.bf16.msra.mxu1 %v4693_v34  ;;  %v2348_v45 = vld [vmem:[%s6344_s4] sm:$0x3] }
 0x332   :  { %2733 = vmatprep.subr.bf16.mxu1 %v4698_v1 }
 0x335   :  { %2734 = vmatpush1.bf16.msra.mxu1 %v4696_v22 }
 0x336   :  { %2735 = vmatprep.subr.bf16.mxu1 %v4701_v35 }
 0x338   :  { %2212 = vmatmul.mubr.bf16.gmra.mrb[24].mxu1 %v5514_v44  ;;  %v4702_v44 = vld [vmem:[%s6345_s5 + $0xd0] ss:$8 sps:$4 sm:$0xff]   ;;  %s4833_s5 = smov [#allocation2]  }
 0x339   :  { %4094 = vmatprep.mubr.msk.bf16.mxu1 %vm1519_vm2, %v5527_v8  ;;  %2736 = vmatpush1.bf16.msra.mxu1 %v4699_v36  ;;  %v5818_v8 = vrot.slane %v2348_v45, %v5344_v25  ;;  %s3817_s28 = sshll.u32 %s4833_s5, 4  ;;  %s3818_s28 = int_to_ptr.vmem [resolvable:$true] %s3817_s28 }
 0x33a   :  { %2737 = vmatprep.subr.bf16.mxu1 %v4704_v20  ;;  %s4803_s2 = scalar_lea.vmem %s3818_s28, 512  ;;  %p4808_p1 = scmp.lt.s32.totalorder %s3818_s28, %s3818_s28 }
 0x33b   :  { %p4804_p0 = scmp.ne.s32.totalorder %s3818_s28, %s4803_s2  ;;  %p4809_p2 = scmp.lt.s32.totalorder %s4803_s2, %s4803_s2 }
 0x33d   :  { %2738 = vmatpush1.bf16.msra.mxu1 %v4702_v44  ;;  %p4810_p3 = por %p4809_p2, %p4808_p1 }
 0x33f   :  { %p4811_p4 = pnand %p4810_p3, %p4804_p0 }
 0x340   :  { %2222 = vmatmul.mubr.bf16.gmra.mrb[28].mxu1 %v5525_v0  ;;  %v5815_v0 = vrot.slane %v2348_v45, %v5339_v23 }
 0x341   :  { %4095 = vmatprep.mubr.msk.bf16.mxu1 %vm1519_vm2, %v5538_v32 }
 0x348   :  { %2232 = vmatmul.mubr.bf16.gmra.mrb[32].mxu1 %v5536_v31 }
 0x349   :  { %4096 = vmatprep.mubr.msk.bf16.mxu1 %vm1519_vm2, %v5549_v56 }
 0x350   :  { %2242 = vmatmul.mubr.bf16.gmra.mrb[36].mxu1 %v5547_v55 }
 0x351   :  { %4097 = vmatprep.mubr.msk.bf16.mxu1 %vm1519_vm2, %v5560_v15 }
 0x358   :  { %2252 = vmatmul.mubr.bf16.gmra.mrb[40].mxu1 %v5558_v14 }
 0x359   :  { %4098 = vmatprep.mubr.msk.bf16.mxu1 %vm1519_vm2, %v5571_v43 }
 0x360   :  { %2262 = vmatmul.mubr.bf16.gmra.mrb[44].mxu1 %v5569_v42 }
 0x361   :  { %4099 = vmatprep.mubr.msk.bf16.mxu1 %vm1519_vm2, %v5584_v12 }
 0x368   :  { %2272 = vmatmul.mubr.bf16.gmra.mrb[48].mxu1 %v5582_v11 }
 0x369   :  { %4100 = vmatprep.mubr.msk.bf16.mxu1 %vm1519_vm2, %v5607_v2 }
 0x370   :  { %2282 = vmatmul.mubr.bf16.gmra.mrb[52].mxu1 %v5605_v39 }
 0x3db   :  { %v2153_v31 = vpop.f32.mrb[0].mxu1 }
 0x3dc   :  { %v2360_v32 = vadd.f32 %v5815_v0, %v2153_v31  ;;  %v2155_v55 = vpop.f32.mrb[1].mxu1 }
 0x3dd   :  { %v2361_v56 = vadd.f32 %v5818_v8, %v2155_v55  ;;  %v2157_v14 = vpop.f32.mrb[2].mxu1 }
 0x3de   :  { %v2362_v15 = vadd.f32 %v5815_v0, %v2157_v14  ;;  %v2159_v42 = vpop.f32.mrb[3].mxu1  ;;  %v2416_v11 = vmax.f32 %v2360_v32, 0.0 }
 0x3df   :  { %v2363_v43 = vadd.f32 %v5818_v8, %v2159_v42  ;;  %v2417_v37 = vmax.f32 %v2361_v56, 0.0 }
 0x3e0   :  { %v2418_v12 = vmax.f32 %v2362_v15, 0.0 }
 0x3e1   :  { %v2419_v38 = vmax.f32 %v2363_v43, 0.0 }
 0x3e2   :  { %v2472_v26 = vpack.c.bf16 %v2418_v12, %v2416_v11 }
 0x3e3   :  { %v2473_v41 = vpack.c.bf16 %v2419_v38, %v2417_v37  ;;  %v2163_v48 = vpop.f32.mrb[4].mxu1 }
 0x3e4   :  { %v2364_v39 = vadd.f32 %v5815_v0, %v2163_v48  ;;  %v2165_v2 = vpop.f32.mrb[5].mxu1 }
 0x3e5   :  { %v2365_v54 = vadd.f32 %v5818_v8, %v2165_v2  ;;  %v2167_v51 = vpop.f32.mrb[6].mxu1  ;;  %4129 = vmatprep.mubr.msk.bf16.mxu1 %vm2668_vm3, %v2473_v41 }
 0x3e6   :  { %v2366_v52 = vadd.f32 %v5815_v0, %v2167_v51  ;;  %v2169_v57 = vpop.f32.mrb[7].mxu1  ;;  %2744 = vmatmul.mubr.bf16.vlgmr.msra.gmra.mrb[56].mxu1 %v2472_v26  ;;  %v2420_v53 = vmax.f32 %v2364_v39, 0.0 }
 0x3e7   :  { %v2367_v58 = vadd.f32 %v5818_v8, %v2169_v57  ;;  %v2421_v59 = vmax.f32 %v2365_v54, 0.0 }
 0x3e8   :  { %v2422_v6 = vmax.f32 %v2366_v52, 0.0 }
 0x3e9   :  { %v2423_v60 = vmax.f32 %v2367_v58, 0.0 }
 0x3ea   :  { %v2474_v4 = vpack.c.bf16 %v2422_v6, %v2420_v53 }
 0x3eb   :  { %v2475_v27 = vpack.c.bf16 %v2423_v60, %v2421_v59  ;;  %v2173_v61 = vpop.f32.mrb[8].mxu1 }
 0x3ec   :  { %v2368_v62 = vadd.f32 %v5815_v0, %v2173_v61  ;;  %v2175_v24 = vpop.f32.mrb[9].mxu1 }
 0x3ed   :  { %v2369_v63 = vadd.f32 %v5818_v8, %v2175_v24  ;;  %v2177_v9 = vpop.f32.mrb[10].mxu1  ;;  %4130 = vmatprep.mubr.msk.bf16.mxu1 %vm2668_vm3, %v2475_v27 }
 0x3ee   :  { %v2370_v10 = vadd.f32 %v5815_v0, %v2177_v9  ;;  %v2179_v47 = vpop.f32.mrb[11].mxu1  ;;  %2752 = vmatmul.mubr.bf16.gmra.mrb[60].mxu1 %v2474_v4  ;;  %v2424_v46 = vmax.f32 %v2368_v62, 0.0 }
 0x3ef   :  { %v2371_v13 = vadd.f32 %v5818_v8, %v2179_v47  ;;  %v2425_v16 = vmax.f32 %v2369_v63, 0.0 }
 0x3f0   :  { %v2426_v5 = vmax.f32 %v2370_v10, 0.0 }
 0x3f1   :  { %v2427_v17 = vmax.f32 %v2371_v13, 0.0 }
 0x3f2   :  { %v2476_v3 = vpack.c.bf16 %v2426_v5, %v2424_v46 }
 0x3f3   :  { %v2477_v30 = vpack.c.bf16 %v2427_v17, %v2425_v16  ;;  %v2183_v18 = vpop.f32.mrb[12].mxu1 }
 0x3f4   :  { %v2372_v40 = vadd.f32 %v5815_v0, %v2183_v18  ;;  %v2185_v29 = vpop.f32.mrb[13].mxu1 }
 0x3f5   :  { %v2373_v50 = vadd.f32 %v5818_v8, %v2185_v29  ;;  %v2187_v19 = vpop.f32.mrb[14].mxu1  ;;  %4131 = vmatprep.mubr.msk.bf16.mxu1 %vm2668_vm3, %v2477_v30 }
 0x3f6   :  { %v2374_v28 = vadd.f32 %v5815_v0, %v2187_v19  ;;  %v2189_v49 = vpop.f32.mrb[15].mxu1  ;;  %2760 = vmatmul.mubr.bf16.gmra.mrb[64].mxu1 %v2476_v3  ;;  %v2428_v33 = vmax.f32 %v2372_v40, 0.0 }
 0x3f7   :  { %v2375_v7 = vadd.f32 %v5818_v8, %v2189_v49  ;;  %v2429_v1 = vmax.f32 %v2373_v50, 0.0 }
 0x3f8   :  { %v2430_v34 = vmax.f32 %v2374_v28, 0.0 }
 0x3f9   :  { %v2431_v22 = vmax.f32 %v2375_v7, 0.0 }
 0x3fa   :  { %v2478_v35 = vpack.c.bf16 %v2430_v34, %v2428_v33 }
 0x3fb   :  { %v2479_v36 = vpack.c.bf16 %v2431_v22, %v2429_v1  ;;  %v2193_v20 = vpop.f32.mrb[16].mxu1 }
 0x3fc   :  { %v2376_v44 = vadd.f32 %v5815_v0, %v2193_v20  ;;  %v2195_v45 = vpop.f32.mrb[17].mxu1 }
 0x3fd   :  { %v2377_v31 = vadd.f32 %v5818_v8, %v2195_v45  ;;  %v2197_v32 = vpop.f32.mrb[18].mxu1  ;;  %4132 = vmatprep.mubr.msk.bf16.mxu1 %vm2668_vm3, %v2479_v36 }
 0x3fe   :  { %v2378_v55 = vadd.f32 %v5815_v0, %v2197_v32  ;;  %v2199_v56 = vpop.f32.mrb[19].mxu1  ;;  %2768 = vmatmul.mubr.bf16.gmra.mrb[68].mxu1 %v2478_v35  ;;  %v2432_v15 = vmax.f32 %v2376_v44, 0.0 }
 0x3ff   :  { %v2379_v14 = vadd.f32 %v5818_v8, %v2199_v56  ;;  %v2433_v43 = vmax.f32 %v2377_v31, 0.0 }
 0x400   :  { %v2434_v42 = vmax.f32 %v2378_v55, 0.0 }
 0x401   :  { %v2435_v11 = vmax.f32 %v2379_v14, 0.0 }
 0x402   :  { %v2480_v12 = vpack.c.bf16 %v2434_v42, %v2432_v15 }
 0x403   :  { %v2481_v37 = vpack.c.bf16 %v2435_v11, %v2433_v43  ;;  %v2203_v38 = vpop.f32.mrb[20].mxu1 }
 0x404   :  { %v2380_v26 = vadd.f32 %v5815_v0, %v2203_v38  ;;  %v2205_v41 = vpop.f32.mrb[21].mxu1 }
 0x405   :  { %v2381_v48 = vadd.f32 %v5818_v8, %v2205_v41  ;;  %v2207_v39 = vpop.f32.mrb[22].mxu1  ;;  %4133 = vmatprep.mubr.msk.bf16.mxu1 %vm2668_vm3, %v2481_v37 }
 0x406   :  { %v2382_v2 = vadd.f32 %v5815_v0, %v2207_v39  ;;  %v2209_v54 = vpop.f32.mrb[23].mxu1  ;;  %2776 = vmatmul.mubr.bf16.gmra.mrb[72].mxu1 %v2480_v12  ;;  %v2436_v52 = vmax.f32 %v2380_v26, 0.0 }
 0x407   :  { %v2383_v51 = vadd.f32 %v5818_v8, %v2209_v54  ;;  %v2437_v58 = vmax.f32 %v2381_v48, 0.0 }
 0x408   :  { %v2438_v57 = vmax.f32 %v2382_v2, 0.0 }
 0x409   :  { %v2439_v53 = vmax.f32 %v2383_v51, 0.0 }
 0x40a   :  { %v2482_v6 = vpack.c.bf16 %v2438_v57, %v2436_v52 }
 0x40b   :  { %v2483_v59 = vpack.c.bf16 %v2439_v53, %v2437_v58  ;;  %v2213_v60 = vpop.f32.mrb[24].mxu1 }
 0x40c   :  { %v2384_v4 = vadd.f32 %v5815_v0, %v2213_v60  ;;  %v2215_v27 = vpop.f32.mrb[25].mxu1 }
 0x40d   :  { %v2385_v61 = vadd.f32 %v5818_v8, %v2215_v27  ;;  %v2217_v62 = vpop.f32.mrb[26].mxu1  ;;  %4134 = vmatprep.mubr.msk.bf16.mxu1 %vm2668_vm3, %v2483_v59 }
 0x40e   :  { %v2386_v24 = vadd.f32 %v5815_v0, %v2217_v62  ;;  %v2219_v63 = vpop.f32.mrb[27].mxu1  ;;  %2784 = vmatmul.mubr.bf16.gmra.mrb[76].mxu1 %v2482_v6  ;;  %v2440_v10 = vmax.f32 %v2384_v4, 0.0 }
 0x40f   :  { %v2387_v9 = vadd.f32 %v5818_v8, %v2219_v63  ;;  %v2441_v13 = vmax.f32 %v2385_v61, 0.0 }
 0x410   :  { %v2442_v47 = vmax.f32 %v2386_v24, 0.0 }
 0x411   :  { %v2443_v46 = vmax.f32 %v2387_v9, 0.0 }
 0x412   :  { %v2484_v5 = vpack.c.bf16 %v2442_v47, %v2440_v10 }
 0x413   :  { %v2485_v16 = vpack.c.bf16 %v2443_v46, %v2441_v13  ;;  %v2223_v17 = vpop.f32.mrb[28].mxu1 }
 0x414   :  { %v2388_v3 = vadd.f32 %v5815_v0, %v2223_v17  ;;  %v2225_v30 = vpop.f32.mrb[29].mxu1 }
 0x415   :  { %v2389_v18 = vadd.f32 %v5818_v8, %v2225_v30  ;;  %v2227_v40 = vpop.f32.mrb[30].mxu1  ;;  %4135 = vmatprep.mubr.msk.bf16.mxu1 %vm2668_vm3, %v2485_v16 }
 0x416   :  { %v2390_v29 = vadd.f32 %v5815_v0, %v2227_v40  ;;  %v2229_v50 = vpop.f32.mrb[31].mxu1  ;;  %2792 = vmatmul.mubr.bf16.gmra.mrb[80].mxu1 %v2484_v5  ;;  %v2444_v28 = vmax.f32 %v2388_v3, 0.0 }
 0x417   :  { %v2391_v19 = vadd.f32 %v5818_v8, %v2229_v50  ;;  %v2445_v7 = vmax.f32 %v2389_v18, 0.0 }
 0x418   :  { %v2446_v49 = vmax.f32 %v2390_v29, 0.0 }
 0x419   :  { %v2447_v33 = vmax.f32 %v2391_v19, 0.0 }
 0x41a   :  { %v2486_v34 = vpack.c.bf16 %v2446_v49, %v2444_v28 }
 0x41b   :  { %v2487_v1 = vpack.c.bf16 %v2447_v33, %v2445_v7  ;;  %v2233_v22 = vpop.f32.mrb[32].mxu1 }
 0x41c   :  { %v2392_v35 = vadd.f32 %v5815_v0, %v2233_v22  ;;  %v2235_v36 = vpop.f32.mrb[33].mxu1 }
 0x41d   :  { %v2393_v20 = vadd.f32 %v5818_v8, %v2235_v36  ;;  %v2237_v44 = vpop.f32.mrb[34].mxu1  ;;  %4136 = vmatprep.mubr.msk.bf16.mxu1 %vm2668_vm3, %v2487_v1 }
 0x41e   :  { %v2394_v45 = vadd.f32 %v5815_v0, %v2237_v44  ;;  %v2239_v31 = vpop.f32.mrb[35].mxu1  ;;  %2800 = vmatmul.mubr.bf16.gmra.mrb[84].mxu1 %v2486_v34  ;;  %v2448_v55 = vmax.f32 %v2392_v35, 0.0 }
 0x41f   :  { %v2395_v32 = vadd.f32 %v5818_v8, %v2239_v31  ;;  %v2449_v14 = vmax.f32 %v2393_v20, 0.0 }
 0x420   :  { %v2450_v56 = vmax.f32 %v2394_v45, 0.0 }
 0x421   :  { %v2451_v15 = vmax.f32 %v2395_v32, 0.0 }
 0x422   :  { %v2488_v42 = vpack.c.bf16 %v2450_v56, %v2448_v55 }
 0x423   :  { %v2489_v43 = vpack.c.bf16 %v2451_v15, %v2449_v14  ;;  %v2243_v11 = vpop.f32.mrb[36].mxu1 }
 0x424   :  { %v2396_v12 = vadd.f32 %v5815_v0, %v2243_v11  ;;  %v2245_v37 = vpop.f32.mrb[37].mxu1 }
 0x425   :  { %v2397_v38 = vadd.f32 %v5818_v8, %v2245_v37  ;;  %v2247_v26 = vpop.f32.mrb[38].mxu1  ;;  %4137 = vmatprep.mubr.msk.bf16.mxu1 %vm2668_vm3, %v2489_v43 }
 0x426   :  { %v2398_v41 = vadd.f32 %v5815_v0, %v2247_v26  ;;  %v2249_v48 = vpop.f32.mrb[39].mxu1  ;;  %2808 = vmatmul.mubr.bf16.gmra.mrb[88].mxu1 %v2488_v42  ;;  %v2452_v2 = vmax.f32 %v2396_v12, 0.0 }
 0x427   :  { %v2399_v39 = vadd.f32 %v5818_v8, %v2249_v48  ;;  %v2453_v51 = vmax.f32 %v2397_v38, 0.0 }
 0x428   :  { %v2454_v54 = vmax.f32 %v2398_v41, 0.0 }
 0x429   :  { %v2455_v52 = vmax.f32 %v2399_v39, 0.0 }
 0x42a   :  { %v2490_v57 = vpack.c.bf16 %v2454_v54, %v2452_v2 }
 0x42b   :  { %v2491_v58 = vpack.c.bf16 %v2455_v52, %v2453_v51  ;;  %v2253_v53 = vpop.f32.mrb[40].mxu1  ;;  %v4705_v52 = vld [vmem:[%s6347_s7] sm:$0xff]  }
 0x42c   :  { %v2400_v6 = vadd.f32 %v5815_v0, %v2253_v53  ;;  %v2255_v59 = vpop.f32.mrb[41].mxu1  ;;  %4200 = vmatprep.subr.bf16.mxu0 %v4705_v52 }
 0x42d   :  { %v2401_v60 = vadd.f32 %v5818_v8, %v2255_v59  ;;  %v2257_v4 = vpop.f32.mrb[42].mxu1  ;;  %4138 = vmatprep.mubr.msk.bf16.mxu1 %vm2668_vm3, %v2491_v58  ;;  %4201 = vmatpush3.bf16.msra.mxu0 %v4705_v52  ;;  %v5946_v52 = vld [vmem:[%s6349_s9 + $0x18] sm:$0xff] }
 0x42e   :  { %v2402_v27 = vadd.f32 %v5815_v0, %v2257_v4  ;;  %v2259_v61 = vpop.f32.mrb[43].mxu1  ;;  %2816 = vmatmul.mubr.bf16.gmra.mrb[92].mxu1 %v2490_v57  ;;  %v2456_v24 = vmax.f32 %v2400_v6, 0.0 }
 0x42f   :  { %v2403_v62 = vadd.f32 %v5818_v8, %v2259_v61  ;;  %v2457_v9 = vmax.f32 %v2401_v60, 0.0 }
 0x430   :  { %v2458_v63 = vmax.f32 %v2402_v27, 0.0 }
 0x431   :  { %v2459_v10 = vmax.f32 %v2403_v62, 0.0 }
 0x432   :  { %v2492_v47 = vpack.c.bf16 %v2458_v63, %v2456_v24 }
 0x433   :  { %v2493_v13 = vpack.c.bf16 %v2459_v10, %v2457_v9  ;;  %v2263_v46 = vpop.f32.mrb[44].mxu1 }
 0x434   :  { %v2404_v5 = vadd.f32 %v5815_v0, %v2263_v46  ;;  %v2265_v16 = vpop.f32.mrb[45].mxu1 }
 0x435   :  { %v2405_v17 = vadd.f32 %v5818_v8, %v2265_v16  ;;  %v2267_v3 = vpop.f32.mrb[46].mxu1  ;;  %4139 = vmatprep.mubr.msk.bf16.mxu1 %vm2668_vm3, %v2493_v13  ;;  %v4707_v13 = vld [vmem:[%s6347_s7 + $0x10] sm:$0xff]  }
 0x436   :  { %v2406_v30 = vadd.f32 %v5815_v0, %v2267_v3  ;;  %v2269_v18 = vpop.f32.mrb[47].mxu1  ;;  %2824 = vmatmul.mubr.bf16.gmra.mrb[96].mxu1 %v2492_v47  ;;  %v2460_v29 = vmax.f32 %v2404_v5, 0.0 }
 0x437   :  { %v2407_v40 = vadd.f32 %v5818_v8, %v2269_v18  ;;  %v2461_v19 = vmax.f32 %v2405_v17, 0.0 }
 0x438   :  { %v2462_v50 = vmax.f32 %v2406_v30, 0.0 }
 0x439   :  { %v2463_v28 = vmax.f32 %v2407_v40, 0.0 }
 0x43a   :  { %v2494_v49 = vpack.c.bf16 %v2462_v50, %v2460_v29  ;;  %v4708_v29 = vld [vmem:[%s6347_s7 + $0x18] sm:$0xff]  }
 0x43b   :  { %v2495_v7 = vpack.c.bf16 %v2463_v28, %v2461_v19  ;;  %v2273_v33 = vpop.f32.mrb[48].mxu1 }
 0x43c   :  { %v2408_v34 = vadd.f32 %v5815_v0, %v2273_v33  ;;  %v2275_v1 = vpop.f32.mrb[49].mxu1 }
 0x43d   :  { %v2409_v22 = vadd.f32 %v5818_v8, %v2275_v1  ;;  %v2277_v35 = vpop.f32.mrb[50].mxu1  ;;  %4140 = vmatprep.mubr.msk.bf16.mxu1 %vm2668_vm3, %v2495_v7 }
 0x43e   :  { %v2410_v36 = vadd.f32 %v5815_v0, %v2277_v35  ;;  %v2279_v20 = vpop.f32.mrb[51].mxu1  ;;  %2832 = vmatmul.mubr.bf16.gmra.mrb[100].mxu1 %v2494_v49  ;;  %v2464_v45 = vmax.f32 %v2408_v34, 0.0 }
 0x43f   :  { %v2411_v44 = vadd.f32 %v5818_v8, %v2279_v20  ;;  %v2465_v32 = vmax.f32 %v2409_v22, 0.0 }
 0x440   :  { %v2466_v31 = vmax.f32 %v2410_v36, 0.0 }
 0x441   :  { %v2467_v55 = vmax.f32 %v2411_v44, 0.0 }
 0x442   :  { %v2496_v56 = vpack.c.bf16 %v2466_v31, %v2464_v45 }
 0x443   :  { %v2497_v14 = vpack.c.bf16 %v2467_v55, %v2465_v32  ;;  %v2283_v15 = vpop.f32.mrb[52].mxu1 }
 0x444   :  { %v2412_v42 = vadd.f32 %v5815_v0, %v2283_v15  ;;  %v2285_v43 = vpop.f32.mrb[53].mxu1 }
 0x445   :  { %v2413_v11 = vadd.f32 %v5818_v8, %v2285_v43  ;;  %v2287_v12 = vpop.f32.mrb[54].mxu1  ;;  %4141 = vmatprep.mubr.msk.bf16.mxu1 %vm2668_vm3, %v2497_v14 }
 0x446   :  { %v2414_v37 = vadd.f32 %v5815_v0, %v2287_v12  ;;  %v2289_v38 = vpop.f32.mrb[55].mxu1  ;;  %2840 = vmatmul.mubr.bf16.gmra.mrb[104].mxu1 %v2496_v56  ;;  %v2468_v41 = vmax.f32 %v2412_v42, 0.0  ;;  %v4706_v0 = vld [vmem:[%s6347_s7 + $0x8] sm:$0xff]  }
 0x447   :  { %v2415_v26 = vadd.f32 %v5818_v8, %v2289_v38  ;;  %v2469_v39 = vmax.f32 %v2413_v11, 0.0  ;;  %4202 = vmatprep.subr.bf16.mxu0 %v4706_v0 }
 0x448   :  { %v2470_v48 = vmax.f32 %v2414_v37, 0.0  ;;  %4203 = vmatpush3.bf16.msra.mxu0 %v4706_v0 }
 0x449   :  { %v2471_v2 = vmax.f32 %v2415_v26, 0.0  ;;  %4204 = vmatprep.subr.bf16.mxu0 %v4707_v13 }
 0x44a   :  { %v2498_v54 = vpack.c.bf16 %v2470_v48, %v2468_v41  ;;  %v5931_v48 = vld [vmem:[%s6349_s9] sm:$0xff] }
 0x44b   :  { %v2499_v51 = vpack.c.bf16 %v2471_v2, %v2469_v39  ;;  %v5936_v39 = vld [vmem:[%s6349_s9 + $0x8] sm:$0xff] }
 0x44c   :  { %4205 = vmatpush3.bf16.msra.mxu0 %v4707_v13 }
 0x44d   :  { %4142 = vmatprep.mubr.msk.bf16.mxu1 %vm2668_vm3, %v2499_v51  ;;  %4206 = vmatprep.subr.bf16.mxu0 %v4708_v29  ;;  %v5941_v51 = vld [vmem:[%s6349_s9 + $0x10] sm:$0xff] }
 0x44e   :  { %2848 = vmatmul.mubr.bf16.gmra.mrb[108].mxu1 %v2498_v54 }
 0x450   :  { %4207 = vmatpush3.bf16.msra.mxu0 %v4708_v29 }
 0x4b9   :  { %v5896_v8 = vpop.f32.mrb[56].mxu1 }
 0x4ba   :  { %v2747_v57 = vpop.f32.mrb[57].mxu1 }
 0x4bb   :  { %v5898_v58 = vpop.f32.mrb[58].mxu1  ;;  %v4497_v57 = vpack.i.bf16 %v5936_v39, %v5931_v48 }
 0x4bc   :  { %v2750_v53 = vpop.f32.mrb[59].mxu1 }
 0x4c1   :  { %v5900_v6 = vpop.f32.mrb[60].mxu1 }
 0x4c2   :  { %v2755_v59 = vpop.f32.mrb[61].mxu1 }
 0x4c3   :  { %v5902_v60 = vpop.f32.mrb[62].mxu1  ;;  %v4502_v59 = vpack.i.bf16 %v5946_v52, %v5941_v51 }
 0x4c4   :  { %v2758_v4 = vpop.f32.mrb[63].mxu1 }
 0x4c9   :  { %v2761_v27 = vpop.f32.mrb[64].mxu1 }
 0x4ca   :  { %2860 = vrot.lane.b32.xlu0 %v2761_v27, %s4828_s0  ;;  %v2763_v61 = vpop.f32.mrb[65].mxu1 }
 0x4cb   :  { %v2764_v62 = vpop.f32.mrb[66].mxu1 }
 0x4cc   :  { %v2766_v24 = vpop.f32.mrb[67].mxu1 }
 0x4ce   :  { %2862 = vrot.lane.b32.xlu0 %v2764_v62, %s4828_s0 }
 0x4d1   :  { %v2769_v63 = vpop.f32.mrb[68].mxu1 }
 0x4d2   :  { %2864 = vrot.lane.b32.xlu1 %v2769_v63, %s4828_s0  ;;  %v2771_v9 = vpop.f32.mrb[69].mxu1 }
 0x4d3   :  { %v2772_v10 = vpop.f32.mrb[70].mxu1 }
 0x4d4   :  { %v2774_v47 = vpop.f32.mrb[71].mxu1 }
 0x4d6   :  { %2866 = vrot.lane.b32.xlu1 %v2772_v10, %s4828_s0 }
 0x4d9   :  { %v2777_v46 = vpop.f32.mrb[72].mxu1 }
 0x4da   :  { %2880 = vrot.lane.b32.xlu0 %v2777_v46, %s4829_s16  ;;  %v2779_v5 = vpop.f32.mrb[73].mxu1 }
 0x4db   :  { %v2780_v16 = vpop.f32.mrb[74].mxu1 }
 0x4dc   :  { %2882 = vrot.lane.b32.xlu1 %v2780_v16, %s4829_s16  ;;  %v2782_v17 = vpop.f32.mrb[75].mxu1 }
 0x4e1   :  { %v2785_v3 = vpop.f32.mrb[76].mxu1 }
 0x4e2   :  { %2884 = vrot.lane.b32.xlu0 %v2785_v3, %s4829_s16  ;;  %v2787_v30 = vpop.f32.mrb[77].mxu1 }
 0x4e3   :  { %v2788_v18 = vpop.f32.mrb[78].mxu1 }
 0x4e4   :  { %2886 = vrot.lane.b32.xlu1 %v2788_v18, %s4829_s16  ;;  %v2790_v40 = vpop.f32.mrb[79].mxu1 }
 0x4e9   :  { %v2793_v50 = vpop.f32.mrb[80].mxu1 }
 0x4ea   :  { %2900 = vrot.lane.b32.xlu0 %v2793_v50, %s4830_s1  ;;  %v2795_v19 = vpop.f32.mrb[81].mxu1 }
 0x4eb   :  { %v2796_v28 = vpop.f32.mrb[82].mxu1 }
 0x4ec   :  { %2902 = vrot.lane.b32.xlu1 %v2796_v28, %s4830_s1  ;;  %v2798_v49 = vpop.f32.mrb[83].mxu1 }
 0x4f1   :  { %v2801_v7 = vpop.f32.mrb[84].mxu1 }
 0x4f2   :  { %2904 = vrot.lane.b32.xlu0 %v2801_v7, %s4830_s1  ;;  %v2803_v33 = vpop.f32.mrb[85].mxu1 }
 0x4f3   :  { %v2804_v34 = vpop.f32.mrb[86].mxu1 }
 0x4f4   :  { %2906 = vrot.lane.b32.xlu1 %v2804_v34, %s4830_s1  ;;  %v2806_v1 = vpop.f32.mrb[87].mxu1 }
 0x4f9   :  { %v2809_v22 = vpop.f32.mrb[88].mxu1 }
 0x4fa   :  { %v2810_v35 = vpop.f32.mrb[89].mxu1 }
 0x4fb   :  { %v2812_v36 = vpop.f32.mrb[90].mxu1 }
 0x4fc   :  { %v2813_v20 = vpop.f32.mrb[91].mxu1 }
 0x501   :  { %v2817_v44 = vpop.f32.mrb[92].mxu1 }
 0x502   :  { %v2818_v45 = vpop.f32.mrb[93].mxu1 }
 0x503   :  { %v2820_v31 = vpop.f32.mrb[94].mxu1 }
 0x504   :  { %v2821_v32 = vpop.f32.mrb[95].mxu1 }
 0x509   :  { %v2825_v55 = vpop.f32.mrb[96].mxu1 }
 0x50a   :  { %v2826_v56 = vpop.f32.mrb[97].mxu1 }
 0x50b   :  { %2924 = vrot.lane.b32.xlu0 %v2826_v56, %s4828_s0  ;;  %v2828_v14 = vpop.f32.mrb[98].mxu1 }
 0x50c   :  { %v2829_v15 = vpop.f32.mrb[99].mxu1 }
 0x50d   :  { %2926 = vrot.lane.b32.xlu1 %v2829_v15, %s4828_s0 }
 0x511   :  { %v2833_v42 = vpop.f32.mrb[100].mxu1 }
 0x512   :  { %v2834_v43 = vpop.f32.mrb[101].mxu1 }
 0x513   :  { %2928 = vrot.lane.b32.xlu0 %v2834_v43, %s4828_s0  ;;  %v2836_v11 = vpop.f32.mrb[102].mxu1 }
 0x514   :  { %v2837_v12 = vpop.f32.mrb[103].mxu1 }
 0x515   :  { %2930 = vrot.lane.b32.xlu1 %v2837_v12, %s4828_s0 }
 0x519   :  { %v2841_v37 = vpop.f32.mrb[104].mxu1 }
 0x51a   :  { %v2842_v38 = vpop.f32.mrb[105].mxu1 }
 0x51b   :  { %2944 = vrot.lane.b32.xlu0 %v2842_v38, %s4829_s16  ;;  %v2844_v26 = vpop.f32.mrb[106].mxu1 }
 0x51c   :  { %v2845_v41 = vpop.f32.mrb[107].mxu1 }
 0x51d   :  { %2946 = vrot.lane.b32.xlu1 %v2845_v41, %s4829_s16 }
 0x521   :  { %v2849_v2 = vpop.f32.mrb[108].mxu1 }
 0x522   :  { %v2850_v54 = vpop.f32.mrb[109].mxu1 }
 0x523   :  { %2948 = vrot.lane.b32.xlu0 %v2850_v54, %s4829_s16  ;;  %v2852_v0 = vpop.f32.mrb[110].mxu1 }
 0x524   :  { %v2853_v53 = vpop.f32.mrb[111].mxu1 }
 0x525   :  { %2950 = vrot.lane.b32.xlu1 %v2853_v53, %s4829_s16 }
 0x527   :  { %4498 = vrot.lane.b32.xlu0 %v4497_v57, %s4830_s1 }
 0x529   :  { %4503 = vrot.lane.b32.xlu1 %v4502_v59, %s4830_s1 }
 0x53c   :  { %v2861_v4 = vpop.permute.xlu0 %2860 }
 0x53d   :  { %v2872_v10 = vadd.f32 %v2861_v4, %v5896_v8 }
 0x540   :  { %v2863_v61 = vpop.permute.xlu0 %2862 }
 0x541   :  { %v2873_v13 = vadd.f32 %v2863_v61, %v5898_v58 }
 0x544   :  { %v2865_v27 = vpop.permute.xlu1 %2864 }
 0x545   :  { %v2874_v40 = vadd.f32 %v2865_v27, %v5900_v6 }
 0x548   :  { %v2867_v62 = vpop.permute.xlu1 %2866 }
 0x549   :  { %v2875_v50 = vadd.f32 %v2867_v62, %v5902_v60  ;;  %v4143_v60 = vld [vmem:[%s6346_s6] ss:$0 sm:$0xff] }
 0x54c   :  { %v2881_v24 = vpop.permute.xlu0 %2880 }
 0x54d   :  { %v2892_v46 = vadd.f32 %v2881_v24, %v2872_v10 }
 0x54e   :  { %v2883_v63 = vpop.permute.xlu1 %2882 }
 0x54f   :  { %v2893_v16 = vadd.f32 %v2883_v63, %v2873_v13 }
 0x554   :  { %v2885_v9 = vpop.permute.xlu0 %2884 }
 0x555   :  { %v2894_v19 = vadd.f32 %v2885_v9, %v2874_v40 }
 0x556   :  { %v2887_v47 = vpop.permute.xlu1 %2886 }
 0x557   :  { %v2895_v49 = vadd.f32 %v2887_v47, %v2875_v50  ;;  %v4144_v47 = vld [vmem:[%s6348_s8] ss:$0 sm:$0xff] }
 0x55c   :  { %v2901_v5 = vpop.permute.xlu0 %2900 }
 0x55d   :  { %v2912_v17 = vadd.f32 %v2901_v5, %v2892_v46 }
 0x55e   :  { %v2903_v3 = vpop.permute.xlu1 %2902 }
 0x55f   :  { %v2913_v30 = vadd.f32 %v2903_v3, %v2893_v16  ;;  %v2916_v18 = vadd.f32 %v2912_v17, %v2810_v35 }
 0x561   :  { %v2917_v29 = vadd.f32 %v2913_v30, %v2813_v20 }
 0x564   :  { %v2905_v28 = vpop.permute.xlu0 %2904 }
 0x565   :  { %v2914_v7 = vadd.f32 %v2905_v28, %v2894_v19 }
 0x566   :  { %v2907_v8 = vpop.permute.xlu1 %2906 }
 0x567   :  { %v2915_v33 = vadd.f32 %v2907_v8, %v2895_v49  ;;  %v2918_v34 = vadd.f32 %v2914_v7, %v2818_v45 }
 0x569   :  { %v2919_v58 = vadd.f32 %v2915_v33, %v2821_v32 }
 0x57d   :  { %v2925_v1 = vpop.permute.xlu0 %2924 }
 0x57e   :  { %v2936_v55 = vadd.f32 %v2925_v1, %v2916_v18 }
 0x57f   :  { %v2927_v22 = vpop.permute.xlu1 %2926 }
 0x580   :  { %v2937_v56 = vadd.f32 %v2927_v22, %v2917_v29 }
 0x585   :  { %v2929_v36 = vpop.permute.xlu0 %2928 }
 0x586   :  { %v2938_v14 = vadd.f32 %v2929_v36, %v2918_v34 }
 0x587   :  { %v2931_v44 = vpop.permute.xlu1 %2930 }
 0x588   :  { %v2939_v43 = vadd.f32 %v2931_v44, %v2919_v58 }
 0x58d   :  { %v2945_v31 = vpop.permute.xlu0 %2944 }
 0x58e   :  { %v2956_v6 = vadd.f32 %v2945_v31, %v2936_v55 }
 0x58f   :  { %v2947_v35 = vpop.permute.xlu1 %2946 }
 0x590   :  { %v2957_v20 = vadd.f32 %v2947_v35, %v2937_v56  ;;  %v2967_v15 = vadd.f32 %v4143_v60, %v2956_v6 }
 0x592   :  { %v2968_v45 = vadd.f32 %v4143_v60, %v2957_v20  ;;  %v2971_v37 = vmax.f32 %v2967_v15, 0.0 }
 0x594   :  { %v2972_v41 = vmax.f32 %v2968_v45, 0.0 }
 0x595   :  { %v2949_v42 = vpop.permute.xlu0 %2948 }
 0x596   :  { %v2958_v32 = vadd.f32 %v2949_v42, %v2938_v14 }
 0x597   :  { %v2951_v11 = vpop.permute.xlu1 %2950 }
 0x598   :  { %v2959_v12 = vadd.f32 %v2951_v11, %v2939_v43  ;;  %v2969_v38 = vadd.f32 %v4143_v60, %v2958_v32 }
 0x599   :  { %v4499_v26 = vpop.permute.xlu0 %4498 }
 0x59a   :  { %v2970_v2 = vadd.f32 %v4143_v60, %v2959_v12  ;;  %v4501_v54 = vunpack.i.h.bf16 %v4499_v26  ;;  %v4500_v0 = vunpack.i.l.bf16 %v4499_v26  ;;  %v2973_v61 = vmax.f32 %v2969_v38, 0.0 }
 0x59b   :  { %v4504_v57 = vpop.permute.xlu1 %4503 }
 0x59c   :  { %v2974_v53 = vmax.f32 %v2970_v2, 0.0  ;;  %v2997_v59 = vsel %vm2995_vm4, %v2972_v41, %v4501_v54  ;;  %v2996_v4 = vsel %vm2995_vm4, %v2971_v37, %v4500_v0  ;;  %v4506_v27 = vunpack.i.h.bf16 %v4504_v57 }
 0x59d   :  { %v3000_v62 = vpack.c.bf16 %v2997_v59, %v2996_v4  ;;  %v4505_v24 = vunpack.i.l.bf16 %v4504_v57 }
 0x59e   :  { %v2999_v63 = vsel %vm2995_vm4, %v2974_v53, %v4506_v27 }
 0x59f   :  { %v2998_v9 = vsel %vm2995_vm4, %v2973_v61, %v4505_v24  ;;  %4208 = vmatprep.mubr.msk.bf16.mxu0 %vm3041_vm5, %v3000_v62 }
 0x5a0   :  { %v3001_v10 = vpack.c.bf16 %v2999_v63, %v2998_v9  ;;  %v4709_v63 = vld [vmem:[%s6347_s7 + $0x20] sm:$0xff]   ;;  %v4710_v9 = vld [vmem:[%s6347_s7 + $0x28] sm:$0xff]  }
 0x5a1   :  { %4212 = vmatprep.subr.bf16.mxu0 %v4709_v63 }
 0x5a2   :  { %4209 = vmatmul.mubr.msk.bf16.vlgmr.msra.gmra.mrb[72].mxu0 %vm3041_vm5, %v3001_v10 }
 0x5a3   :  { %4213 = vmatpush3.bf16.msra.mxu0 %v4709_v63 }
 0x5a4   :  { %4214 = vmatprep.subr.bf16.mxu0 %v4710_v9 }
 0x5a7   :  { %4215 = vmatpush3.bf16.msra.mxu0 %v4710_v9 }
 0x675   :  { %v4210_v13 = vpop.f32.mrb[72].mxu0 }
 0x676   :  { %v3082_v46 = vpop.f32.mrb[73].mxu0  ;;  %v3091_v3 = vadd.f32 %v4210_v13, %v4144_v47 }
 0x677   :  { %v3083_v5 = vadd.f32 %v4144_v47, %v3082_v46  ;;  %v4211_v16 = vpop.f32.mrb[74].mxu0  ;;  %v4711_v46 = vld [vmem:[%s6347_s7 + $0x30] sm:$0xff]  }
 0x678   :  { %v3085_v17 = vpop.f32.mrb[75].mxu0  ;;  %v3094_v18 = vadd.f32 %v4211_v16, %v4144_v47  ;;  %v4153_v49 = vmul.f32 -1.442695, %v3091_v3  ;;  %4216 = vmatprep.subr.bf16.mxu0 %v4711_v46 }
 0x679   :  { %4715 = vtanh.f32 %v3083_v5  ;;  %v3086_v30 = vadd.f32 %v4144_v47, %v3085_v17  ;;  %v4151_v28 = vmul.f32 -1.442695, %v3083_v5  ;;  %4217 = vmatpush3.bf16.msra.mxu0 %v4711_v46  ;;  %v4712_v5 = vld [vmem:[%s6347_s7 + $0x38] sm:$0xff]  }
 0x67a   :  { %4717 = vtanh.f32 %v3091_v3  ;;  %v4154_v8 = vmul.f32 -1.442695, %v3094_v18  ;;  %4218 = vmatprep.subr.bf16.mxu0 %v4712_v5 }
 0x67b   :  { %4719 = vtanh.f32 %v3086_v30  ;;  %v4152_v7 = vmul.f32 -1.442695, %v3086_v30 }
 0x67c   :  { %4721 = vtanh.f32 %v3094_v18 }
 0x67d   :  { %4723 = vpow2.f32 %v4151_v28  ;;  %4219 = vmatpush3.bf16.msra.mxu0 %v4712_v5 }
 0x67e   :  { %4725 = vpow2.f32 %v4153_v49 }
 0x67f   :  { %4727 = vpow2.f32 %v4152_v7 }
 0x680   :  { %4729 = vpow2.f32 %v4154_v8 }
 0x683   :  { %v4716_v40 = vpop.eup %4715 }
 0x684   :  { %3145 = vrot.lane.b32.xlu0 %v4716_v40, %s4829_s16  ;;  %v4718_v29 = vpop.eup %4717 }
 0x685   :  { %v4720_v50 = vpop.eup %4719 }
 0x686   :  { %3147 = vrot.lane.b32.xlu1 %v4720_v50, %s4829_s16  ;;  %v4722_v19 = vpop.eup %4721 }
 0x687   :  { %v4724_v33 = vpop.eup %4723 }
 0x688   :  { %3149 = vrot.lane.b32.xlu0 %v4718_v29, %s4829_s16  ;;  %v3109_v34 = vadd.f32 1.0, %v4724_v33  ;;  %v4726_v58 = vpop.eup %4725 }
 0x689   :  { %v4728_v1 = vpop.eup %4727  ;;  %v3111_v22 = vadd.f32 1.0, %v4726_v58 }
 0x68a   :  { %3151 = vrot.lane.b32.xlu1 %v4722_v19, %s4829_s16  ;;  %4731 = vrcp.f32 %v3109_v34  ;;  %v3110_v36 = vadd.f32 1.0, %v4728_v1  ;;  %v4730_v44 = vpop.eup %4729 }
 0x68b   :  { %4733 = vrcp.f32 %v3111_v22  ;;  %v3112_v31 = vadd.f32 1.0, %v4730_v44 }
 0x68c   :  { %3125 = vrot.lane.b32.xlu0 %v5931_v48, %s4828_s0  ;;  %4735 = vrcp.f32 %v3110_v36  ;;  %v4164_v36 = vld [vmem:[%s6348_s8 + $0x1] ss:$0 sm:$0xff] }
 0x68d   :  { %4737 = vrcp.f32 %v3112_v31 }
 0x68e   :  { %3127 = vrot.lane.b32.xlu1 %v5936_v39, %s4828_s0 }
 0x690   :  { %3129 = vrot.lane.b32.xlu0 %v5941_v51, %s4828_s0 }
 0x692   :  { %3131 = vrot.lane.b32.xlu1 %v5946_v52, %s4828_s0 }
 0x694   :  { %v4732_v55 = vpop.eup %4731 }
 0x695   :  { %v4734_v6 = vpop.eup %4733 }
 0x696   :  { %v4736_v14 = vpop.eup %4735 }
 0x697   :  { %v4738_v43 = vpop.eup %4737 }
 0x6f6   :  { %v3146_v35 = vpop.permute.xlu0 %3145 }
 0x6f7   :  { %v3157_v56 = vmul.f32 %v4732_v55, %v3146_v35 }
 0x6f8   :  { %v3148_v15 = vpop.permute.xlu1 %3147 }
 0x6f9   :  { %3165 = vrot.lane.b32.xlu0 %v3157_v56, %s4830_s1  ;;  %v3158_v42 = vmul.f32 %v4736_v14, %v3148_v15 }
 0x6fa   :  { %v3150_v60 = vpop.permute.xlu0 %3149 }
 0x6fb   :  { %v3159_v20 = vmul.f32 %v4734_v6, %v3150_v60  ;;  %3167 = vrot.lane.b32.xlu1 %v3158_v42, %s4830_s1 }
 0x6fc   :  { %v3152_v45 = vpop.permute.xlu1 %3151 }
 0x6fd   :  { %3169 = vrot.lane.b32.xlu0 %v3159_v20, %s4830_s1  ;;  %v3160_v32 = vmul.f32 %v4738_v43, %v3152_v45 }
 0x6fe   :  { %v3126_v11 = vpop.permute.xlu0 %3125 }
 0x6ff   :  { %3171 = vrot.lane.b32.xlu1 %v3160_v32, %s4830_s1  ;;  %v3137_v38 = vmul.f32 %v4732_v55, %v3126_v11 }
 0x700   :  { %v3128_v12 = vpop.permute.xlu1 %3127 }
 0x701   :  { %v3138_v57 = vmul.f32 %v4736_v14, %v3128_v12 }
 0x702   :  { %v3130_v37 = vpop.permute.xlu0 %3129 }
 0x703   :  { %v3139_v54 = vmul.f32 %v4734_v6, %v3130_v37 }
 0x704   :  { %v3132_v2 = vpop.permute.xlu1 %3131 }
 0x705   :  { %v3140_v27 = vmul.f32 %v4738_v43, %v3132_v2 }
 0x76b   :  { %v3166_v26 = vpop.permute.xlu0 %3165 }
 0x76c   :  { %v5988_v41 = vadd.f32 %v3166_v26, %v3137_v38 }
 0x76d   :  { %v3168_v59 = vpop.permute.xlu1 %3167 }
 0x76e   :  { %4739 = vtanh.f32 %v5988_v41  ;;  %v5993_v4 = vadd.f32 %v3168_v59, %v3138_v57 }
 0x76f   :  { %v3170_v0 = vpop.permute.xlu0 %3169 }
 0x770   :  { %v5991_v53 = vadd.f32 %v3170_v0, %v3139_v54 }
 0x771   :  { %v3172_v61 = vpop.permute.xlu1 %3171 }
 0x772   :  { %4741 = vtanh.f32 %v5991_v53  ;;  %v5997_v62 = vadd.f32 %v3172_v61, %v3140_v27 }
 0x773   :  { %4743 = vtanh.f32 %v5993_v4 }
 0x774   :  { %4745 = vtanh.f32 %v5997_v62 }
 0x778   :  { %v4740_v24 = vpop.eup %4739 }
 0x779   :  { %3189 = vrot.lane.b32.xlu0 %v4740_v24, %s4829_s16 }
 0x77c   :  { %v4742_v10 = vpop.eup %4741 }
 0x77d   :  { %3193 = vrot.lane.b32.xlu0 %v4742_v10, %s4829_s16  ;;  %v4744_v47 = vpop.eup %4743 }
 0x77e   :  { %3191 = vrot.lane.b32.xlu1 %v4744_v47, %s4829_s16  ;;  %v4746_v13 = vpop.eup %4745 }
 0x782   :  { %3195 = vrot.lane.b32.xlu1 %v4746_v13, %s4829_s16 }
 0x7eb   :  { %v3190_v16 = vpop.permute.xlu0 %3189 }
 0x7ec   :  { %v3201_v17 = vmul.f32 %v4732_v55, %v3190_v16 }
 0x7ee   :  { %3209 = vrot.lane.b32.xlu0 %v3201_v17, %s4830_s1 }
 0x7ef   :  { %v3194_v3 = vpop.permute.xlu0 %3193 }
 0x7f0   :  { %v3203_v30 = vmul.f32 %v4734_v6, %v3194_v3  ;;  %v3192_v18 = vpop.permute.xlu1 %3191 }
 0x7f1   :  { %v3202_v40 = vmul.f32 %v4736_v14, %v3192_v18 }
 0x7f2   :  { %3213 = vrot.lane.b32.xlu0 %v3203_v30, %s4830_s1 }
 0x7f3   :  { %3211 = vrot.lane.b32.xlu1 %v3202_v40, %s4830_s1 }
 0x7f4   :  { %v3196_v29 = vpop.permute.xlu1 %3195 }
 0x7f5   :  { %v3204_v50 = vmul.f32 %v4738_v43, %v3196_v29 }
 0x7f7   :  { %3215 = vrot.lane.b32.xlu1 %v3204_v50, %s4830_s1 }
 0x860   :  { %v6020_v19 = vpop.permute.xlu0 %3209 }
 0x861   :  { %v3221_v49 = vsel %vm2995_vm4, %v6020_v19, %v5931_v48 }
 0x864   :  { %v6030_v33 = vpop.permute.xlu0 %3213 }
 0x865   :  { %v6022_v28 = vpop.permute.xlu1 %3211  ;;  %v3223_v58 = vsel %vm2995_vm4, %v6030_v33, %v5941_v51 }
 0x866   :  { %v3222_v7 = vsel %vm2995_vm4, %v6022_v28, %v5936_v39 }
 0x867   :  { %v3225_v8 = vpack.c.bf16 %v3222_v7, %v3221_v49 }
 0x869   :  { %v6032_v34 = vpop.permute.xlu1 %3215  ;;  %4220 = vmatprep.mubr.msk.bf16.mxu0 %vm3041_vm5, %v3225_v8 }
 0x86a   :  { %v3224_v1 = vsel %vm2995_vm4, %v6032_v34, %v5946_v52 }
 0x86b   :  { %v3226_v22 = vpack.c.bf16 %v3224_v1, %v3223_v58 }
 0x86d   :  { %4221 = vmatmul.mubr.msk.bf16.vlgmr.msra.gmra.mrb[76].mxu0 %vm3041_vm5, %v3226_v22 }
 0x940   :  { %v4222_v44 = vpop.f32.mrb[76].mxu0 }
 0x941   :  { %v3308_v31 = vpop.f32.mrb[77].mxu0  ;;  %v3317_v6 = vadd.f32 %v4222_v44, %v4164_v36  ;;  %v4713_v44 = vld [vmem:[%s6350_s10] sm:$0xff]  }
 0x942   :  { %v3309_v55 = vadd.f32 %v4164_v36, %v3308_v31  ;;  %v4223_v35 = vpop.f32.mrb[78].mxu0  ;;  %4224 = vmatprep.subr.bf16.mxu0 %v4713_v44 }
 0x943   :  { %v3311_v56 = vpop.f32.mrb[79].mxu0  ;;  %v3320_v20 = vadd.f32 %v4223_v35, %v4164_v36  ;;  %v4173_v32 = vmul.f32 -1.442695, %v3317_v6  ;;  %4225 = vmatpush3.bf16.msra.mxu0 %v4713_v44 }
 0x944   :  { %4747 = vtanh.f32 %v3309_v55  ;;  %v3312_v60 = vadd.f32 %v4164_v36, %v3311_v56  ;;  %v4171_v45 = vmul.f32 -1.442695, %v3309_v55  ;;  %v4714_v56 = vld [vmem:[%s6350_s10 + $0x8] sm:$0xff]  }
 0x945   :  { %4749 = vtanh.f32 %v3317_v6  ;;  %v4174_v12 = vmul.f32 -1.442695, %v3320_v20  ;;  %4226 = vmatprep.subr.bf16.mxu0 %v4714_v56 }
 0x946   :  { %4751 = vtanh.f32 %v3312_v60  ;;  %v4172_v11 = vmul.f32 -1.442695, %v3312_v60 }
 0x947   :  { %4753 = vtanh.f32 %v3320_v20  ;;  %4227 = vmatpush3.bf16.msra.mxu0 %v4714_v56 }
 0x948   :  { %4755 = vpow2.f32 %v4171_v45 }
 0x949   :  { %4757 = vpow2.f32 %v4173_v32 }
 0x94a   :  { %4759 = vpow2.f32 %v4172_v11 }
 0x94b   :  { %4761 = vpow2.f32 %v4174_v12 }
 0x94e   :  { %v4748_v14 = vpop.eup %4747 }
 0x94f   :  { %3371 = vrot.lane.b32.xlu0 %v4748_v14, %s4829_s16  ;;  %v4750_v15 = vpop.eup %4749 }
 0x950   :  { %v4752_v42 = vpop.eup %4751 }
 0x951   :  { %3373 = vrot.lane.b32.xlu1 %v4752_v42, %s4829_s16  ;;  %v4754_v43 = vpop.eup %4753 }
 0x953   :  { %3375 = vrot.lane.b32.xlu0 %v4750_v15, %s4829_s16 }
 0x955   :  { %3377 = vrot.lane.b32.xlu1 %v4754_v43, %s4829_s16 }
 0x957   :  { %3351 = vrot.lane.b32.xlu0 %v5931_v48, %s4829_s16  ;;  %v4756_v48 = vpop.eup %4755 }
 0x958   :  { %v3335_v37 = vadd.f32 1.0, %v4756_v48  ;;  %v4758_v38 = vpop.eup %4757 }
 0x959   :  { %3353 = vrot.lane.b32.xlu1 %v5936_v39, %s4829_s16  ;;  %v4760_v26 = vpop.eup %4759  ;;  %v3337_v2 = vadd.f32 1.0, %v4758_v38  ;;  %v6094_v38 = vand.u32 127, %v1202_v21 }
 0x95a   :  { %4763 = vrcp.f32 %v3335_v37  ;;  %v4762_v54 = vpop.eup %4761  ;;  %v4831_v37 = vmov 15  }
 0x95b   :  { %3355 = vrot.lane.b32.xlu0 %v5941_v51, %s4829_s16  ;;  %v3336_v51 = vadd.f32 1.0, %v4760_v26  ;;  %4765 = vrcp.f32 %v3337_v2  ;;  %v3338_v39 = vadd.f32 1.0, %v4762_v54  ;;  %4507 = vset.pattern.permute.xlu1 %v4831_v37  ;;  %v4175_v26 = vld [vmem:[%s6351_s11] ss:$0 sm:$0xff]  ;;  %vm3520_vm6 = vcmp.lt.s32.totalorder %v6094_v38, 15 }
 0x95c   :  { %4508 = vset.pattern.permute.xlu0 %v4831_v37  ;;  %vm3670_vm15 = vcmp.eq.s32.totalorder %v6094_v38, 0  ;;  %vm3695_vm0 = vcmp.eq.s32.totalorder %v6094_v38, 1  ;;  %vm3704_vm1 = vcmp.eq.s32.totalorder %v6094_v38, 2  ;;  %vm3713_vm2 = vcmp.eq.s32.totalorder %v6094_v38, 3 }
 0x95d   :  { %3357 = vrot.lane.b32.xlu1 %v5946_v52, %s4829_s16  ;;  %4767 = vrcp.f32 %v3336_v51 }
 0x95e   :  { %4769 = vrcp.f32 %v3338_v39 }
 0x964   :  { %v4764_v52 = vpop.eup %4763 }
 0x965   :  { %v4766_v59 = vpop.eup %4765 }
 0x967   :  { %v4768_v24 = vpop.eup %4767 }
 0x968   :  { %v4770_v10 = vpop.eup %4769 }
 0x9c1   :  { %v3372_v0 = vpop.permute.xlu0 %3371 }
 0x9c2   :  { %v3383_v57 = vmul.f32 %v4764_v52, %v3372_v0 }
 0x9c3   :  { %v3374_v63 = vpop.permute.xlu1 %3373 }
 0x9c4   :  { %3391 = vrot.lane.b32.xlu0 %v3383_v57, %s4830_s1  ;;  %v3384_v9 = vmul.f32 %v4768_v24, %v3374_v63  ;;  %v6110_v63 = vcvt.s32.f32 %v6094_v38 }
 0x9c5   :  { %v3376_v27 = vpop.permute.xlu0 %3375 }
 0x9c6   :  { %v3385_v61 = vmul.f32 %v4766_v59, %v3376_v27  ;;  %3393 = vrot.lane.b32.xlu1 %v3384_v9, %s4830_s1 }
 0x9c7   :  { %v3378_v47 = vpop.permute.xlu1 %3377 }
 0x9c8   :  { %3395 = vrot.lane.b32.xlu0 %v3385_v61, %s4830_s1  ;;  %v3386_v13 = vmul.f32 %v4770_v10, %v3378_v47 }
 0x9c9   :  { %v3352_v46 = vpop.permute.xlu0 %3351 }
 0x9ca   :  { %3397 = vrot.lane.b32.xlu1 %v3386_v13, %s4830_s1  ;;  %v3363_v17 = vmul.f32 %v4764_v52, %v3352_v46 }
 0x9cb   :  { %v3354_v5 = vpop.permute.xlu1 %3353 }
 0x9cc   :  { %v3364_v50 = vmul.f32 %v4768_v24, %v3354_v5 }
 0x9cd   :  { %v3356_v16 = vpop.permute.xlu0 %3355 }
 0x9ce   :  { %v3365_v40 = vmul.f32 %v4766_v59, %v3356_v16 }
 0x9cf   :  { %v3358_v18 = vpop.permute.xlu1 %3357 }
 0x9d0   :  { %v3366_v58 = vmul.f32 %v4770_v10, %v3358_v18 }
 0xa36   :  { %v3392_v3 = vpop.permute.xlu0 %3391 }
 0xa37   :  { %v6061_v30 = vadd.f32 %v3392_v3, %v3363_v17 }
 0xa38   :  { %v3394_v7 = vpop.permute.xlu1 %3393 }
 0xa39   :  { %4771 = vtanh.f32 %v6061_v30  ;;  %v6066_v8 = vadd.f32 %v3394_v7, %v3364_v50 }
 0xa3a   :  { %v3396_v29 = vpop.permute.xlu0 %3395 }
 0xa3b   :  { %v6064_v49 = vadd.f32 %v3396_v29, %v3365_v40 }
 0xa3c   :  { %v3398_v1 = vpop.permute.xlu1 %3397 }
 0xa3d   :  { %4773 = vtanh.f32 %v6064_v49  ;;  %v6070_v22 = vadd.f32 %v3398_v1, %v3366_v58 }
 0xa3e   :  { %4775 = vtanh.f32 %v6066_v8 }
 0xa3f   :  { %4777 = vtanh.f32 %v6070_v22 }
 0xa43   :  { %v4772_v36 = vpop.eup %4771 }
 0xa44   :  { %3415 = vrot.lane.b32.xlu0 %v4772_v36, %s4829_s16 }
 0xa47   :  { %v4774_v31 = vpop.eup %4773 }
 0xa48   :  { %3419 = vrot.lane.b32.xlu0 %v4774_v31, %s4829_s16  ;;  %v4776_v55 = vpop.eup %4775 }
 0xa49   :  { %3417 = vrot.lane.b32.xlu1 %v4776_v55, %s4829_s16  ;;  %v4778_v35 = vpop.eup %4777 }
 0xa4d   :  { %3421 = vrot.lane.b32.xlu1 %v4778_v35, %s4829_s16 }
 0xab6   :  { %v3416_v6 = vpop.permute.xlu0 %3415 }
 0xab7   :  { %v3427_v20 = vmul.f32 %v4764_v52, %v3416_v6 }
 0xaba   :  { %v3420_v15 = vpop.permute.xlu0 %3419 }
 0xabb   :  { %v3418_v60 = vpop.permute.xlu1 %3417  ;;  %v3429_v45 = vmul.f32 %v4766_v59, %v3420_v15 }
 0xabc   :  { %v6083_v14 = vmul.f32 %v4768_v24, %v3418_v60  ;;  %v4832_v60 = vmov 0.0  }
 0xabe   :  { %v3431_v42 = vpack.c.bf16 %v6083_v14, %v3427_v20 }
 0xabf   :  { %v3422_v43 = vpop.permute.xlu1 %3421 }
 0xac0   :  { %v6086_v32 = vmul.f32 %v4770_v10, %v3422_v43  ;;  %3446 = vrot.lane.b32.xlu0 %v3431_v42, %s4830_s1 }
 0xac2   :  { %v3432_v11 = vpack.c.bf16 %v6086_v32, %v3429_v45 }
 0xac4   :  { %3448 = vrot.lane.b32.xlu1 %v3432_v11, %s4830_s1 }
 0xb32   :  { %v3447_v12 = vpop.permute.xlu0 %3446 }
 0xb33   :  { %4228 = vmatprep.mubr.msk.bf16.mxu0 %vm2995_vm4, %v3447_v12 }
 0xb36   :  { %v3449_v48 = vpop.permute.xlu1 %3448 }
 0xb37   :  { %4229 = vmatmul.mubr.msk.bf16.vlgmr.msra.gmra.mrb[80].mxu0 %vm2995_vm4, %v3449_v48 }
 0xc0a   :  { %v4230_v2 = vpop.f32.mrb[80].mxu0 }
 0xc0b   :  { %v3511_v51 = vadd.f32 %v4230_v2, %v4175_v26  ;;  %v3502_v54 = vpop.f32.mrb[81].mxu0 }
 0xc0c   :  { %v4231_v39 = vpop.f32.mrb[82].mxu0  ;;  %v3503_v52 = vadd.f32 %v4175_v26, %v3502_v54 }
 0xc0d   :  { %3683 = vperm.xlu1 %4507, %v3511_v51   ;;  %v3505_v0 = vpop.f32.mrb[83].mxu0  ;;  %v3523_v57 = vsel %vm3520_vm6, %v3511_v51, -1e+30  ;;  %v3514_v59 = vadd.f32 %v4231_v39, %v4175_v26 }
 0xc0e   :  { %3529 = vmax.xlane.f32.xlu0 %v3523_v57  ;;  %v3521_v21 = vsel %vm3520_vm6, %v3503_v52, -1e+30  ;;  %v3506_v61 = vadd.f32 %v4175_v26, %v3505_v0 }
 0xc0f   :  { %v3524_v27 = vsel %vm3520_vm6, %v3514_v59, -1e+30 }
 0xc10   :  { %v3522_v24 = vsel %vm3520_vm6, %v3506_v61, -1e+30 }
 0xc11   :  { %3673 = vperm.xlu1 %4507, %v3503_v52  }
 0xc12   :  { %3525 = vmax.xlane.f32.xlu0 %v3521_v21 }
 0xc15   :  { %3688 = vperm.xlu1 %4507, %v3514_v59  }
 0xc16   :  { %3531 = vmax.xlane.f32.xlu0 %v3524_v27 }
 0xc2c   :  { %3678 = vperm.xlu0 %4508, %v3506_v61  }
 0xc39   :  { %3527 = vmax.xlane.f32.xlu1 %v3522_v24 }
 0xc4a   :  { %3748 = vrot.lane.b32.xlu1 %v3427_v20, %s4829_s16 }
 0xc8c   :  { %v6127_v50 = vpop.permute.xlu1 %3683 }
 0xc90   :  { %v6131_v58 = vpop.permute.xlu1 %3673 }
 0xc94   :  { %v6135_v36 = vpop.permute.xlu1 %3688 }
 0xc9b   :  { %v3530_v9 = vpop.xlane.xlu0 %3529 }
 0xc9c   :  { %v6112_v10 = vsub.f32 %v3523_v57, %v3530_v9  ;;  %vm3595_vm7 = vcmp.eq.f32.partialorder %v3523_v57, %v3530_v9 }
 0xc9d   :  { %v3599_v47 = vsel %vm3595_vm7, %v6110_v63, 128.0 }
 0xc9e   :  { %v3541_v13 = vmul.f32 1.442695, %v6112_v10  ;;  %3605 = vmin.xlane.f32.xlu1 %v3599_v47 }
 0xc9f   :  { %v3526_v46 = vpop.xlane.xlu0 %3525 }
 0xca0   :  { %4779 = vpow2.f32 %v3541_v13  ;;  %v6116_v5 = vsub.f32 %v3521_v21, %v3526_v46  ;;  %vm3593_vm8 = vcmp.eq.f32.partialorder %v3521_v21, %v3526_v46 }
 0xca1   :  { %v3597_v16 = vsel %vm3593_vm8, %v6110_v63, 128.0 }
 0xca2   :  { %v3537_v17 = vmul.f32 1.442695, %v6116_v5  ;;  %3601 = vmin.xlane.f32.xlu1 %v3597_v16 }
 0xca3   :  { %v3532_v3 = vpop.xlane.xlu0 %3531 }
 0xca4   :  { %4781 = vpow2.f32 %v3537_v17  ;;  %vm3596_vm9 = vcmp.eq.f32.partialorder %v3524_v27, %v3532_v3  ;;  %v6129_v7 = vsub.f32 %v3524_v27, %v3532_v3 }
 0xca5   :  { %v3600_v18 = vsel %vm3596_vm9, %v6110_v63, 128.0 }
 0xca6   :  { %3607 = vmin.xlane.f32.xlu0 %v3600_v18  ;;  %v3543_v1 = vmul.f32 1.442695, %v6129_v7 }
 0xca8   :  { %4783 = vpow2.f32 %v3543_v1 }
 0xcaa   :  { %v6121_v40 = vpop.eup %4779 }
 0xcab   :  { %3549 = vadd.xlane.f32.xlu1 %v6121_v40 }
 0xcae   :  { %v6124_v29 = vpop.eup %4781 }
 0xcaf   :  { %3545 = vadd.xlane.f32.xlu1 %v6124_v29 }
 0xcb2   :  { %v6145_v56 = vpop.eup %4783 }
 0xcc0   :  { %3752 = vrot.lane.b32.xlu1 %v3429_v45, %s4829_s16 }
 0xcc4   :  { %3754 = vrot.lane.b32.xlu1 %v6086_v32, %s4829_s16 }
 0xcc6   :  { %v3528_v44 = vpop.xlane.xlu1 %3527 }
 0xcc7   :  { %v6139_v31 = vsub.f32 %v3522_v24, %v3528_v44  ;;  %vm3594_vm10 = vcmp.eq.f32.partialorder %v3522_v24, %v3528_v44 }
 0xcc8   :  { %3764 = vrot.lane.b32.xlu1 %v5988_v41, %s4830_s1  ;;  %v3598_v55 = vsel %vm3594_vm10, %v6110_v63, 128.0 }
 0xcc9   :  { %v3539_v35 = vmul.f32 1.442695, %v6139_v31  ;;  %3603 = vmin.xlane.f32.xlu0 %v3598_v55 }
 0xccb   :  { %4785 = vpow2.f32 %v3539_v35 }
 0xccc   :  { %3766 = vrot.lane.b32.xlu1 %v5993_v4, %s4830_s1  ;;  %v6163_v4 = vpop.permute.xlu1 %3748 }
 0xccd   :  { %3551 = vadd.xlane.f32.xlu0 %v6145_v56 }
 0xcd0   :  { %3770 = vrot.lane.b32.xlu1 %v5997_v62, %s4830_s1  ;;  %v3633_v62 = vld [vmem:[%s6352_s12] sm:$0x3] }
 0xcd4   :  { %3782 = vrot.lane.b32.xlu1 %v6066_v8, %s4829_s16  ;;  %v6169_v8 = vrot.slane %v3633_v62, %v5339_v23 }
 0xcd5   :  { %v6154_v41 = vpop.eup %4785 }
 0xcd6   :  { %3547 = vadd.xlane.f32.xlu0 %v6154_v41 }
 0xcec   :  { %3750 = vrot.lane.b32.xlu0 %v6083_v14, %s4829_s16  ;;  %v6177_v14 = vpop.permute.xlu0 %3678 }
 0xcf0   :  { %3768 = vrot.lane.b32.xlu0 %v5991_v53, %s4830_s1 }
 0xcf4   :  { %3780 = vrot.lane.b32.xlu0 %v6061_v30, %s4829_s16  ;;  %v3653_v30 = vrot.slane %v3633_v62, %v5344_v25 }
 0xd2b   :  { %v6171_v6 = vpop.xlane.xlu1 %3605 }
 0xd2c   :  { %vm3611_vm11 = vcmp.eq.f32.partialorder %v6110_v63, %v6171_v6 }
 0xd2d   :  { %v4182_v20 = vsel %vm3611_vm11, 1.0, %v4832_v60 }
 0xd2e   :  { %v3640_v53 = vmul.f32 %v4182_v20, %v6169_v8  ;;  %v3656_v23 = vmul.f32 %v4182_v20, %v3653_v30 }
 0xd2f   :  { %v6179_v15 = vpop.xlane.xlu1 %3601 }
 0xd30   :  { %vm3609_vm12 = vcmp.eq.f32.partialorder %v6110_v63, %v6179_v15  ;;  %3646 = vadd.xlane.f32.xlu1 %v3640_v53 }
 0xd31   :  { %v4180_v42 = vsel %vm3609_vm12, 1.0, %v4832_v60 }
 0xd32   :  { %v3638_v25 = vmul.f32 %v4180_v42, %v6169_v8  ;;  %v3654_v12 = vmul.f32 %v4180_v42, %v3653_v30 }
 0xd33   :  { %v6183_v43 = vpop.xlane.xlu0 %3607 }
 0xd34   :  { %vm3612_vm13 = vcmp.eq.f32.partialorder %v6110_v63, %v6183_v43  ;;  %3662 = vadd.xlane.f32.xlu1 %v3656_v23 }
 0xd35   :  { %v6187_v45 = vsel %vm3612_vm13, 1.0, %v4832_v60 }
 0xd36   :  { %v3641_v32 = vmul.f32 %v6187_v45, %v6169_v8  ;;  %v3657_v37 = vmul.f32 %v6187_v45, %v3653_v30 }
 0xd38   :  { %v3550_v11 = vpop.xlane.xlu1 %3549  ;;  %3642 = vadd.xlane.f32.xlu1 %v3638_v25  ;;  %3648 = vadd.xlane.f32.xlu0 %v3641_v32 }
 0xd39   :  { %4787 = vlog2.f32 %v3550_v11 }
 0xd3a   :  { %4789 = vrcp.f32 %v3550_v11 }
 0xd3c   :  { %3658 = vadd.xlane.f32.xlu1 %v3654_v12  ;;  %v3546_v48 = vpop.xlane.xlu1 %3545 }
 0xd3d   :  { %4791 = vlog2.f32 %v3546_v48 }
 0xd3e   :  { %4793 = vrcp.f32 %v3546_v48 }
 0xd40   :  { %v3753_v26 = vpop.permute.xlu1 %3752  ;;  %3664 = vadd.xlane.f32.xlu1 %v3657_v37 }
 0xd43   :  { %v4788_v2 = vpop.eup %4787 }
 0xd44   :  { %v4790_v51 = vpop.eup %4789  ;;  %v3558_v54 = vmul.f32 0.6931472, %v4788_v2  ;;  %v3755_v39 = vpop.permute.xlu1 %3754 }
 0xd45   :  { %v3570_v57 = vmul.f32 %v4790_v51, %v6121_v40  ;;  %v3795_v46 = vsel %vm2995_vm4, %v6032_v34, %v3755_v39 }
 0xd46   :  { %v3563_v52 = vsub.f32 %v6112_v10, %v3558_v54 }
 0xd47   :  { %v4792_v0 = vpop.eup %4791 }
 0xd48   :  { %3668 = vst [vmem:[%s6353_s13 + $0x10] sm:$0xff] %v3563_v52  ;;  %v3554_v59 = vmul.f32 0.6931472, %v4792_v0  ;;  %v3765_v21 = vpop.permute.xlu1 %3764  ;;  %v3623_v27 = vmul.f32 %v4182_v20, %v3563_v52  ;;  %v3575_v61 = vmul.f32 %v3570_v57, %v3563_v52  ;;  %v4794_v9 = vpop.eup %4793 }
 0xd49   :  { %v3566_v13 = vmul.f32 %v4794_v9, %v6124_v29 }
 0xd4a   :  { %v3561_v24 = vsub.f32 %v6116_v5, %v3554_v59  ;;  %3629 = vadd.xlane.f32.xlu1 %v3623_v27  ;;  %v3579_v47 = vsel %vm3520_vm6, %v3575_v61, 0.0  ;;  %v3693_v27 = vsel %vm3670_vm15, %v6127_v50, 0.0 }
 0xd4c   :  { %3666 = vst [vmem:[%s6353_s13] sm:$0xff] %v3561_v24  ;;  %v3767_v10 = vpop.permute.xlu1 %3766  ;;  %v3621_v17 = vmul.f32 %v4180_v42, %v3561_v24  ;;  %v3573_v3 = vmul.f32 %v3566_v13, %v3561_v24 }
 0xd4e   :  { %3585 = vadd.xlane.f32.xlu1 %v3579_v47  ;;  %v3577_v18 = vsel %vm3520_vm6, %v3573_v3, 0.0  ;;  %v3716_v47 = vsel %vm3713_vm2, %v6171_v6, 0.0  ;;  %v3691_v3 = vsel %vm3670_vm15, %v6131_v58, 0.0 }
 0xd50   :  { %v3771_v16 = vpop.permute.xlu1 %3770 }
 0xd51   :  { %v6208_v5 = vsel %vm3041_vm5, %v3795_v46, %v3771_v16 }
 0xd52   :  { %3625 = vadd.xlane.f32.xlu1 %v3621_v17 }
 0xd56   :  { %3581 = vadd.xlane.f32.xlu1 %v3577_v18  ;;  %v6212_v40 = vpop.xlane.xlu0 %3603 }
 0xd57   :  { %vm3610_vm14 = vcmp.eq.f32.partialorder %v6110_v63, %v6212_v40 }
 0xd58   :  { %v4181_v29 = vsel %vm3610_vm14, 1.0, %v4832_v60  ;;  %v3783_v60 = vpop.permute.xlu1 %3782 }
 0xd59   :  { %v3639_v1 = vmul.f32 %v4181_v29, %v6169_v8  ;;  %v3655_v44 = vmul.f32 %v4181_v29, %v3653_v30 }
 0xd5a   :  { %v3552_v34 = vpop.xlane.xlu0 %3551 }
 0xd5b   :  { %4795 = vlog2.f32 %v3552_v34  ;;  %3644 = vadd.xlane.f32.xlu0 %v3639_v1 }
 0xd5c   :  { %4797 = vrcp.f32 %v3552_v34 }
 0xd5f   :  { %3660 = vadd.xlane.f32.xlu0 %v3655_v44 }
 0xd63   :  { %v3548_v55 = vpop.xlane.xlu0 %3547 }
 0xd64   :  { %4799 = vlog2.f32 %v3548_v55 }
 0xd65   :  { %v4796_v35 = vpop.eup %4795  ;;  %4801 = vrcp.f32 %v3548_v55 }
 0xd66   :  { %v4798_v62 = vpop.eup %4797  ;;  %v3560_v20 = vmul.f32 0.6931472, %v4796_v35  ;;  %v3714_v35 = vsel %vm3713_vm2, %v6179_v15, 0.0  ;;  %v3694_v15 = vsel %vm3670_vm15, %v6135_v36, 0.0 }
 0xd67   :  { %3786 = vrot.lane.b32.xlu1 %v6070_v22, %s4829_s16  ;;  %v3751_v53 = vpop.permute.xlu0 %3750  ;;  %v3572_v30 = vmul.f32 %v4798_v62, %v6145_v56  ;;  %v3794_v22 = vsel %vm2995_vm4, %v6030_v33, %v3753_v26  ;;  %v3792_v56 = vsel %vm2995_vm4, %v6020_v19, %v6163_v4 }
 0xd68   :  { %v3793_v63 = vsel %vm2995_vm4, %v6022_v28, %v3751_v53  ;;  %v3564_v8 = vsub.f32 %v6129_v7, %v3560_v20  ;;  %v3796_v12 = vsel %vm3041_vm5, %v3792_v56, %v3765_v21  ;;  %vm3722_vm4 = vcmp.eq.s32.totalorder %v6094_v38, 4 }
 0xd69   :  { %v3797_v23 = vsel %vm3041_vm5, %v3793_v63, %v3767_v10 }
 0xd6a   :  { %v3801_v42 = vsel %vm2668_vm3, %v3797_v23, %v3783_v60  ;;  %v3624_v25 = vmul.f32 %v6187_v45, %v3564_v8  ;;  %3669 = vst [vmem:[%s6353_s13 + $0x18] sm:$0xff] %v3564_v8  ;;  %v3576_v32 = vmul.f32 %v3572_v30, %v3564_v8 }
 0xd6b   :  { %3805 = vst [vmem:[#allocation2 + $0x8] sm:$0xff] %v3801_v42  ;;  %v3769_v28 = vpop.permute.xlu0 %3768 }
 0xd6c   :  { %v6232_v7 = vsel %vm3041_vm5, %v3794_v22, %v3769_v28  ;;  %3631 = vadd.xlane.f32.xlu0 %v3624_v25  ;;  %v3580_v33 = vsel %vm3520_vm6, %v3576_v32, 0.0  ;;  %vm3731_vm5 = vcmp.eq.s32.totalorder %v6094_v38, 5 }
 0xd6e   :  { %v4800_v11 = vpop.eup %4799 }
 0xd6f   :  { %v4802_v45 = vpop.eup %4801  ;;  %v3556_v48 = vmul.f32 0.6931472, %v4800_v11  ;;  %v3781_v37 = vpop.permute.xlu0 %3780 }
 0xd70   :  { %v3800_v26 = vsel %vm2668_vm3, %v3796_v12, %v3781_v37  ;;  %3587 = vadd.xlane.f32.xlu0 %v3580_v33  ;;  %v3568_v51 = vmul.f32 %v4802_v45, %v6154_v41  ;;  %v3717_v45 = vsel %vm3713_vm2, %v6183_v43, 0.0 }
 0xd71   :  { %3804 = vst [vmem:[#allocation2] sm:$0xff] %v3800_v26  ;;  %v3562_v2 = vsub.f32 %v6139_v31, %v3556_v48 }
 0xd73   :  { %v3622_v54 = vmul.f32 %v4181_v29, %v3562_v2  ;;  %3667 = vst [vmem:[%s6353_s13 + $0x8] sm:$0xff] %v3562_v2  ;;  %v3574_v19 = vmul.f32 %v3568_v51, %v3562_v2  ;;  %v3692_v2 = vsel %vm3670_vm15, %v6177_v14, 0.0  ;;  %v3715_v14 = vsel %vm3713_vm2, %v6212_v40, 0.0 }
 0xd75   :  { %3627 = vadd.xlane.f32.xlu0 %v3622_v54  ;;  %v3578_v4 = vsel %vm3520_vm6, %v3574_v19, 0.0 }
 0xd79   :  { %3583 = vadd.xlane.f32.xlu0 %v3578_v4 }
 0xd8f   :  { %3784 = vrot.lane.b32.xlu0 %v6064_v49, %s4829_s16 }
 0xdbd   :  { %v3647_v39 = vpop.xlane.xlu1 %3646 }
 0xdbe   :  { %v3725_v46 = vsel %vm3722_vm4, %v3647_v39, 0.0 }
 0xdc1   :  { %v3663_v52 = vpop.xlane.xlu1 %3662 }
 0xdc2   :  { %v3734_v18 = vsel %vm3731_vm5, %v3663_v52, 0.0 }
 0xdc5   :  { %v3643_v0 = vpop.xlane.xlu1 %3642  ;;  %v3649_v62 = vpop.xlane.xlu0 %3648 }
 0xdc6   :  { %v3723_v53 = vsel %vm3722_vm4, %v3643_v0, 0.0  ;;  %v3726_v48 = vsel %vm3722_vm4, %v3649_v62, 0.0 }
 0xdc9   :  { %v3659_v31 = vpop.xlane.xlu1 %3658 }
 0xdca   :  { %v3732_v8 = vsel %vm3731_vm5, %v3659_v31, 0.0 }
 0xdcd   :  { %v3665_v57 = vpop.xlane.xlu1 %3664 }
 0xdce   :  { %v3735_v26 = vsel %vm3731_vm5, %v3665_v57, 0.0 }
 0xdd7   :  { %v3630_v41 = vpop.xlane.xlu1 %3629 }
 0xdd8   :  { %v3707_v9 = vsel %vm3704_vm1, %v3630_v41, 0.0 }
 0xddb   :  { %v3586_v59 = vpop.xlane.xlu1 %3585 }
 0xddc   :  { %v3591_v21 = vsub.f32 0.0, %v3586_v59 }
 0xdde   :  { %v3698_v49 = vsel %vm3695_vm0, %v3591_v21, 0.0 }
 0xddf   :  { %v3702_v61 = vadd.f32 %v3698_v49, %v3693_v27  ;;  %v3626_v24 = vpop.xlane.xlu1 %3625 }
 0xde0   :  { %v3705_v44 = vsel %vm3704_vm1, %v3626_v24, 0.0 }
 0xde1   :  { %v3711_v10 = vadd.f32 %v3707_v9, %v3702_v61 }
 0xde3   :  { %v3720_v50 = vadd.f32 %v3716_v47, %v3711_v10  ;;  %v3582_v13 = vpop.xlane.xlu1 %3581 }
 0xde4   :  { %v3589_v16 = vsub.f32 0.0, %v3582_v13 }
 0xde5   :  { %v3729_v17 = vadd.f32 %v3725_v46, %v3720_v50 }
 0xde6   :  { %v3696_v29 = vsel %vm3695_vm0, %v3589_v16, 0.0 }
 0xde7   :  { %v3738_v6 = vadd.f32 %v3734_v18, %v3729_v17  ;;  %v3700_v1 = vadd.f32 %v3696_v29, %v3691_v3  ;;  %v3787_v34 = vpop.permute.xlu1 %3786 }
 0xde8   :  { %v3803_v55 = vsel %vm2668_vm3, %v6208_v5, %v3787_v34  ;;  %v3645_v60 = vpop.xlane.xlu0 %3644 }
 0xde9   :  { %3742 = vst [vmem:[%s6354_s14 + $0x10] sm:$0xff] %v3738_v6  ;;  %v3709_v58 = vadd.f32 %v3705_v44, %v3700_v1  ;;  %3807 = vst [vmem:[#allocation2 + $0x18] sm:$0xff] %v3803_v55 }
 0xdeb   :  { %v3718_v20 = vadd.f32 %v3714_v35, %v3709_v58 }
 0xdec   :  { %v3661_v23 = vpop.xlane.xlu0 %3660 }
 0xded   :  { %v3727_v63 = vadd.f32 %v3723_v53, %v3718_v20 }
 0xdef   :  { %v3736_v5 = vadd.f32 %v3732_v8, %v3727_v63 }
 0xdf1   :  { %3740 = vst [vmem:[%s6354_s14] sm:$0xff] %v3736_v5 }
 0xdf9   :  { %v3632_v30 = vpop.xlane.xlu0 %3631 }
 0xdfa   :  { %v3708_v32 = vsel %vm3704_vm1, %v3632_v30, 0.0 }
 0xdfd   :  { %v3588_v42 = vpop.xlane.xlu0 %3587 }
 0xdfe   :  { %v3592_v25 = vsub.f32 0.0, %v3588_v42 }
 0xe00   :  { %v3699_v22 = vsel %vm3695_vm0, %v3592_v25, 0.0 }
 0xe01   :  { %v3703_v28 = vadd.f32 %v3699_v22, %v3694_v15 }
 0xe02   :  { %v3628_v11 = vpop.xlane.xlu0 %3627 }
 0xe03   :  { %v3712_v56 = vadd.f32 %v3708_v32, %v3703_v28  ;;  %v3706_v4 = vsel %vm3704_vm1, %v3628_v11, 0.0 }
 0xe05   :  { %v3721_v12 = vadd.f32 %v3717_v45, %v3712_v56 }
 0xe06   :  { %v3584_v37 = vpop.xlane.xlu0 %3583 }
 0xe07   :  { %v3730_v36 = vadd.f32 %v3726_v48, %v3721_v12  ;;  %v3590_v33 = vsub.f32 0.0, %v3584_v37 }
 0xe09   :  { %v3739_v51 = vadd.f32 %v3735_v26, %v3730_v36  ;;  %v3697_v43 = vsel %vm3695_vm0, %v3590_v33, 0.0 }
 0xe0a   :  { %v3701_v54 = vadd.f32 %v3697_v43, %v3692_v2  ;;  %v3785_v19 = vpop.permute.xlu0 %3784 }
 0xe0b   :  { %3743 = vst [vmem:[%s6354_s14 + $0x18] sm:$0xff] %v3739_v51  ;;  %v3802_v39 = vsel %vm2668_vm3, %v6232_v7, %v3785_v19 }
 0xe0c   :  { %v3710_v52 = vadd.f32 %v3706_v4, %v3701_v54  ;;  %3806 = vst [vmem:[#allocation2 + $0x10] sm:$0xff] %v3802_v39 }
 0xe0d   :  { %4814 = shalt.err (!%p4811_p4)
}
 0xe0e   :  { %s4815_s7 = scalar_lea.hbm %s6355_s15, 512 }
 0xe0f   :  { %p4816_p5 = scmp.ne.s32.totalorder %s6355_s15, %s4815_s7  ;;  %p4819_p6 = scmp.lt.u32.totalorder %s4815_s7, %s6355_s15 }
 0xe11   :  { %p4821_p7 = pnand %p4819_p6, %p4816_p5 }
 0xe13   :  { %4824 = shalt.err (!%p4821_p7)
}
 0xe14   :  { %s4834_s21 = smov 128   ;;  %s4835_s10 = smov 8   ;;  %v3719_v40 = vadd.f32 %v3715_v14, %v3710_v52  ;;  %v3724_v7 = vsel %vm3722_vm4, %v3645_v60, 0.0  ;;  %v3733_v31 = vsel %vm3731_vm5, %v3661_v23, 0.0 }
 0xe15   :  { %3823 = dma.vmem_to_hbm [thread:$0]  %s3818_s28, 512, %s6355_s15, [#allocation3], %s4834_s21, %s4834_s21, %s4835_s10  }
 0xe16   :  { %v3728_v0 = vadd.f32 %v3724_v7, %v3719_v40 }
 0xe18   :  { %v3737_v57 = vadd.f32 %v3733_v31, %v3728_v0 }
 0xe1a   :  { %3741 = vst [vmem:[%s6354_s14 + $0x8] sm:$0xff] %v3737_v57 }
 0xe1b   :  { %4825 = dma.done.wait [#allocation3], 512  }
 0xe1c   :  { %4826 = vsyncadd [#allocation3], 4294966784 }
 0xe1d   :  { %3831 = vsyncpa [#allocation3], 1 }

</bundles_post_ra>
